<compile_context>
chip_gen: v5e
topology: v5e:2x2
jax: 0.10.0
libtpu: 0.0.40
codegen_flags: <defaults>
</compile_context>

<pallas_src>
import functools

import jax
import jax.numpy as jnp
from jax.experimental import pallas as pl
from jax.experimental.pallas import tpu as pltpu

_LANE = 128
_SUBLANE = 8
_TARGET_IN_BYTES = 4 * 1024 * 1024     # per-block input slab (~roofline-saturating)
_WORKSET_CAP = 20 * 1024 * 1024        # per-block VMEM working-set cap (v7x-safe)


def _round_up(x, m):
    return (x + m - 1) // m * m


def _vmem_limit_bytes():
    """Scoped-VMEM limit: ~3/4 of physical VMEM, clamped to [32 MiB, 96 MiB]."""
    try:
        phys = getattr(pltpu.get_tpu_info(), "vmem_capacity_bytes", None)
    except Exception:
        phys = None
    if not phys:
        return 48 * 1024 * 1024        # safe default (v7x physical VMEM = 64 MiB)
    return int(min(96 << 20, max(32 << 20, (phys * 3) // 4)))


_VMEM_LIMIT = _vmem_limit_bytes()


def _make_pool_kernel(w, strided):
    """Pool one block of independent (N*C) rows.

    x_ref: (TR, OH, 2*W)  -- adjacent H rows pre-folded into lanes (free view).
    o_ref: (TR, OH, OW) or lane-dense flattened (TR, OH*OW).
    """
    ow = w // 2

    def kernel(x_ref, o_ref):
        if strided:
            # Fused 2x2 max tree: four lane-strided taps straight off the block.
            a = x_ref[:, :, pl.ds(0, ow, stride=2)]        # row 2i,   even cols
            b = x_ref[:, :, pl.ds(1, ow, stride=2)]        # row 2i,   odd  cols
            c = x_ref[:, :, pl.ds(w, ow, stride=2)]        # row 2i+1, even cols
            d = x_ref[:, :, pl.ds(w + 1, ow, stride=2)]    # row 2i+1, odd  cols
            o = jnp.maximum(jnp.maximum(a, b), jnp.maximum(c, d))
        else:
            # Fallback: contiguous lane-half H pool + reshape-based W pool.
            x = x_ref[...]
            xh = jnp.maximum(x[:, :, :w], x[:, :, w:])
            x4 = xh.reshape(xh.shape[0], xh.shape[1], ow, 2)
            o = jnp.maximum(x4[..., 0], x4[..., 1])
        o_ref[...] = o.reshape(o_ref.shape)

    return kernel


def _choose_row_tile(r, in_row, per_row, need_mult8):
    tr = max(1, _TARGET_IN_BYTES // max(in_row, 1))
    tr = min(tr, max(1, _WORKSET_CAP // max(per_row, 1)))
    tr = min(tr, r)
    # Keep several blocks in flight (DMA pipelining / both v7x TensorCores)
    # once there is enough data for it to matter.
    if r >= 64:
        tr = min(tr, -(-r // 8))
    elif r >= 16:
        tr = min(tr, -(-r // 4))
    # A flattened (TR, OH*OW) output makes TR one of the (8,128)-tiled dims.
    if need_mult8 and tr != r:
        tr = r if r < _SUBLANE else max(_SUBLANE, (tr // _SUBLANE) * _SUBLANE)
    return int(max(1, min(tr, r)))


@functools.partial(jax.jit, static_argnames=("strided", "flat_ok"))
def _down_impl(x, strided, flat_ok):
    n, c, h, w = x.shape
    oh, ow = h // 2, w // 2
    if oh == 0 or ow == 0 or n * c == 0:
        return jnp.zeros((n, c, oh, ow), x.dtype)
    if (h % 2) or (w % 2):             # match PyTorch MaxPool2d(2): floor odd dims
        x = x[:, :, : 2 * oh, : 2 * ow]
        h, w = 2 * oh, 2 * ow

    r = n * c
    isz = jnp.dtype(x.dtype).itemsize
    flat_out = flat_ok and ow < _LANE  # lane-dense output when the plane is narrow

    xr = x.reshape(r, oh, 2 * w)       # free contiguous view: H-row pairs -> lanes

    in_row = _round_up(oh, _SUBLANE) * _round_up(2 * w, _LANE) * isz
    tap_row = _round_up(oh, _SUBLANE) * _round_up(ow, _LANE) * isz
    out_row = _round_up(oh * ow, _LANE) * isz if flat_out else tap_row
    per_row = 2 * in_row + 6 * tap_row + 2 * out_row   # dbl-buf in/out + temps
    tr = _choose_row_tile(r, in_row, per_row, need_mult8=flat_out)
    num_blocks = pl.cdiv(r, tr)        # partial last block is masked by Pallas

    if flat_out:
        out_shape = jax.ShapeDtypeStruct((r, oh * ow), x.dtype)
        out_spec = pl.BlockSpec((tr, oh * ow), lambda i: (i, 0))
    else:
        out_shape = jax.ShapeDtypeStruct((r, oh, ow), x.dtype)
        out_spec = pl.BlockSpec((tr, oh, ow), lambda i: (i, 0, 0))

    out = pl.pallas_call(
        _make_pool_kernel(w, strided),
        out_shape=out_shape,
        grid=(num_blocks,),
        in_specs=[pl.BlockSpec((tr, oh, 2 * w), lambda i: (i, 0, 0))],
        out_specs=out_spec,
        compiler_params=pltpu.CompilerParams(
            dimension_semantics=("parallel",),
            vmem_limit_bytes=_VMEM_LIMIT,
        ),
    )(xr)

    return out.reshape(n, c, oh, ow)


# Preference-ordered configs: (strided taps, lane-dense flattened output).
# The first config that lowers cleanly on this jax/libtpu stays for all calls.
_CONFIGS = ((True, True), (False, True), (True, False), (False, False))
_CFG_IDX = 0


def down_forward(x):
    """Down.forward(x) == F.max_pool2d(x, kernel_size=2, stride=2), NCHW."""
    global _CFG_IDX
    while True:
        strided, flat_ok = _CONFIGS[_CFG_IDX]
        try:
            return _down_impl(x, strided=strided, flat_ok=flat_ok)
        except Exception:
            if _CFG_IDX == len(_CONFIGS) - 1:
                raise
            _CFG_IDX += 1


def _reference_pool(x):
    n, c, h, w = x.shape
    oh, ow = h // 2, w // 2
    xc = x[:, :, : 2 * oh, : 2 * ow]
    return jnp.max(xc.reshape(n, c, oh, 2, ow, 2), axis=(3, 5))


if __name__ == "__main__":
    # `Down` has no learnable parameters (only MaxPool2d), nothing to init.
    k1, k2, k3 = jax.random.split(jax.random.PRNGKey(0), 3)

    # Spec-sized input: folded lane-dense input + flattened lane-dense output.
    x = jax.random.normal(k1, (2, 4, 16, 16), dtype=jnp.float32)
    y = jax.block_until_ready(down_forward(x))
    assert y.shape == (2, 4, 8, 8)
    assert jnp.allclose(y, _reference_pool(x)), "mismatch vs reference (f32 16x16)"

    # N*C chosen so the row tile does not divide it -> exercises the masked
    # partial last block (no wrapper-side padding pass anymore).
    x2 = jax.random.normal(k2, (3, 23, 16, 16), dtype=jnp.float32)
    y2 = jax.block_until_ready(down_forward(x2))
    assert y2.shape == (3, 23, 8, 8)
    assert jnp.allclose(y2, _reference_pool(x2)), "mismatch on partial-block case"

    # Wide plane (W >= 128): 3-D lane-dense output path.
    x3 = jax.random.normal(k3, (2, 2, 8, 256), dtype=jnp.float32)
    y3 = jax.block_until_ready(down_forward(x3))
    assert y3.shape == (2, 2, 4, 128)
    assert jnp.allclose(y3, _reference_pool(x3)), "mismatch on wide-plane case"

    # bf16 passes through unchanged (max pooling is exact in any dtype).
    xb = jax.random.normal(k1, (2, 4, 16, 16), dtype=jnp.bfloat16)
    yb = jax.block_until_ready(down_forward(xb))
    assert yb.dtype == jnp.bfloat16
    assert jnp.array_equal(yb, _reference_pool(xb)), "mismatch on bf16 case"

    print("KERNEL_OK")
</pallas_src>

<mosaic_0001>
module attributes {stable_mosaic.version = 11 : i64} {
  func.func @kernel(%arg0: i32, %arg1: memref<8x8x32xf32, #tpu.memory_space<vmem>>, %arg2: memref<8x64xf32, #tpu.memory_space<vmem>>) attributes {dimension_semantics = [#tpu.dimension_semantics<parallel>], iteration_bounds = array<i64: 1>, scalar_prefetch = 0 : i64, scratch_operands = 0 : i64, tpu.core_type = #tpu.core_type<tc>, window_params = [{transform_indices = @transform_0, window_bounds = array<i64: 8, 8, 32>}, {transform_indices = @transform_1, window_bounds = array<i64: 8, 64>}]} {
    %c0 = arith.constant 0 : index
    %c0_0 = arith.constant 0 : index
    %c0_1 = arith.constant 0 : index
    %0 = tpu.strided_load %arg1[%c0, %c0_0, %c0_1] {strides = array<i32: 1, 1, 2>} : memref<8x8x32xf32, #tpu.memory_space<vmem>>, vector<8x8x8xf32>
    %c0_2 = arith.constant 0 : index
    %c0_3 = arith.constant 0 : index
    %c1 = arith.constant 1 : index
    %1 = tpu.strided_load %arg1[%c0_2, %c0_3, %c1] {strides = array<i32: 1, 1, 2>} : memref<8x8x32xf32, #tpu.memory_space<vmem>>, vector<8x8x8xf32>
    %c0_4 = arith.constant 0 : index
    %c0_5 = arith.constant 0 : index
    %c16 = arith.constant 16 : index
    %2 = tpu.strided_load %arg1[%c0_4, %c0_5, %c16] {strides = array<i32: 1, 1, 2>} : memref<8x8x32xf32, #tpu.memory_space<vmem>>, vector<8x8x8xf32>
    %c0_6 = arith.constant 0 : index
    %c0_7 = arith.constant 0 : index
    %c17 = arith.constant 17 : index
    %3 = tpu.strided_load %arg1[%c0_6, %c0_7, %c17] {strides = array<i32: 1, 1, 2>} : memref<8x8x32xf32, #tpu.memory_space<vmem>>, vector<8x8x8xf32>
    %4 = arith.maximumf %0, %1 : vector<8x8x8xf32>
    %5 = arith.maximumf %2, %3 : vector<8x8x8xf32>
    %6 = arith.maximumf %4, %5 : vector<8x8x8xf32>
    %7 = vector.shape_cast %6 : vector<8x8x8xf32> to vector<8x64xf32>
    %c0_8 = arith.constant 0 : index
    %c0_9 = arith.constant 0 : index
    %8 = vector.load %arg2[%c0_8, %c0_9] : memref<8x64xf32, #tpu.memory_space<vmem>>, vector<8x64xf32>
    tpu.vector_store %arg2[%c0_8, %c0_9], %7 {strides = array<i32>} : memref<8x64xf32, #tpu.memory_space<vmem>>, vector<8x64xf32>,
    return
  }
  func.func @transform_0(%arg0: i32) -> (i32, i32, i32) {
    %c0_i32 = arith.constant 0 : i32
    %c0_i32_0 = arith.constant 0 : i32
    %c0_i32_1 = arith.constant 0 : i32
    return %arg0, %c0_i32, %c0_i32_0 : i32, i32, i32
  }
  func.func @transform_1(%arg0: i32) -> (i32, i32) {
    %c0_i32 = arith.constant 0 : i32
    %c0_i32_0 = arith.constant 0 : i32
    return %arg0, %c0_i32 : i32, i32
  }
}

module attributes {stable_mosaic.version = 11 : i64} {
  func.func @kernel(%arg0: i32, %arg1: memref<8x8x32xf32, #tpu.memory_space<vmem>>, %arg2: memref<8x64xf32, #tpu.memory_space<vmem>>) attributes {dimension_semantics = [#tpu.dimension_semantics<parallel>], iteration_bounds = array<i64: 1>, scalar_prefetch = 0 : i64, scratch_operands = 0 : i64, tpu.core_type = #tpu.core_type<tc>, window_params = [{transform_indices = @transform_0, window_bounds = array<i64: 8, 8, 32>}, {transform_indices = @transform_1, window_bounds = array<i64: 8, 64>}]} {
    %c0 = arith.constant 0 : index
    %c0_0 = arith.constant 0 : index
    %c0_1 = arith.constant 0 : index
    %0 = vector.load %arg1[%c0, %c0_0, %c0_1] : memref<8x8x32xf32, #tpu.memory_space<vmem>>, vector<8x8x32xf32>
    %1 = vector.extract_strided_slice %0 {offsets = [0, 0, 0], sizes = [8, 8, 16], strides = [1, 1, 1]} : vector<8x8x32xf32> to vector<8x8x16xf32>
    %2 = vector.extract_strided_slice %0 {offsets = [0, 0, 16], sizes = [8, 8, 16], strides = [1, 1, 1]} : vector<8x8x32xf32> to vector<8x8x16xf32>
    %3 = arith.maximumf %1, %2 : vector<8x8x16xf32>
    %4 = vector.shape_cast %3 : vector<8x8x16xf32> to vector<8x8x8x2xf32>
    %5 = vector.extract_strided_slice %4 {offsets = [0, 0, 0, 0], sizes = [8, 8, 8, 1], strides = [1, 1, 1, 1]} : vector<8x8x8x2xf32> to vector<8x8x8x1xf32>
    %6 = vector.shape_cast %5 : vector<8x8x8x1xf32> to vector<8x8x8xf32>
    %7 = vector.extract_strided_slice %4 {offsets = [0, 0, 0, 1], sizes = [8, 8, 8, 1], strides = [1, 1, 1, 1]} : vector<8x8x8x2xf32> to vector<8x8x8x1xf32>
    %8 = vector.shape_cast %7 : vector<8x8x8x1xf32> to vector<8x8x8xf32>
    %9 = arith.maximumf %6, %8 : vector<8x8x8xf32>
    %10 = vector.shape_cast %9 : vector<8x8x8xf32> to vector<8x64xf32>
    %c0_2 = arith.constant 0 : index
    %c0_3 = arith.constant 0 : index
    %11 = vector.load %arg2[%c0_2, %c0_3] : memref<8x64xf32, #tpu.memory_space<vmem>>, vector<8x64xf32>
    tpu.vector_store %arg2[%c0_2, %c0_3], %10 {strides = array<i32>} : memref<8x64xf32, #tpu.memory_space<vmem>>, vector<8x64xf32>,
    return
  }
  func.func @transform_0(%arg0: i32) -> (i32, i32, i32) {
    %c0_i32 = arith.constant 0 : i32
    %c0_i32_0 = arith.constant 0 : i32
    %c0_i32_1 = arith.constant 0 : i32
    return %arg0, %c0_i32, %c0_i32_0 : i32, i32, i32
  }
  func.func @transform_1(%arg0: i32) -> (i32, i32) {
    %c0_i32 = arith.constant 0 : i32
    %c0_i32_0 = arith.constant 0 : i32
    return %arg0, %c0_i32 : i32, i32
  }
}

module attributes {stable_mosaic.version = 11 : i64} {
  func.func @kernel(%arg0: i32, %arg1: memref<8x8x32xf32, #tpu.memory_space<vmem>>, %arg2: memref<8x8x8xf32, #tpu.memory_space<vmem>>) attributes {dimension_semantics = [#tpu.dimension_semantics<parallel>], iteration_bounds = array<i64: 1>, scalar_prefetch = 0 : i64, scratch_operands = 0 : i64, tpu.core_type = #tpu.core_type<tc>, window_params = [{transform_indices = @transform_0, window_bounds = array<i64: 8, 8, 32>}, {transform_indices = @transform_1, window_bounds = array<i64: 8, 8, 8>}]} {
    %c0 = arith.constant 0 : index
    %c0_0 = arith.constant 0 : index
    %c0_1 = arith.constant 0 : index
    %0 = tpu.strided_load %arg1[%c0, %c0_0, %c0_1] {strides = array<i32: 1, 1, 2>} : memref<8x8x32xf32, #tpu.memory_space<vmem>>, vector<8x8x8xf32>
    %c0_2 = arith.constant 0 : index
    %c0_3 = arith.constant 0 : index
    %c1 = arith.constant 1 : index
    %1 = tpu.strided_load %arg1[%c0_2, %c0_3, %c1] {strides = array<i32: 1, 1, 2>} : memref<8x8x32xf32, #tpu.memory_space<vmem>>, vector<8x8x8xf32>
    %c0_4 = arith.constant 0 : index
    %c0_5 = arith.constant 0 : index
    %c16 = arith.constant 16 : index
    %2 = tpu.strided_load %arg1[%c0_4, %c0_5, %c16] {strides = array<i32: 1, 1, 2>} : memref<8x8x32xf32, #tpu.memory_space<vmem>>, vector<8x8x8xf32>
    %c0_6 = arith.constant 0 : index
    %c0_7 = arith.constant 0 : index
    %c17 = arith.constant 17 : index
    %3 = tpu.strided_load %arg1[%c0_6, %c0_7, %c17] {strides = array<i32: 1, 1, 2>} : memref<8x8x32xf32, #tpu.memory_space<vmem>>, vector<8x8x8xf32>
    %4 = arith.maximumf %0, %1 : vector<8x8x8xf32>
    %5 = arith.maximumf %2, %3 : vector<8x8x8xf32>
    %6 = arith.maximumf %4, %5 : vector<8x8x8xf32>
    %c0_8 = arith.constant 0 : index
    %c0_9 = arith.constant 0 : index
    %c0_10 = arith.constant 0 : index
    %7 = vector.load %arg2[%c0_8, %c0_9, %c0_10] : memref<8x8x8xf32, #tpu.memory_space<vmem>>, vector<8x8x8xf32>
    tpu.vector_store %arg2[%c0_8, %c0_9, %c0_10], %6 {strides = array<i32>} : memref<8x8x8xf32, #tpu.memory_space<vmem>>, vector<8x8x8xf32>,
    return
  }
  func.func @transform_0(%arg0: i32) -> (i32, i32, i32) {
    %c0_i32 = arith.constant 0 : i32
    %c0_i32_0 = arith.constant 0 : i32
    %c0_i32_1 = arith.constant 0 : i32
    return %arg0, %c0_i32, %c0_i32_0 : i32, i32, i32
  }
  func.func @transform_1(%arg0: i32) -> (i32, i32, i32) {
    %c0_i32 = arith.constant 0 : i32
    %c0_i32_0 = arith.constant 0 : i32
    %c0_i32_1 = arith.constant 0 : i32
    return %arg0, %c0_i32, %c0_i32_0 : i32, i32, i32
  }
}

module attributes {stable_mosaic.version = 11 : i64} {
  func.func @kernel(%arg0: i32, %arg1: memref<8x8x32xf32, #tpu.memory_space<vmem>>, %arg2: memref<8x8x8xf32, #tpu.memory_space<vmem>>) attributes {dimension_semantics = [#tpu.dimension_semantics<parallel>], iteration_bounds = array<i64: 1>, scalar_prefetch = 0 : i64, scratch_operands = 0 : i64, tpu.core_type = #tpu.core_type<tc>, window_params = [{transform_indices = @transform_0, window_bounds = array<i64: 8, 8, 32>}, {transform_indices = @transform_1, window_bounds = array<i64: 8, 8, 8>}]} {
    %c0 = arith.constant 0 : index
    %c0_0 = arith.constant 0 : index
    %c0_1 = arith.constant 0 : index
    %0 = vector.load %arg1[%c0, %c0_0, %c0_1] : memref<8x8x32xf32, #tpu.memory_space<vmem>>, vector<8x8x32xf32>
    %1 = vector.extract_strided_slice %0 {offsets = [0, 0, 0], sizes = [8, 8, 16], strides = [1, 1, 1]} : vector<8x8x32xf32> to vector<8x8x16xf32>
    %2 = vector.extract_strided_slice %0 {offsets = [0, 0, 16], sizes = [8, 8, 16], strides = [1, 1, 1]} : vector<8x8x32xf32> to vector<8x8x16xf32>
    %3 = arith.maximumf %1, %2 : vector<8x8x16xf32>
    %4 = vector.shape_cast %3 : vector<8x8x16xf32> to vector<8x8x8x2xf32>
    %5 = vector.extract_strided_slice %4 {offsets = [0, 0, 0, 0], sizes = [8, 8, 8, 1], strides = [1, 1, 1, 1]} : vector<8x8x8x2xf32> to vector<8x8x8x1xf32>
    %6 = vector.shape_cast %5 : vector<8x8x8x1xf32> to vector<8x8x8xf32>
    %7 = vector.extract_strided_slice %4 {offsets = [0, 0, 0, 1], sizes = [8, 8, 8, 1], strides = [1, 1, 1, 1]} : vector<8x8x8x2xf32> to vector<8x8x8x1xf32>
    %8 = vector.shape_cast %7 : vector<8x8x8x1xf32> to vector<8x8x8xf32>
    %9 = arith.maximumf %6, %8 : vector<8x8x8xf32>
    %c0_2 = arith.constant 0 : index
    %c0_3 = arith.constant 0 : index
    %c0_4 = arith.constant 0 : index
    %10 = vector.load %arg2[%c0_2, %c0_3, %c0_4] : memref<8x8x8xf32, #tpu.memory_space<vmem>>, vector<8x8x8xf32>
    tpu.vector_store %arg2[%c0_2, %c0_3, %c0_4], %9 {strides = array<i32>} : memref<8x8x8xf32, #tpu.memory_space<vmem>>, vector<8x8x8xf32>,
    return
  }
  func.func @transform_0(%arg0: i32) -> (i32, i32, i32) {
    %c0_i32 = arith.constant 0 : i32
    %c0_i32_0 = arith.constant 0 : i32
    %c0_i32_1 = arith.constant 0 : i32
    return %arg0, %c0_i32, %c0_i32_0 : i32, i32, i32
  }
  func.func @transform_1(%arg0: i32) -> (i32, i32, i32) {
    %c0_i32 = arith.constant 0 : i32
    %c0_i32_0 = arith.constant 0 : i32
    %c0_i32_1 = arith.constant 0 : i32
    return %arg0, %c0_i32, %c0_i32_0 : i32, i32, i32
  }
}

</mosaic_0001>

<bundles_post_ra>
// kernel: _down_impl.1
= control target key start
LH: loop header
LB: loop body
LE: loop exit
PB: predicated region body
PF: predicated region fallthrough
CT: control target
= control target key end

     0   :  { %s2024_s10 = smov 112   ;;  %s2025_s23 = smov 126   ;;  %vm233_vm0 = vcmask 1047556   ;;  %vm1771_vm1 = vcmask 1041409   ;;  %vm1773_vm2 = vcmask 1042434   ;;  %vm1775_vm3 = vcmask 1043459   ;;  %s3545_s0 = inlined_call_operand.vmem [shape: f32[8,8,32], index: 0, kind: input, shape index: {}]   ;;  %s3546_s1 = inlined_call_operand.vmem [shape: f32[8,64], index: 1, kind: output, shape index: {}]  }
   0x1   :  { %v10_v0 = vld [vmem:[%s3545_s0 + $0x10] sm:$0xff]  ;;  %v8_v1 = vld [vmem:[%s3545_s0] sm:$0xff]  ;;  %v11_v3 = vld [vmem:[%s3545_s0 + $0x18] sm:$0xff]  ;;  %s2027_s24 = smov 122   ;;  %s2028_s25 = smov 120   ;;  %vm1777_vm4 = vcmask 1044484  }
   0x2   :  { %28 = vrot.lane.b32.xlu1 %v10_v0, %s2024_s10  ;;  %24 = vrot.lane.b32.xlu0 %v8_v1, %s2024_s10  ;;  %v12_v2 = vld [vmem:[%s3545_s0 + $0x20] sm:$0xff]  ;;  %v9_v4 = vld [vmem:[%s3545_s0 + $0x8] sm:$0xff]  ;;  %s2029_s26 = smov 118   ;;  %s2030_s27 = smov 116   ;;  %vm1779_vm5 = vcmask 1045509   ;;  %vm1781_vm6 = vcmask 1046534  }
   0x3   :  { %32 = vrot.lane.b32.xlu2 %v12_v2, %s2024_s10  ;;  %v13_v5 = vld [vmem:[%s3545_s0 + $0x28] sm:$0xff]  ;;  %v14_v6 = vld [vmem:[%s3545_s0 + $0x30] sm:$0xff]  ;;  %v15_v7 = vld [vmem:[%s3545_s0 + $0x38] sm:$0xff]  ;;  %s2026_s0 = smov 124   ;;  %s2031_s28 = smov 114   ;;  %vm1783_vm7 = vcmask 1047559  }
   0x4   :  { %s2034_s29 = smov 127   ;;  %s2036_s30 = smov 8   ;;  %vm1982_vm8 = vcmask 64512   ;;  %vm1984_vm9 = vcmask 130048   ;;  %vm1986_vm10 = vcmask 195584   ;;  %vm1988_vm11 = vcmask 261120  }
   0x5   :  { %s2037_s2 = smov 24   ;;  %s2038_s3 = smov 16   ;;  %vm1990_vm12 = vcmask 326656   ;;  %vm1992_vm13 = vcmask 392192   ;;  %vm1994_vm14 = vcmask 457728   ;;  %vm1996_vm15 = vcmask 523264  }
   0x6   :  { %s2039_s4 = smov 32   ;;  %s2040_s5 = smov 48  }
   0x7   :  { %s2041_s6 = smov 40   ;;  %s2042_s7 = smov 56  }
   0xa   :  { %30 = vrot.lane.b32.xlu1 %v11_v3, %s2024_s10  ;;  %26 = vrot.lane.b32.xlu0 %v9_v4, %s2024_s10 }
   0xb   :  { %34 = vrot.lane.b32.xlu2 %v13_v5, %s2024_s10 }
  0x12   :  { %36 = vrot.lane.b32.xlu0 %v14_v6, %s2024_s10  ;;  %38 = vrot.lane.b32.xlu1 %v15_v7, %s2024_s10 }
  0x5d   :  { %v33_v8 = vpop.permute.xlu2 %32 }
  0x5e   :  { %v2094_v21 = vmax.f32 %v12_v2, %v33_v8 }
  0x65   :  { %v35_v13 = vpop.permute.xlu2 %34 }
  0x66   :  { %v2083_v14 = vmax.f32 %v13_v5, %v35_v13 }
  0x68   :  { %3602 = vst [vmem:[#allocation2_spill] sm:$0xff] %v2083_v14 }
  0x74   :  { %v29_v9 = vpop.permute.xlu1 %28  ;;  %v25_v10 = vpop.permute.xlu0 %24 }
  0x75   :  { %v2077_v11 = vmax.f32 %v10_v0, %v29_v9  ;;  %v2079_v12 = vmax.f32 %v8_v1, %v25_v10  ;;  %v2032_v1 = vmov 1983009808  }
  0x76   :  { %v238_v2 = vunpack.c.l.s4 %v2032_v1 }
  0x77   :  { %68 = vrot.lane.b32.xlu1 %v2077_v11, %s2025_s23  ;;  %64 = vrot.lane.b32.xlu2 %v2079_v12, %s2025_s23 }
  0x78   :  { %v2233_v8 = vunpack.c.0.s8 %v238_v2 }
  0x7a   :  { %3618 = vst [vmem:[#allocation18_spill] sm:$0xff] %v2233_v8 }
  0x7c   :  { %v31_v15 = vpop.permute.xlu1 %30  ;;  %v27_v16 = vpop.permute.xlu0 %26 }
  0x7d   :  { %v2085_v17 = vmax.f32 %v11_v3, %v31_v15  ;;  %v2087_v18 = vmax.f32 %v9_v4, %v27_v16  ;;  %v235_v3 = vrot.slane %v2079_v12, 4 }
  0x7f   :  { %74 = vrot.lane.b32.xlu1 %v2083_v14, %s2025_s23  ;;  %70 = vrot.lane.b32.xlu2 %v2085_v17, %s2025_s23 }
  0x80   :  { %66 = vrot.lane.b32.xlu0 %v2087_v18, %s2025_s23 }
  0x84   :  { %v37_v19 = vpop.permute.xlu0 %36  ;;  %v39_v22 = vpop.permute.xlu1 %38 }
  0x85   :  { %v2092_v20 = vmax.f32 %v14_v6, %v37_v19  ;;  %v2099_v23 = vmax.f32 %v15_v7, %v39_v22  ;;  %v459_v22 = vrot.slane %v2077_v11, 4 }
  0x87   :  { %3603 = vst [vmem:[#allocation3_spill] sm:$0xff] %v2092_v20  ;;  %88 = vrot.lane.b32.xlu1 %v2079_v12, %s2026_s0  ;;  %76 = vrot.lane.b32.xlu2 %v2092_v20, %s2025_s23 }
  0x88   :  { %72 = vrot.lane.b32.xlu0 %v2094_v21, %s2025_s23  ;;  %3604 = vst [vmem:[#allocation4_spill] sm:$0xff] %v2099_v23 }
  0x8f   :  { %94 = vrot.lane.b32.xlu1 %v2085_v17, %s2026_s0  ;;  %90 = vrot.lane.b32.xlu2 %v2087_v18, %s2026_s0 }
  0x90   :  { %78 = vrot.lane.b32.xlu0 %v2099_v23, %s2025_s23 }
  0x97   :  { %100 = vrot.lane.b32.xlu1 %v2092_v20, %s2026_s0  ;;  %96 = vrot.lane.b32.xlu2 %v2094_v21, %s2026_s0 }
  0x98   :  { %92 = vrot.lane.b32.xlu0 %v2077_v11, %s2026_s0 }
  0x9f   :  { %114 = vrot.lane.b32.xlu1 %v2087_v18, %s2027_s24  ;;  %102 = vrot.lane.b32.xlu2 %v2099_v23, %s2026_s0 }
  0xa0   :  { %98 = vrot.lane.b32.xlu0 %v2083_v14, %s2026_s0 }
  0xa7   :  { %120 = vrot.lane.b32.xlu1 %v2094_v21, %s2027_s24  ;;  %116 = vrot.lane.b32.xlu2 %v2077_v11, %s2027_s24 }
  0xa8   :  { %112 = vrot.lane.b32.xlu0 %v2079_v12, %s2027_s24 }
  0xaf   :  { %126 = vrot.lane.b32.xlu1 %v2099_v23, %s2027_s24  ;;  %122 = vrot.lane.b32.xlu2 %v2083_v14, %s2027_s24 }
  0xb0   :  { %118 = vrot.lane.b32.xlu0 %v2085_v17, %s2027_s24 }
  0xb7   :  { %140 = vrot.lane.b32.xlu1 %v2077_v11, %s2028_s25  ;;  %136 = vrot.lane.b32.xlu2 %v2079_v12, %s2028_s25 }
  0xb8   :  { %124 = vrot.lane.b32.xlu0 %v2092_v20, %s2027_s24 }
  0xbf   :  { %146 = vrot.lane.b32.xlu1 %v2083_v14, %s2028_s25  ;;  %142 = vrot.lane.b32.xlu2 %v2085_v17, %s2028_s25 }
  0xc0   :  { %138 = vrot.lane.b32.xlu0 %v2087_v18, %s2028_s25 }
  0xc7   :  { %160 = vrot.lane.b32.xlu1 %v2079_v12, %s2029_s26  ;;  %148 = vrot.lane.b32.xlu2 %v2092_v20, %s2028_s25 }
  0xc8   :  { %144 = vrot.lane.b32.xlu0 %v2094_v21, %s2028_s25 }
  0xcf   :  { %166 = vrot.lane.b32.xlu1 %v2085_v17, %s2029_s26  ;;  %162 = vrot.lane.b32.xlu2 %v2087_v18, %s2029_s26 }
  0xd0   :  { %150 = vrot.lane.b32.xlu0 %v2099_v23, %s2028_s25 }
  0xd1   :  { %v2128_v24 = vpop.permute.xlu2 %64 }
  0xd2   :  { %v247_v5 = vrot.slane %v2128_v24, 4 }
  0xd7   :  { %172 = vrot.lane.b32.xlu1 %v2092_v20, %s2029_s26  ;;  %168 = vrot.lane.b32.xlu2 %v2094_v21, %s2029_s26 }
  0xd8   :  { %164 = vrot.lane.b32.xlu0 %v2077_v11, %s2029_s26 }
  0xd9   :  { %v2133_v25 = vpop.permute.xlu2 %70 }
  0xdf   :  { %186 = vrot.lane.b32.xlu1 %v2087_v18, %s2030_s27  ;;  %174 = vrot.lane.b32.xlu2 %v2099_v23, %s2029_s26 }
  0xe0   :  { %170 = vrot.lane.b32.xlu0 %v2083_v14, %s2029_s26 }
  0xe1   :  { %v2138_v26 = vpop.permute.xlu2 %76 }
  0xe2   :  { %3605 = vst [vmem:[#allocation5_spill] sm:$0xff] %v2138_v26 }
  0xe7   :  { %192 = vrot.lane.b32.xlu1 %v2094_v21, %s2030_s27  ;;  %188 = vrot.lane.b32.xlu2 %v2077_v11, %s2030_s27 }
  0xe8   :  { %184 = vrot.lane.b32.xlu0 %v2079_v12, %s2030_s27 }
  0xe9   :  { %v2143_v27 = vpop.permute.xlu1 %68  ;;  %v2145_v28 = vpop.permute.xlu2 %90 }
  0xea   :  { %v345_v26 = vrot.slane %v2145_v28, 4 }
  0xef   :  { %198 = vrot.lane.b32.xlu1 %v2099_v23, %s2030_s27  ;;  %194 = vrot.lane.b32.xlu2 %v2083_v14, %s2030_s27 }
  0xf0   :  { %190 = vrot.lane.b32.xlu0 %v2085_v17, %s2030_s27 }
  0xf1   :  { %v2150_v29 = vpop.permute.xlu1 %74  ;;  %v2152_v30 = vpop.permute.xlu2 %96 }
  0xf2   :  { %3606 = vst [vmem:[#allocation6_spill] sm:$0xff] %v2150_v29  ;;  %v2154_v31 = vpop.permute.xlu0 %66 }
  0xf7   :  { %212 = vrot.lane.b32.xlu1 %v2077_v11, %s2031_s28  ;;  %208 = vrot.lane.b32.xlu2 %v2079_v12, %s2031_s28 }
  0xf8   :  { %196 = vrot.lane.b32.xlu0 %v2092_v20, %s2030_s27 }
  0xf9   :  { %v2159_v32 = vpop.permute.xlu1 %88  ;;  %v2161_v33 = vpop.permute.xlu2 %102 }
  0xfa   :  { %3607 = vst [vmem:[#allocation7_spill] sm:$0xff] %v2161_v33  ;;  %v2163_v34 = vpop.permute.xlu0 %72  ;;  %v236_v6 = vsel %vm233_vm0, %v2159_v32, %v235_v3  ;;  %v2033_v3 = vmov 1934713408   ;;  %v232_v2 = vrot.slane %v2159_v32, 4 }
  0xfb   :  { %v2237_v13 = vperm.slane %v236_v6, %v2233_v8 }
  0xff   :  { %218 = vrot.lane.b32.xlu1 %v2083_v14, %s2031_s28  ;;  %214 = vrot.lane.b32.xlu2 %v2085_v17, %s2031_s28 }
 0x100   :  { %210 = vrot.lane.b32.xlu0 %v2087_v18, %s2031_s28 }
 0x101   :  { %v2168_v35 = vpop.permute.xlu1 %94  ;;  %v2170_v36 = vpop.permute.xlu2 %116 }
 0x102   :  { %v2172_v37 = vpop.permute.xlu0 %78 }
 0x103   :  { %3608 = vst [vmem:[#allocation8_spill] sm:$0xff] %v2172_v37  ;;  %v295_v37 = vrot.slane %v2237_v13, 4 }
 0x107   :  { %220 = vrot.lane.b32.xlu2 %v2092_v20, %s2031_s28 }
 0x108   :  { %216 = vrot.lane.b32.xlu0 %v2094_v21, %s2031_s28 }
 0x109   :  { %v2176_v38 = vpop.permute.xlu1 %100  ;;  %v2178_v39 = vpop.permute.xlu2 %122 }
 0x10a   :  { %3609 = vst [vmem:[#allocation9_spill] sm:$0xff] %v2176_v38  ;;  %v2180_v40 = vpop.permute.xlu0 %92 }
 0x110   :  { %222 = vrot.lane.b32.xlu0 %v2099_v23, %s2031_s28  ;;  %v286_v23 = vunpack.c.l.s4 %v2033_v3 }
 0x111   :  { %v2183_v41 = vpop.permute.xlu1 %114  ;;  %v137_v42 = vpop.permute.xlu2 %136 }
 0x112   :  { %v2185_v43 = vpop.permute.xlu0 %98 }
 0x113   :  { %3610 = vst [vmem:[#allocation10_spill] sm:$0xff] %v2185_v43 }
 0x119   :  { %v2187_v44 = vpop.permute.xlu1 %120  ;;  %v2189_v45 = vpop.permute.xlu2 %142 }
 0x11a   :  { %v113_v46 = vpop.permute.xlu0 %112 }
 0x11b   :  { %v245_v9 = vrot.slane %v113_v46, 4  ;;  %v248_v10 = vsel %vm233_vm0, %v113_v46, %v247_v5  ;;  %v259_v46 = vrot.slane %v137_v42, 4 }
 0x11c   :  { %v2242_v19 = vperm.slane %v248_v10, %v2233_v8 }
 0x11d   :  { %v246_v16 = vsel %vm233_vm0, %v245_v9, %v2128_v24 }
 0x11e   :  { %v2252_v24 = vperm.slane %v246_v16, %v2233_v8  ;;  %v296_v10 = vsel %vm233_vm0, %v2242_v19, %v295_v37 }
 0x121   :  { %v2191_v47 = vpop.permute.xlu1 %126  ;;  %v2193_v48 = vpop.permute.xlu2 %148 }
 0x122   :  { %3611 = vst [vmem:[#allocation11_spill] sm:$0xff] %v2191_v47  ;;  %v2195_v49 = vpop.permute.xlu0 %118  ;;  %v460_v47 = vsel %vm233_vm0, %v2180_v40, %v459_v22  ;;  %v234_v22 = vsel %vm233_vm0, %v232_v2, %v2079_v12 }
 0x123   :  { %3612 = vst [vmem:[#allocation12_spill] sm:$0xff] %v2193_v48  ;;  %v2260_v48 = vunpack.c.0.s8 %v286_v23  ;;  %v2265_v16 = vperm.slane %v460_v47, %v2233_v8  ;;  %v2277_v12 = vperm.slane %v234_v22, %v2233_v8 }
 0x129   :  { %v2197_v50 = vpop.permute.xlu1 %140  ;;  %v2199_v51 = vpop.permute.xlu2 %162 }
 0x12a   :  { %v2201_v52 = vpop.permute.xlu0 %124 }
 0x12b   :  { %3613 = vst [vmem:[#allocation13_spill] sm:$0xff] %v2201_v52 }
 0x131   :  { %v2203_v53 = vpop.permute.xlu1 %146  ;;  %v2205_v54 = vpop.permute.xlu2 %168 }
 0x132   :  { %3614 = vst [vmem:[#allocation14_spill] sm:$0xff] %v2203_v53  ;;  %v2207_v55 = vpop.permute.xlu0 %138 }
 0x139   :  { %v161_v56 = vpop.permute.xlu1 %160  ;;  %v2209_v57 = vpop.permute.xlu2 %174 }
 0x13a   :  { %3615 = vst [vmem:[#allocation15_spill] sm:$0xff] %v2209_v57  ;;  %v2211_v58 = vpop.permute.xlu0 %144  ;;  %v271_v5 = vrot.slane %v161_v56, 4 }
 0x141   :  { %v2213_v59 = vpop.permute.xlu1 %166  ;;  %v2215_v60 = vpop.permute.xlu2 %188 }
 0x142   :  { %v2217_v61 = vpop.permute.xlu0 %150 }
 0x143   :  { %3616 = vst [vmem:[#allocation16_spill] sm:$0xff] %v2217_v61 }
 0x149   :  { %v2219_v62 = vpop.permute.xlu1 %172  ;;  %v2223_v0 = vpop.permute.xlu2 %194 }
 0x14a   :  { %3617 = vst [vmem:[#allocation17_spill] sm:$0xff] %v2219_v62  ;;  %v2221_v63 = vpop.permute.xlu0 %164  ;;  %v359_v62 = vrot.slane %v2154_v31, 4 }
 0x151   :  { %v2226_v4 = vpop.permute.xlu1 %186  ;;  %v209_v15 = vpop.permute.xlu2 %208 }
 0x152   :  { %v2231_v7 = vpop.permute.xlu0 %170  ;;  %v269_v1 = vrot.slane %v209_v15, 4  ;;  %v272_v3 = vsel %vm233_vm0, %v209_v15, %v271_v5  ;;  %v2270_v5 = vperm.slane %v296_v10, %v2260_v48  ;;  %v483_v10 = vrot.slane %v2197_v50, 4 }
 0x153   :  { %v280_v20 = vperm.slane %v272_v3, %v2233_v8 }
 0x154   :  { %v270_v57 = vsel %vm233_vm0, %v269_v1, %v161_v56  ;;  %v471_v56 = vrot.slane %v2143_v27, 4  ;;  %v281_v1 = vrot.slane %v2252_v24, 4  ;;  %v343_v3 = vrot.slane %v2270_v5, 4 }
 0x155   :  { %v276_v23 = vperm.slane %v270_v57, %v2233_v8 }
 0x156   :  { %v472_v47 = vsel %vm233_vm0, %v2170_v36, %v471_v56  ;;  %v484_v56 = vsel %vm233_vm0, %v2215_v60, %v483_v10 }
 0x157   :  { %v305_v22 = vrot.slane %v276_v23, 4  ;;  %v2318_v38 = vperm.slane %v484_v56, %v2233_v8 }
 0x159   :  { %v2247_v6 = vpop.permute.xlu1 %192 }
 0x15a   :  { %v185_v9 = vpop.permute.xlu0 %184 }
 0x15b   :  { %v257_v33 = vrot.slane %v185_v9, 4  ;;  %v260_v32 = vsel %vm233_vm0, %v185_v9, %v259_v46  ;;  %v519_v9 = vrot.slane %v2265_v16, 4 }
 0x15c   :  { %v268_v61 = vperm.slane %v260_v32, %v2233_v8  ;;  %v347_v32 = vrot.slane %v2087_v18, 4 }
 0x15d   :  { %v258_v37 = vsel %vm233_vm0, %v257_v33, %v137_v42 }
 0x15e   :  { %v319_v15 = vrot.slane %v268_v61, 4  ;;  %v264_v33 = vperm.slane %v258_v37, %v2233_v8  ;;  %v2296_v37 = vperm.slane %v472_v47, %v2233_v8 }
 0x160   :  { %v320_v46 = vsel %vm233_vm0, %v280_v20, %v319_v15  ;;  %v282_v15 = vsel %vm233_vm0, %v281_v1, %v2277_v12  ;;  %v306_v1 = vsel %vm233_vm0, %v305_v22, %v264_v33  ;;  %v520_v10 = vsel %vm233_vm0, %v2296_v37, %v519_v9 }
 0x161   :  { %v2282_v42 = vpop.permute.xlu1 %198  ;;  %v2285_v2 = vperm.slane %v320_v46, %v2260_v48  ;;  %v2311_v47 = vperm.slane %v282_v15, %v2260_v48  ;;  %v495_v22 = vrot.slane %v2221_v63, 4  ;;  %v2326_v15 = vperm.slane %v306_v1, %v2260_v48 }
 0x162   :  { %3619 = vst [vmem:[#allocation19_spill] sm:$0xff] %v2282_v42  ;;  %v2289_v57 = vpop.permute.xlu0 %190  ;;  %v348_v42 = vsel %vm233_vm0, %v2145_v28, %v347_v32  ;;  %v317_v32 = vrot.slane %v280_v20, 4  ;;  %v307_v9 = vrot.slane %v264_v33, 4  ;;  %v2331_v56 = vperm.slane %v520_v10, %v2260_v48 }
 0x163   :  { %v2302_v46 = vsel %vm233_vm0, %v2285_v2, %v343_v3  ;;  %v360_v3 = vsel %vm233_vm0, %v2183_v41, %v359_v62  ;;  %v2322_v52 = vperm.slane %v348_v42, %v2233_v8  ;;  %v293_v28 = vrot.slane %v2242_v19, 4 }
 0x164   :  { %3620 = vst [vmem:[#allocation20_spill] sm:$0xff] %v2302_v46  ;;  %1207 = vrot.lane.b32.xlu2 %v2302_v46, %s2034_s29  ;;  %v357_v46 = vrot.slane %v2183_v41, 4  ;;  %v318_v14 = vsel %vm233_vm0, %v317_v32, %v268_v61  ;;  %v2334_v20 = vperm.slane %v360_v3, %v2233_v8  ;;  %v331_v1 = vrot.slane %v2311_v47, 4 }
 0x165   :  { %v371_v41 = vrot.slane %v2207_v55, 4  ;;  %v543_v33 = vrot.slane %v2318_v38, 4  ;;  %v369_v61 = vrot.slane %v2226_v4, 4  ;;  %v2352_v19 = vperm.slane %v318_v14, %v2260_v48 }
 0x166   :  { %v2349_v3 = vsel %vm233_vm0, %v2326_v15, %v331_v1  ;;  %v407_v32 = vrot.slane %v2322_v52, 4  ;;  %v346_v1 = vsel %vm233_vm0, %v345_v26, %v2087_v18  ;;  %v567_v14 = vrot.slane %v2331_v56, 4 }
 0x167   :  { %v358_v43 = vsel %vm233_vm0, %v357_v46, %v2154_v31  ;;  %v337_v26 = vrot.slane %v2352_v19, 4  ;;  %v2386_v31 = vperm.slane %v346_v1, %v2233_v8  ;;  %v283_v46 = vrot.slane %v2277_v12, 4 }
 0x169   :  { %v213_v62 = vpop.permute.xlu1 %212  ;;  %v284_v1 = vsel %vm233_vm0, %v2252_v24, %v283_v46 }
 0x16a   :  { %v496_v42 = vsel %vm233_vm0, %v213_v62, %v495_v22  ;;  %v2338_v29 = vpop.permute.xlu0 %196  ;;  %v372_v22 = vsel %vm233_vm0, %v2226_v4, %v371_v41  ;;  %v408_v4 = vsel %vm233_vm0, %v2334_v20, %v407_v32  ;;  %v370_v41 = vsel %vm233_vm0, %v369_v61, %v2207_v55 }
 0x16b   :  { %3621 = vst [vmem:[#allocation21_spill] sm:$0xff] %v2338_v29  ;;  %v2345_v10 = vperm.slane %v496_v42, %v2233_v8  ;;  %v308_v42 = vsel %vm233_vm0, %v276_v23, %v307_v9  ;;  %v294_v23 = vsel %vm233_vm0, %v293_v28, %v2237_v13  ;;  %v380_v9 = vperm.slane %v372_v22, %v2233_v8 }
 0x16c   :  { %1195 = vrot.lane.b32.xlu2 %v2349_v3, %s2034_s29  ;;  %v383_v55 = vrot.slane %v2199_v51, 4  ;;  %v2393_v13 = vperm.slane %v358_v43, %v2233_v8  ;;  %v376_v28 = vperm.slane %v370_v41, %v2233_v8  ;;  %v300_v61 = vperm.slane %v294_v23, %v2260_v48 }
 0x16d   :  { %v544_v29 = vsel %vm233_vm0, %v2345_v10, %v543_v33  ;;  %v2398_v32 = vperm.slane %v408_v4, %v2260_v48  ;;  %v493_v22 = vrot.slane %v213_v62, 4  ;;  %v395_v23 = vrot.slane %v2386_v31, 4 }
 0x16e   :  { %v2365_v53 = vperm.slane %v544_v29, %v2260_v48  ;;  %v2383_v29 = vperm.slane %v308_v42, %v2260_v48  ;;  %v2405_v43 = vsel %vm233_vm0, %v337_v26, %v300_v61  ;;  %v419_v62 = vrot.slane %v376_v28, 4 }
 0x16f   :  { %3623 = vst [vmem:[#allocation23_spill] sm:$0xff] %v2405_v43  ;;  %v292_v24 = vperm.slane %v284_v1, %v2260_v48  ;;  %v494_v26 = vsel %vm233_vm0, %v493_v22, %v2221_v63 }
 0x170   :  { %v2379_v18 = vsel %vm233_vm0, %v2365_v53, %v567_v14  ;;  %v431_v14 = vrot.slane %v380_v9, 4  ;;  %v333_v41 = vrot.slane %v2383_v29, 4  ;;  %v500_v22 = vperm.slane %v494_v26, %v2233_v8 }
 0x171   :  { %3622 = vst [vmem:[#allocation22_spill] sm:$0xff] %v2379_v18  ;;  %1239 = vrot.lane.b32.xlu0 %v2379_v18, %s2034_s29 }
 0x172   :  { %v211_v33 = vpop.permute.xlu0 %210 }
 0x173   :  { %v381_v42 = vrot.slane %v211_v33, 4  ;;  %v384_v12 = vsel %vm233_vm0, %v211_v33, %v383_v55 }
 0x174   :  { %v392_v18 = vperm.slane %v384_v12, %v2233_v8  ;;  %1201 = vrot.lane.b32.xlu2 %v2405_v43, %s2034_s29  ;;  %v455_v12 = vrot.slane %v2398_v32, 4 }
 0x175   :  { %v382_v4 = vsel %vm233_vm0, %v381_v42, %v2199_v51  ;;  %v405_v51 = vrot.slane %v2334_v20, 4  ;;  %v2424_v42 = vsel %vm233_vm0, %v333_v41, %v292_v24 }
 0x176   :  { %v388_v55 = vperm.slane %v382_v4, %v2233_v8  ;;  %v432_v46 = vsel %vm233_vm0, %v392_v18, %v431_v14  ;;  %v396_v4 = vsel %vm233_vm0, %v2393_v13, %v395_v23  ;;  %v481_v14 = vrot.slane %v2215_v60, 4 }
 0x177   :  { %v2419_v33 = vperm.slane %v432_v46, %v2260_v48  ;;  %v429_v41 = vrot.slane %v392_v18, 4  ;;  %v469_v23 = vrot.slane %v2170_v36, 4  ;;  %v404_v60 = vperm.slane %v396_v4, %v2260_v48 }
 0x178   :  { %v420_v1 = vsel %vm233_vm0, %v388_v55, %v419_v62  ;;  %v417_v43 = vrot.slane %v388_v55, 4  ;;  %v457_v55 = vrot.slane %v2180_v40, 4  ;;  %v406_v46 = vsel %vm233_vm0, %v405_v51, %v2322_v52 }
 0x179   :  { %1197 = vrot.lane.b32.xlu0 %v2424_v42, %s2034_s29  ;;  %v2434_v63 = vsel %vm233_vm0, %v2419_v33, %v455_v12  ;;  %v428_v20 = vperm.slane %v420_v1, %v2260_v48  ;;  %v482_v12 = vsel %vm233_vm0, %v481_v14, %v2197_v50  ;;  %v329_v18 = vrot.slane %v2326_v15, 4 }
 0x17a   :  { %3624 = vst [vmem:[#allocation24_spill] sm:$0xff] %v2434_v63  ;;  %1223 = vrot.lane.b32.xlu1 %v2434_v63, %s2034_s29  ;;  %v418_v26 = vsel %vm233_vm0, %v417_v43, %v376_v28  ;;  %v529_v63 = vrot.slane %v500_v22, 4  ;;  %v339_v36 = vrot.slane %v300_v61, 4  ;;  %v430_v40 = vsel %vm233_vm0, %v429_v41, %v380_v9 }
 0x17b   :  { %v445_v62 = vrot.slane %v428_v20, 4  ;;  %v470_v52 = vsel %vm233_vm0, %v469_v23, %v2143_v27  ;;  %v393_v51 = vrot.slane %v2393_v13, 4  ;;  %v2459_v50 = vperm.slane %v406_v46, %v2260_v48 }
 0x17c   :  { %v488_v4 = vperm.slane %v482_v12, %v2233_v8  ;;  %v2464_v15 = vsel %vm233_vm0, %v2352_v19, %v339_v36  ;;  %v424_v28 = vperm.slane %v418_v26, %v2260_v48  ;;  %v458_v61 = vsel %vm233_vm0, %v457_v55, %v2077_v11 }
 0x17d   :  { %v2448_v1 = vsel %vm233_vm0, %v445_v62, %v404_v60  ;;  %v2473_v27 = vsel %vm233_vm0, %v329_v18, %v2311_v47  ;;  %v2476_v9 = vperm.slane %v430_v40, %v2260_v48  ;;  %v476_v13 = vperm.slane %v470_v52, %v2233_v8 }
 0x17e   :  { %1213 = vrot.lane.b32.xlu2 %v2448_v1, %s2034_s29  ;;  %v530_v19 = vsel %vm233_vm0, %v529_v63, %v488_v4  ;;  %v451_v43 = vrot.slane %v2459_v50, 4  ;;  %v394_v11 = vsel %vm233_vm0, %v393_v51, %v2386_v31  ;;  %v464_v14 = vperm.slane %v458_v61, %v2233_v8  ;;  %v215_v61 = vpop.permute.xlu2 %214 }
 0x17f   :  { %v441_v41 = vrot.slane %v424_v28, 4  ;;  %v2491_v23 = vperm.slane %v530_v19, %v2260_v48  ;;  %v505_v62 = vrot.slane %v476_v13, 4  ;;  %v400_v63 = vperm.slane %v394_v11, %v2260_v48 }
 0x180   :  { %v2488_v47 = vsel %vm233_vm0, %v2476_v9, %v451_v43  ;;  %v335_v55 = vrot.slane %v292_v24, 4  ;;  %v507_v46 = vrot.slane %v464_v14, 4  ;;  %v531_v36 = vrot.slane %v488_v4, 4 }
 0x181   :  { %1203 = vrot.lane.b32.xlu0 %v2464_v15, %s2034_s29  ;;  %v2497_v31 = vsel %vm233_vm0, %v441_v41, %v400_v63  ;;  %v506_v12 = vsel %vm233_vm0, %v505_v62, %v464_v14  ;;  %v553_v26 = vrot.slane %v2491_v23, 4  ;;  %v581_v52 = vrot.slane %v2195_v49, 4 }
 0x182   :  { %1193 = vrot.lane.b32.xlu1 %v2473_v27, %s2034_s29  ;;  %v2502_v18 = vsel %vm233_vm0, %v2383_v29, %v335_v55  ;;  %v512_v24 = vperm.slane %v506_v12, %v2260_v48  ;;  %v508_v40 = vsel %vm233_vm0, %v476_v13, %v507_v46  ;;  %v341_v29 = vrot.slane %v2285_v2, 4 }
 0x183   :  { %v447_v19 = vrot.slane %v404_v60, 4  ;;  %v532_v43 = vsel %vm233_vm0, %v500_v22, %v531_v36  ;;  %v2520_v11 = vperm.slane %v508_v40, %v2260_v48  ;;  %v582_v13 = vsel %vm233_vm0, %v581_v52, %v2133_v25 }
 0x184   :  { %v2513_v51 = vsel %vm233_vm0, %v553_v26, %v512_v24  ;;  %v605_v14 = vrot.slane %v215_v61, 4  ;;  %v2529_v2 = vsel %vm233_vm0, %v341_v29, %v2270_v5  ;;  %v2534_v60 = vperm.slane %v532_v43, %v2260_v48 }
 0x185   :  { %v2523_v4 = vsel %vm233_vm0, %v428_v20, %v447_v19  ;;  %v569_v20 = vrot.slane %v2168_v35, 4  ;;  %v593_v22 = vrot.slane %v2289_v57, 4  ;;  %v559_v41 = vrot.slane %v2520_v11, 4 }
 0x186   :  { %1219 = vrot.lane.b32.xlu2 %v2488_v47, %s2034_s29  ;;  %v2542_v62 = vperm.slane %v582_v13, %v2233_v8  ;;  %v453_v5 = vrot.slane %v2419_v33, 4  ;;  %v606_v55 = vsel %vm233_vm0, %v605_v14, %v2213_v59  ;;  %v607_v26 = vrot.slane %v2213_v59, 4 }
 0x187   :  { %v2549_v46 = vsel %vm233_vm0, %v2534_v60, %v559_v41  ;;  %v570_v12 = vsel %vm233_vm0, %v569_v20, %v2085_v17  ;;  %v594_v36 = vsel %vm233_vm0, %v593_v22, %v2189_v45  ;;  %v443_v40 = vrot.slane %v400_v63, 4 }
 0x188   :  { %3625 = vst [vmem:[#allocation25_spill] sm:$0xff] %v2549_v46  ;;  %v595_v33 = vrot.slane %v2189_v45, 4  ;;  %v617_v52 = vrot.slane %v2542_v62, 4  ;;  %v612_v29 = vperm.slane %v606_v55, %v2233_v8  ;;  %v2563_v19 = vsel %vm233_vm0, %v453_v5, %v2398_v32 }
 0x189   :  { %1209 = vrot.lane.b32.xlu0 %v2497_v31, %s2034_s29  ;;  %v608_v43 = vsel %vm233_vm0, %v215_v61, %v607_v26  ;;  %v541_v13 = vrot.slane %v2345_v10, 4  ;;  %v2568_v59 = vsel %vm233_vm0, %v424_v28, %v443_v40  ;;  %v565_v45 = vrot.slane %v2365_v53, 4 }
 0x18a   :  { %1199 = vrot.lane.b32.xlu1 %v2502_v18, %s2034_s29  ;;  %v576_v63 = vperm.slane %v570_v12, %v2233_v8  ;;  %v600_v14 = vperm.slane %v594_v36, %v2233_v8  ;;  %v583_v32 = vrot.slane %v2133_v25, 4  ;;  %v596_v10 = vsel %vm233_vm0, %v2289_v57, %v595_v33 }
 0x18b   :  { %v2581_v28 = vperm.slane %v608_v43, %v2233_v8  ;;  %v641_v61 = vrot.slane %v612_v29, 4  ;;  %v2588_v22 = vsel %vm233_vm0, %v565_v45, %v2331_v56  ;;  %v449_v41 = vrot.slane %v2476_v9, 4 }
 0x18c   :  { %v618_v20 = vsel %vm233_vm0, %v617_v52, %v576_v63  ;;  %v584_v53 = vsel %vm233_vm0, %v2195_v49, %v583_v32  ;;  %3626 = vst [vmem:[#allocation26_spill] sm:$0xff] %v2588_v22  ;;  %v542_v25 = vsel %vm233_vm0, %v541_v13, %v2318_v38  ;;  %v604_v57 = vperm.slane %v596_v10, %v2233_v8 }
 0x18d   :  { %v555_v5 = vrot.slane %v512_v24, 4  ;;  %v642_v55 = vsel %vm233_vm0, %v641_v61, %v600_v14  ;;  %v571_v12 = vrot.slane %v2085_v17, 4  ;;  %v2599_v49 = vperm.slane %v618_v20, %v2260_v48 }
 0x18e   :  { %1225 = vrot.lane.b32.xlu2 %v2513_v51, %s2034_s29  ;;  %v592_v56 = vperm.slane %v584_v53, %v2233_v8  ;;  %v653_v9 = vrot.slane %v2581_v28, 4  ;;  %v548_v26 = vperm.slane %v542_v25, %v2260_v48  ;;  %v517_v36 = vrot.slane %v2296_v37, 4  ;;  %v217_v37 = vpop.permute.xlu0 %216 }
 0x18f   :  { %v2605_v38 = vsel %vm233_vm0, %v2491_v23, %v555_v5  ;;  %v643_v24 = vrot.slane %v600_v14, 4  ;;  %v2611_v40 = vsel %vm233_vm0, %v449_v41, %v2459_v50  ;;  %v2616_v17 = vperm.slane %v642_v55, %v2260_v48 }
 0x190   :  { %v654_v33 = vsel %vm233_vm0, %v653_v9, %v604_v57  ;;  %v572_v23 = vsel %vm233_vm0, %v2168_v35, %v571_v12  ;;  %v667_v52 = vrot.slane %v2599_v49, 4  ;;  %v518_v50 = vsel %vm233_vm0, %v517_v36, %v2265_v16 }
 0x191   :  { %1215 = vrot.lane.b32.xlu0 %v2523_v4, %s2034_s29  ;;  %v629_v43 = vrot.slane %v592_v56, 4  ;;  %v705_v13 = vrot.slane %v2247_v6, 4  ;;  %v561_v45 = vrot.slane %v548_v26, 4  ;;  %v557_v32 = vrot.slane %v2534_v60, 4 }
 0x192   :  { %1205 = vrot.lane.b32.xlu1 %v2529_v2, %s2034_s29  ;;  %v2629_v14 = vsel %vm233_vm0, %v2616_v17, %v667_v52  ;;  %v2633_v10 = vperm.slane %v654_v33, %v2260_v48  ;;  %v644_v35 = vsel %vm233_vm0, %v612_v29, %v643_v24  ;;  %v580_v61 = vperm.slane %v572_v23, %v2233_v8 }
 0x193   :  { %3627 = vst [vmem:[#allocation27_spill] sm:$0xff] %v2629_v14  ;;  %v717_v20 = vrot.slane %v217_v37, 4  ;;  %v524_v16 = vperm.slane %v518_v50, %v2260_v48  ;;  %v2645_v60 = vperm.slane %v644_v35, %v2260_v48  ;;  %v619_v25 = vrot.slane %v576_v63, 4 }
 0x194   :  { %v630_v41 = vsel %vm233_vm0, %v629_v43, %v580_v61  ;;  %v706_v29 = vsel %vm233_vm0, %v705_v13, %v2211_v58  ;;  %v2651_v5 = vsel %vm233_vm0, %v557_v32, %v2520_v11  ;;  %v673_v55 = vrot.slane %v2633_v10, 4 }
 0x195   :  { %v2641_v53 = vsel %vm233_vm0, %v561_v45, %v524_v16  ;;  %v631_v12 = vrot.slane %v580_v61, 4  ;;  %v655_v9 = vrot.slane %v604_v57, 4  ;;  %v718_v36 = vsel %vm233_vm0, %v717_v20, %v2205_v54 }
 0x196   :  { %1231 = vrot.lane.b32.xlu2 %v2549_v46, %s2034_s29  ;;  %v681_v63 = vrot.slane %v2152_v30, 4  ;;  %v636_v24 = vperm.slane %v630_v41, %v2260_v48  ;;  %v620_v11 = vsel %vm233_vm0, %v2542_v62, %v619_v25  ;;  %v693_v33 = vrot.slane %v2187_v44, 4  ;;  %v2689_v25 = vpop.permute.xlu1 %218  ;;  %v3666_v46 = vld [vmem:[#allocation8_spill] sm:$0xff] }
 0x197   :  { %v632_v23 = vsel %vm233_vm0, %v592_v56, %v631_v12  ;;  %v712_v52 = vperm.slane %v706_v29, %v2233_v8  ;;  %v669_v57 = vrot.slane %v2645_v60, 4  ;;  %v724_v50 = vperm.slane %v718_v36, %v2233_v8 }
 0x198   :  { %v2670_v43 = vsel %vm233_vm0, %v673_v55, %v636_v24  ;;  %v695_v13 = vrot.slane %v2163_v34, 4  ;;  %v2676_v62 = vperm.slane %v620_v11, %v2260_v48  ;;  %v656_v56 = vsel %vm233_vm0, %v2581_v28, %v655_v9 }
 0x199   :  { %1221 = vrot.lane.b32.xlu0 %v2563_v19, %s2034_s29  ;;  %3628 = vst [vmem:[#allocation28_spill] sm:$0xff] %v2670_v43  ;;  %v682_v45 = vsel %vm233_vm0, %v681_v63, %v2094_v21  ;;  %v563_v32 = vrot.slane %v524_v16, 4  ;;  %v2683_v35 = vperm.slane %v632_v23, %v2260_v48  ;;  %v694_v61 = vsel %vm233_vm0, %v693_v33, %v2163_v34 }
 0x19a   :  { %1211 = vrot.lane.b32.xlu1 %v2568_v59, %s2034_s29  ;;  %v696_v20 = vsel %vm233_vm0, %v2187_v44, %v695_v13  ;;  %v755_v41 = vrot.slane %v712_v52, 4  ;;  %v2693_v29 = vsel %vm233_vm0, %v669_v57, %v2676_v62  ;;  %v719_v28 = vrot.slane %v2205_v54, 4 }
 0x19b   :  { %v753_v55 = vrot.slane %v724_v50, 4  ;;  %v2697_v16 = vsel %vm233_vm0, %v548_v26, %v563_v32  ;;  %v2702_v34 = vperm.slane %v656_v56, %v2260_v48  ;;  %v688_v44 = vperm.slane %v682_v45, %v2233_v8 }
 0x19c   :  { %v756_v12 = vsel %vm233_vm0, %v724_v50, %v755_v41  ;;  %v700_v9 = vperm.slane %v694_v61, %v2233_v8  ;;  %v829_v54 = vrot.slane %v2689_v25, 4  ;;  %v720_v26 = vsel %vm233_vm0, %v217_v37, %v719_v28  ;;  %v2731_v61 = vpop.permute.xlu2 %220 }
 0x19d   :  { %v679_v36 = vrot.slane %v2683_v35, 4  ;;  %v683_v63 = vrot.slane %v2094_v21, 4  ;;  %v2714_v11 = vperm.slane %v696_v20, %v2233_v8  ;;  %v665_v23 = vrot.slane %v2616_v17, 4 }
 0x19e   :  { %1237 = vrot.lane.b32.xlu2 %v2588_v22, %s2034_s29  ;;  %v2722_v57 = vperm.slane %v756_v12, %v2260_v48  ;;  %v754_v50 = vsel %vm233_vm0, %v753_v55, %v712_v52  ;;  %v731_v13 = vrot.slane %v688_v44, 4  ;;  %v728_v37 = vperm.slane %v720_v26, %v2233_v8  ;;  %v3631_v26 = vld [vmem:[#allocation10_spill] sm:$0xff]  ;;  %v3651_v22 = vld [vmem:[#allocation12_spill] sm:$0xff] }
 0x19f   :  { %v2718_v33 = vsel %vm233_vm0, %v2702_v34, %v679_v36  ;;  %v675_v21 = vrot.slane %v636_v24, 4  ;;  %v684_v56 = vsel %vm233_vm0, %v2152_v30, %v683_v63  ;;  %v729_v45 = vrot.slane %v700_v9, 4 }
 0x1a0   :  { %3629 = vst [vmem:[#allocation29_spill] sm:$0xff] %v2718_v33  ;;  %v707_v32 = vrot.slane %v2211_v58, 4  ;;  %v830_v17 = vsel %vm233_vm0, %v829_v54, %v2231_v7  ;;  %v741_v52 = vrot.slane %v2714_v11, 4  ;;  %v732_v41 = vsel %vm233_vm0, %v700_v9, %v731_v13  ;;  %v3632_v13 = vld [vmem:[#allocation14_spill] sm:$0xff] }
 0x1a1   :  { %1227 = vrot.lane.b32.xlu0 %v2605_v38, %s2034_s29  ;;  %v2738_v20 = vsel %vm233_vm0, %v2633_v10, %v675_v21  ;;  %v2742_v24 = vperm.slane %v754_v50, %v2260_v48  ;;  %v817_v30 = vrot.slane %v2223_v0, 4  ;;  %v2749_v28 = vsel %vm233_vm0, %v665_v23, %v2599_v49 }
 0x1a2   :  { %1217 = vrot.lane.b32.xlu1 %v2611_v40, %s2034_s29  ;;  %3630 = vst [vmem:[#allocation30_spill] sm:$0xff] %v2738_v20  ;;  %v708_v58 = vsel %vm233_vm0, %v2247_v6, %v707_v32  ;;  %v781_v10 = vrot.slane %v2722_v57, 4  ;;  %v692_v55 = vperm.slane %v684_v56, %v2233_v8  ;;  %v2756_v12 = vperm.slane %v830_v17, %v2233_v8  ;;  %v3634_v17 = vld [vmem:[#allocation6_spill] sm:$0xff] }
 0x1a3   :  { %v765_v9 = vrot.slane %v728_v37, 4  ;;  %v805_v6 = vrot.slane %v2178_v39, 4  ;;  %v740_v54 = vperm.slane %v732_v41, %v2260_v48  ;;  %v730_v49 = vsel %vm233_vm0, %v729_v45, %v688_v44 }
 0x1a4   :  { %v793_v36 = vrot.slane %v3631_v26, 4  ;;  %v716_v63 = vperm.slane %v708_v58, %v2233_v8  ;;  %v777_v23 = vrot.slane %v2742_v24, 4  ;;  %v742_v50 = vsel %vm233_vm0, %v741_v52, %v692_v55 }
 0x1a5   :  { %v818_v21 = vsel %vm233_vm0, %v817_v30, %v3632_v13  ;;  %v2770_v56 = vsel %vm233_vm0, %v781_v10, %v740_v54  ;;  %v865_v32 = vrot.slane %v2756_v12, 4  ;;  %v2776_v44 = vperm.slane %v730_v49, %v2260_v48  ;;  %v3635_v10 = vld [vmem:[#allocation2_spill] sm:$0xff] }
 0x1a6   :  { %1243 = vrot.lane.b32.xlu2 %v2629_v14, %s2034_s29  ;;  %3633 = vst [vmem:[#allocation10_spill] sm:$0xff] %v2770_v56  ;;  %v766_v45 = vsel %vm233_vm0, %v765_v9, %v716_v63  ;;  %v806_v41 = vsel %vm233_vm0, %v805_v6, %v3634_v17  ;;  %v671_v30 = vrot.slane %v2676_v62, 4  ;;  %v2785_v58 = vperm.slane %v742_v50, %v2260_v48 }
 0x1a7   :  { %v2792_v49 = vsel %vm233_vm0, %v777_v23, %v2776_v44  ;;  %v2801_v62 = vperm.slane %v766_v45, %v2260_v48  ;;  %v812_v6 = vperm.slane %v806_v41, %v2233_v8  ;;  %v767_v50 = vrot.slane %v716_v63, 4 }
 0x1a8   :  { %3636 = vst [vmem:[#allocation14_spill] sm:$0xff] %v2792_v49  ;;  %v2796_v9 = vsel %vm233_vm0, %v2645_v60, %v671_v30  ;;  %v677_v45 = vrot.slane %v2702_v34, 4  ;;  %v819_v14 = vrot.slane %v3632_v13, 4 }
 0x1a9   :  { %1233 = vrot.lane.b32.xlu0 %v2641_v53, %s2034_s29  ;;  %3637 = vst [vmem:[#allocation6_spill] sm:$0xff] %v2796_v9  ;;  %v768_v60 = vsel %vm233_vm0, %v728_v37, %v767_v50  ;;  %v831_v50 = vrot.slane %v2231_v7, 4 }
 0x1aa   :  { %1229 = vrot.lane.b32.xlu1 %v2651_v5, %s2034_s29  ;;  %v2837_v13 = vsel %vm233_vm0, %v677_v45, %v2683_v35 }
 0x1ab   :  { %3640 = vst [vmem:[#allocation32_spill] sm:$0xff] %v2837_v13 }
 0x1ae   :  { %1249 = vrot.lane.b32.xlu2 %v2670_v43, %s2034_s29  ;;  %v841_v43 = vrot.slane %v812_v6, 4 }
 0x1b1   :  { %1245 = vrot.lane.b32.xlu0 %v2693_v29, %s2034_s29 }
 0x1b2   :  { %1235 = vrot.lane.b32.xlu1 %v2697_v16, %s2034_s29 }
 0x1b6   :  { %1255 = vrot.lane.b32.xlu2 %v2718_v33, %s2034_s29  ;;  %v794_v33 = vsel %vm233_vm0, %v793_v36, %v3635_v10 }
 0x1b7   :  { %v800_v23 = vperm.slane %v794_v33, %v2233_v8  ;;  %v795_v33 = vrot.slane %v3635_v10, 4 }
 0x1b9   :  { %1251 = vrot.lane.b32.xlu0 %v2738_v20, %s2034_s29  ;;  %v843_v63 = vrot.slane %v800_v23, 4 }
 0x1ba   :  { %1241 = vrot.lane.b32.xlu1 %v2749_v28, %s2034_s29 }
 0x1be   :  { %1261 = vrot.lane.b32.xlu2 %v2770_v56, %s2034_s29  ;;  %v2781_v52 = vpop.permute.xlu2 %1207  ;;  %v824_v56 = vperm.slane %v818_v21, %v2233_v8  ;;  %v787_v21 = vrot.slane %v2785_v58, 4 }
 0x1c0   :  { %v866_v36 = vsel %vm233_vm0, %v865_v32, %v824_v56  ;;  %v2812_v30 = vsel %vm233_vm0, %v2801_v62, %v787_v21  ;;  %v783_v32 = vrot.slane %v740_v54, 4  ;;  %v2831_v21 = vperm.slane %v768_v60, %v2260_v48  ;;  %v3641_v60 = vld [vmem:[#allocation13_spill] sm:$0xff] }
 0x1c1   :  { %1257 = vrot.lane.b32.xlu0 %v2792_v49, %s2034_s29  ;;  %3638 = vst [vmem:[#allocation2_spill] sm:$0xff] %v2812_v30  ;;  %v2816_v41 = vperm.slane %v866_v36, %v2260_v48  ;;  %v842_v36 = vsel %vm233_vm0, %v841_v43, %v800_v23  ;;  %v820_v54 = vsel %vm233_vm0, %v2223_v0, %v819_v14 }
 0x1c2   :  { %1247 = vrot.lane.b32.xlu1 %v2796_v9, %s2034_s29  ;;  %v2827_v34 = vsel %vm233_vm0, %v2722_v57, %v783_v32  ;;  %v832_v57 = vsel %vm233_vm0, %v2689_v25, %v831_v50  ;;  %v796_v43 = vsel %vm233_vm0, %v3631_v26, %v795_v33  ;;  %v848_v0 = vperm.slane %v842_v36, %v2260_v48 }
 0x1c3   :  { %3639 = vst [vmem:[#allocation31_spill] sm:$0xff] %v2827_v34  ;;  %v889_v7 = vrot.slane %v2816_v41, 4  ;;  %v828_v35 = vperm.slane %v820_v54, %v2233_v8  ;;  %v789_v10 = vrot.slane %v2831_v21, 4  ;;  %v844_v23 = vsel %vm233_vm0, %v812_v6, %v843_v63 }
 0x1c4   :  { %v917_v25 = vrot.slane %v3641_v60, 4  ;;  %v840_v45 = vperm.slane %v832_v57, %v2233_v8  ;;  %v807_v26 = vrot.slane %v3634_v17, 4  ;;  %v804_v6 = vperm.slane %v796_v43, %v2233_v8  ;;  %v3646_v43 = vld [vmem:[#allocation9_spill] sm:$0xff] }
 0x1c5   :  { %v2857_v32 = vsel %vm233_vm0, %v889_v7, %v848_v0  ;;  %v2870_v33 = vperm.slane %v844_v23, %v2260_v48  ;;  %v879_v17 = vrot.slane %v828_v35, 4  ;;  %v941_v50 = vrot.slane %v2731_v61, 4 }
 0x1c6   :  { %1267 = vrot.lane.b32.xlu2 %v2812_v30, %s2034_s29  ;;  %v2822_v37 = vpop.permute.xlu2 %1195  ;;  %v743_v30 = vrot.slane %v692_v55, 4  ;;  %v867_v55 = vrot.slane %v824_v56, 4  ;;  %3642 = vst [vmem:[#allocation13_spill] sm:$0xff] %v2857_v32  ;;  %v808_v63 = vsel %vm233_vm0, %v2178_v39, %v807_v26  ;;  %v877_v57 = vrot.slane %v840_v45, 4 }
 0x1c7   :  { %v855_v23 = vrot.slane %v804_v6, 4 }
 0x1c8   :  { %v744_v14 = vsel %vm233_vm0, %v2714_v11, %v743_v30  ;;  %v868_v56 = vsel %vm233_vm0, %v2756_v12, %v867_v55  ;;  %v779_v30 = vrot.slane %v2776_v44, 4  ;;  %v3644_v12 = vld [vmem:[#allocation5_spill] sm:$0xff]  ;;  %v880_v55 = vsel %vm233_vm0, %v840_v45, %v879_v17 }
 0x1c9   :  { %1263 = vrot.lane.b32.xlu0 %v2827_v34, %s2034_s29  ;;  %v2863_v11 = vperm.slane %v744_v14, %v2260_v48  ;;  %v918_v7 = vsel %vm233_vm0, %v917_v25, %v3644_v12  ;;  %v2890_v39 = vperm.slane %v868_v56, %v2260_v48  ;;  %v905_v14 = vrot.slane %v3646_v43, 4  ;;  %v3647_v25 = vld [vmem:[#allocation21_spill] sm:$0xff]  ;;  %v3650_v34 = vld [vmem:[#allocation3_spill] sm:$0xff] }
 0x1ca   :  { %1253 = vrot.lane.b32.xlu1 %v2837_v13, %s2034_s29  ;;  %v2885_v44 = vsel %vm233_vm0, %v2742_v24, %v779_v30  ;;  %v929_v26 = vrot.slane %v3647_v25, 4  ;;  %v895_v24 = vrot.slane %v2870_v33, 4  ;;  %v2900_v30 = vperm.slane %v918_v7, %v2233_v8 }
 0x1cb   :  { %v2879_v54 = vsel %vm233_vm0, %v789_v10, %v2863_v11  ;;  %3645 = vst [vmem:[#allocation5_spill] sm:$0xff] %v2885_v44  ;;  %v816_v10 = vperm.slane %v808_v63, %v2233_v8  ;;  %v785_v45 = vrot.slane %v2801_v62, 4  ;;  %v2910_v17 = vperm.slane %v880_v55, %v2260_v48 }
 0x1cc   :  { %3643 = vst [vmem:[#allocation33_spill] sm:$0xff] %v2879_v54  ;;  %v878_v63 = vsel %vm233_vm0, %v877_v57, %v828_v35  ;;  %v891_v7 = vrot.slane %v848_v0, 4  ;;  %v953_v55 = vrot.slane %v2900_v30, 4 }
 0x1cd   :  { %v853_v49 = vrot.slane %v816_v10, 4  ;;  %v856_v62 = vsel %vm233_vm0, %v816_v10, %v855_v23  ;;  %v2930_v0 = vperm.slane %v878_v63, %v2260_v48  ;;  %v2937_v10 = vsel %vm233_vm0, %v785_v45, %v2785_v58 }
 0x1ce   :  { %1273 = vrot.lane.b32.xlu2 %v2857_v32, %s2034_s29  ;;  %v2875_v36 = vpop.permute.xlu2 %1201  ;;  %v3648_v32 = vld [vmem:[#allocation17_spill] sm:$0xff]  ;;  %v2927_v57 = vsel %vm233_vm0, %v2816_v41, %v891_v7  ;;  %v901_v23 = vrot.slane %v2910_v17, 4  ;;  %v864_v58 = vperm.slane %v856_v62, %v2260_v48  ;;  %v791_v62 = vrot.slane %v2863_v11, 4 }
 0x1cf   :  { %v942_v56 = vsel %vm233_vm0, %v941_v50, %v3648_v32  ;;  %v943_v50 = vrot.slane %v3648_v32, 4  ;;  %3652 = vst [vmem:[#allocation21_spill] sm:$0xff] %v2927_v57  ;;  %v931_v32 = vrot.slane %v3651_v22, 4  ;;  %v854_v45 = vsel %vm233_vm0, %v853_v49, %v804_v6 }
 0x1d0   :  { %v948_v13 = vperm.slane %v942_v56, %v2233_v8  ;;  %3653 = vst [vmem:[#allocation17_spill] sm:$0xff] %v2937_v10  ;;  %v2949_v56 = vpop.permute.xlu0 %222  ;;  %v897_v7 = vrot.slane %v2930_v0, 4  ;;  %v2967_v49 = vperm.slane %v854_v45, %v2260_v48  ;;  %v2985_v45 = vsel %vm233_vm0, %v2831_v21, %v791_v62 }
 0x1d1   :  { %1269 = vrot.lane.b32.xlu0 %v2879_v54, %s2034_s29  ;;  %v2906_v54 = vsel %vm233_vm0, %v2890_v39, %v895_v24  ;;  %v930_v24 = vsel %vm233_vm0, %v929_v26, %v3651_v22  ;;  %v919_v22 = vrot.slane %v3644_v12, 4  ;;  %3656 = vst [vmem:[#allocation34_spill] sm:$0xff] %v2985_v45 }
 0x1d2   :  { %1259 = vrot.lane.b32.xlu1 %v2885_v44, %s2034_s29  ;;  %3649 = vst [vmem:[#allocation9_spill] sm:$0xff] %v2906_v54  ;;  %v906_v44 = vsel %vm233_vm0, %v905_v14, %v3650_v34  ;;  %v944_v14 = vsel %vm233_vm0, %v2731_v61, %v943_v50  ;;  %v936_v26 = vperm.slane %v930_v24, %v2233_v8 }
 0x1d3   :  { %v912_v41 = vperm.slane %v906_v44, %v2233_v8  ;;  %v932_v61 = vsel %vm233_vm0, %v3647_v25, %v931_v32  ;;  %v2954_v63 = vperm.slane %v944_v14, %v2233_v8  ;;  %v977_v44 = vrot.slane %v948_v13, 4 }
 0x1d4   :  { %v920_v12 = vsel %vm233_vm0, %v3641_v60, %v919_v22  ;;  %v2961_v24 = vsel %vm233_vm0, %v901_v23, %v864_v58  ;;  %v940_v25 = vperm.slane %v932_v61, %v2233_v8  ;;  %v2980_v23 = vsel %vm233_vm0, %v897_v7, %v2967_v49 }
 0x1d5   :  { %v954_v50 = vsel %vm233_vm0, %v953_v55, %v912_v41  ;;  %3654 = vst [vmem:[#allocation3_spill] sm:$0xff] %v2961_v24  ;;  %v978_v6 = vsel %vm233_vm0, %v977_v44, %v936_v26  ;;  %v928_v60 = vperm.slane %v920_v12, %v2233_v8  ;;  %v989_v32 = vrot.slane %v2954_v63, 4 }
 0x1d6   :  { %1279 = vrot.lane.b32.xlu2 %v2906_v54, %s2034_s29  ;;  %v2972_v55 = vperm.slane %v954_v50, %v2260_v48  ;;  %3655 = vst [vmem:[#allocation12_spill] sm:$0xff] %v2980_v23  ;;  %v907_v22 = vrot.slane %v3650_v34, 4  ;;  %v979_v61 = vrot.slane %v936_v26, 4  ;;  %v2990_v11 = vperm.slane %v978_v6, %v2260_v48  ;;  %v3657_v50 = vld [vmem:[#allocation19_spill] sm:$0xff] }
 0x1d7   :  { %v990_v44 = vsel %vm233_vm0, %v989_v32, %v940_v25  ;;  %v965_v21 = vrot.slane %v928_v60, 4  ;;  %v1041_v12 = vrot.slane %v3657_v50, 4  ;;  %v893_v6 = vrot.slane %v2890_v39, 4 }
 0x1d8   :  { %v2923_v35 = vpop.permute.xlu2 %1213  ;;  %v908_v7 = vsel %vm233_vm0, %v3646_v43, %v907_v22  ;;  %v1003_v26 = vrot.slane %v2972_v55, 4  ;;  %v3007_v32 = vperm.slane %v990_v44, %v2260_v48  ;;  %v1053_v22 = vrot.slane %v2949_v56, 4 }
 0x1d9   :  { %1275 = vrot.lane.b32.xlu0 %v2927_v57, %s2034_s29  ;;  %v916_v43 = vperm.slane %v908_v7, %v2233_v8  ;;  %v903_v54 = vrot.slane %v864_v58, 4  ;;  %v3028_v57 = vsel %vm233_vm0, %v893_v6, %v2870_v33 }
 0x1da   :  { %1265 = vrot.lane.b32.xlu1 %v2937_v10, %s2034_s29  ;;  %v3003_v62 = vsel %vm233_vm0, %v2990_v11, %v1003_v26  ;;  %v1009_v58 = vrot.slane %v3007_v32, 4 }
 0x1db   :  { %3658 = vst [vmem:[#allocation19_spill] sm:$0xff] %v3003_v62  ;;  %v3018_v26 = vsel %vm233_vm0, %v2910_v17, %v903_v54  ;;  %v966_v39 = vsel %vm233_vm0, %v965_v21, %v916_v43  ;;  %v967_v54 = vrot.slane %v916_v43, 4  ;;  %v991_v17 = vrot.slane %v940_v25, 4 }
 0x1dc   :  { %3659 = vst [vmem:[#allocation35_spill] sm:$0xff] %v3018_v26  ;;  %v972_v33 = vperm.slane %v966_v39, %v2260_v48  ;;  %v1031_v39 = vrot.slane %v3666_v46, 4 }
 0x1dd   :  { %v968_v43 = vsel %vm233_vm0, %v928_v60, %v967_v54  ;;  %v992_v60 = vsel %vm233_vm0, %v2954_v63, %v991_v17 }
 0x1de   :  { %1285 = vrot.lane.b32.xlu2 %v2961_v24, %s2034_s29  ;;  %v980_v24 = vsel %vm233_vm0, %v948_v13, %v979_v61  ;;  %v955_v13 = vrot.slane %v912_v41, 4  ;;  %v3660_v61 = vld [vmem:[#allocation16_spill] sm:$0xff]  ;;  %v3663_v41 = vld [vmem:[#allocation7_spill] sm:$0xff]  ;;  %v3051_v20 = vsel %vm233_vm0, %v1009_v58, %v972_v33  ;;  %v3065_v58 = vperm.slane %v968_v43, %v2260_v48 }
 0x1df   :  { %v3022_v44 = vperm.slane %v980_v24, %v2260_v48  ;;  %v1042_v7 = vsel %vm233_vm0, %v1041_v12, %v3660_v61  ;;  %3661 = vst [vmem:[#allocation16_spill] sm:$0xff] %v3028_v57  ;;  %v1017_v24 = vrot.slane %v3663_v41, 4 }
 0x1e0   :  { %v2976_v14 = vpop.permute.xlu2 %1219  ;;  %v956_v6 = vsel %vm233_vm0, %v2900_v30, %v955_v13  ;;  %v1048_v25 = vperm.slane %v1042_v7, %v2233_v8  ;;  %v2035_v13 = vmov 0   ;;  %v3667_v7 = vld [vmem:[#allocation4_spill] sm:$0xff] }
 0x1e1   :  { %1281 = vrot.lane.b32.xlu0 %v2980_v23, %s2034_s29  ;;  %v3057_v30 = vperm.slane %v956_v6, %v2260_v48  ;;  %v1018_v54 = vsel %vm233_vm0, %v1017_v24, %v3667_v7  ;;  %2022 = vset.pattern.permute.xlu2 %v2035_v13 }
 0x1e2   :  { %1271 = vrot.lane.b32.xlu1 %v2985_v45, %s2034_s29  ;;  %2023 = vset.pattern.permute.xlu0 %v2035_v13  ;;  %v1091_v9 = vrot.slane %v1048_v25, 4 }
 0x1e3   :  { %v2997_v34 = vpop.permute.xlu0 %1239  ;;  %2021 = vset.pattern.permute.xlu1 %v2035_v13  ;;  %v1019_v13 = vrot.slane %v3667_v7, 4  ;;  %v1011_v7 = vrot.slane %v972_v33, 4 }
 0x1e6   :  { %1291 = vrot.lane.b32.xlu2 %v3003_v62, %s2034_s29  ;;  %v3662_v62 = vld [vmem:[#allocation15_spill] sm:$0xff] }
 0x1e7   :  { %v1054_v21 = vsel %vm233_vm0, %v1053_v22, %v3662_v62  ;;  %v1005_v22 = vrot.slane %v3022_v44, 4  ;;  %3665 = vst [vmem:[#allocation15_spill] sm:$0xff] %v3051_v20 }
 0x1e8   :  { %v3014_v23 = vpop.permute.xlu2 %1225 }
 0x1e9   :  { %1287 = vrot.lane.b32.xlu0 %v3018_v26, %s2034_s29  ;;  %v3664_v26 = vld [vmem:[#allocation11_spill] sm:$0xff]  ;;  %v3075_v17 = vsel %vm233_vm0, %v1005_v22, %v3057_v30 }
 0x1ea   :  { %1277 = vrot.lane.b32.xlu1 %v3028_v57, %s2034_s29  ;;  %v1029_v45 = vrot.slane %v3664_v26, 4  ;;  %v1060_v57 = vperm.slane %v1054_v21, %v2233_v8  ;;  %v899_v21 = vrot.slane %v2967_v49, 4  ;;  %v1032_v6 = vsel %vm233_vm0, %v3664_v26, %v1031_v39  ;;  %3669 = vst [vmem:[#allocation11_spill] sm:$0xff] %v3075_v17 }
 0x1eb   :  { %v3038_v12 = vpop.permute.xlu0 %1197  ;;  %v1055_v49 = vrot.slane %v3662_v62, 4  ;;  %v1015_v39 = vrot.slane %v3065_v58, 4 }
 0x1ec   :  { %v3046_v10 = vpop.permute.xlu1 %1223  ;;  %v1089_v24 = vrot.slane %v1060_v57, 4  ;;  %v3080_v43 = vsel %vm233_vm0, %v2930_v0, %v899_v21  ;;  %v1092_v26 = vsel %vm233_vm0, %v1060_v57, %v1091_v9  ;;  %v1001_v9 = vrot.slane %v2990_v11, 4 }
 0x1ed   :  { %3670 = vst [vmem:[#allocation8_spill] sm:$0xff] %v3080_v43  ;;  %v1056_v22 = vsel %vm233_vm0, %v2949_v56, %v1055_v49  ;;  %v3118_v11 = vsel %vm233_vm0, %v3007_v32, %v1011_v7 }
 0x1ee   :  { %1297 = vrot.lane.b32.xlu2 %v3051_v20, %s2034_s29  ;;  %v1030_v20 = vsel %vm233_vm0, %v1029_v45, %v3666_v46  ;;  %v3085_v46 = vperm.slane %v992_v60, %v2260_v48  ;;  %v1024_v45 = vperm.slane %v1018_v54, %v2233_v8  ;;  %v1040_v60 = vperm.slane %v1032_v6, %v2233_v8 }
 0x1ef   :  { %v1036_v62 = vperm.slane %v1030_v20, %v2233_v8  ;;  %v1100_v20 = vperm.slane %v1092_v26, %v2260_v48  ;;  %v1090_v57 = vsel %vm233_vm0, %v1089_v24, %v1048_v25  ;;  %v1064_v49 = vperm.slane %v1056_v22, %v2233_v8 }
 0x1f0   :  { %v3071_v63 = vpop.permute.xlu2 %1231  ;;  %v3103_v54 = vsel %vm233_vm0, %v3085_v46, %v1015_v39  ;;  %v1067_v56 = vrot.slane %v1024_v45, 4  ;;  %v1020_v6 = vsel %vm233_vm0, %v3663_v41, %v1019_v13  ;;  %v1043_v39 = vrot.slane %v3660_v61, 4 }
 0x1f1   :  { %3668 = vst [vmem:[#allocation7_spill] sm:$0xff] %v3071_v63  ;;  %1293 = vrot.lane.b32.xlu0 %v3075_v17, %s2034_s29  ;;  %v1065_v17 = vrot.slane %v1036_v62, 4  ;;  %v1096_v24 = vperm.slane %v1090_v57, %v2260_v48  ;;  %v3126_v41 = vsel %vm233_vm0, %v1001_v9, %v2972_v55  ;;  %v1117_v61 = vrot.slane %v1100_v20, 4 }
 0x1f2   :  { %1283 = vrot.lane.b32.xlu1 %v3080_v43, %s2034_s29  ;;  %3671 = vst [vmem:[#allocation4_spill] sm:$0xff] %v3103_v54  ;;  %v1077_v43 = vrot.slane %v1040_v60, 4  ;;  %v1068_v25 = vsel %vm233_vm0, %v1036_v62, %v1067_v56  ;;  %v1044_v33 = vsel %vm233_vm0, %v3657_v50, %v1043_v39  ;;  %v1028_v26 = vperm.slane %v1020_v6, %v2233_v8 }
 0x1f3   :  { %v3094_v0 = vpop.permute.xlu0 %1203  ;;  %v1101_v22 = vrot.slane %v1064_v49, 4  ;;  %v1076_v62 = vperm.slane %v1068_v25, %v2260_v48  ;;  %v1066_v50 = vsel %vm233_vm0, %v1065_v17, %v1024_v45  ;;  %v1052_v13 = vperm.slane %v1044_v33, %v2233_v8 }
 0x1f4   :  { %v3099_v21 = vpop.permute.xlu1 %1193  ;;  %v1113_v9 = vrot.slane %v1096_v24, 4  ;;  %v1078_v57 = vsel %vm233_vm0, %v1077_v43, %v1028_v26  ;;  %v1072_v7 = vperm.slane %v1066_v50, %v2260_v48  ;;  %v1007_v39 = vrot.slane %v3057_v30, 4 }
 0x1f5   :  { %v3140_v56 = vsel %vm233_vm0, %v1117_v61, %v1076_v62  ;;  %v1102_v6 = vsel %vm233_vm0, %v1101_v22, %v1052_v13  ;;  %v1084_v17 = vperm.slane %v1078_v57, %v2260_v48  ;;  %v1103_v30 = vrot.slane %v1052_v13, 4 }
 0x1f6   :  { %1303 = vrot.lane.b32.xlu2 %v3103_v54, %s2034_s29  ;;  %v3151_v25 = vsel %vm233_vm0, %v1113_v9, %v1072_v7  ;;  %v3155_v43 = vsel %vm233_vm0, %v3022_v44, %v1007_v39  ;;  %v1108_v33 = vperm.slane %v1102_v6, %v2260_v48  ;;  %v1013_v44 = vrot.slane %v3085_v46, 4 }
 0x1f7   :  { %v1123_v22 = vrot.slane %v1084_v17, 4  ;;  %v1104_v57 = vsel %vm233_vm0, %v1064_v49, %v1103_v30  ;;  %v1119_v39 = vrot.slane %v1076_v62, 4  ;;  %v1079_v54 = vrot.slane %v1028_v26, 4 }
 0x1f8   :  { %v3114_v63 = vpop.permute.xlu2 %1237  ;;  %v1112_v13 = vperm.slane %v1104_v57, %v2260_v48  ;;  %v3177_v49 = vsel %vm233_vm0, %v1013_v44, %v3065_v58  ;;  %v1115_v57 = vrot.slane %v1072_v7, 4  ;;  %v1386_v7 = vmax.f32 %v2349_v3, %v2822_v37 }
 0x1f9   :  { %1299 = vrot.lane.b32.xlu0 %v3118_v11, %s2034_s29  ;;  %v3164_v9 = vsel %vm233_vm0, %v1108_v33, %v1123_v22  ;;  %v3172_v6 = vsel %vm233_vm0, %v1100_v20, %v1119_v39  ;;  %v1080_v62 = vsel %vm233_vm0, %v1040_v60, %v1079_v54  ;;  %v1385_v20 = vmax.f32 %v2473_v27, %v3099_v21 }
 0x1fa   :  { %1289 = vrot.lane.b32.xlu1 %v3126_v41, %s2034_s29  ;;  %v1125_v22 = vrot.slane %v1112_v13, 4  ;;  %v1088_v26 = vperm.slane %v1080_v62, %v2260_v48  ;;  %v3193_v39 = vsel %vm233_vm0, %v1096_v24, %v1115_v57  ;;  %v1121_v54 = vrot.slane %v1108_v33, 4 }
 0x1fb   :  { %v3133_v32 = vpop.permute.xlu0 %1209 }
 0x1fc   :  { %v1200_v55 = vpop.permute.xlu1 %1199  ;;  %v3190_v44 = vsel %vm233_vm0, %v1125_v22, %v1088_v26  ;;  %v3205_v24 = vsel %vm233_vm0, %v1121_v54, %v1084_v17  ;;  %v1390_v22 = vmax.f32 %v2464_v15, %v3094_v0  ;;  %v1127_v33 = vrot.slane %v1088_v26, 4 }
 0x1fd   :  { %v1388_v60 = vmax.f32 %v2502_v18, %v1200_v55  ;;  %v1393_v17 = vmax.f32 %v2497_v31, %v3133_v32  ;;  %v1387_v31 = vmax.f32 %v2424_v42, %v3038_v12 }
 0x1fe   :  { %1309 = vrot.lane.b32.xlu2 %v3140_v56, %s2034_s29  ;;  %v3215_v3 = vsel %vm233_vm0, %v1112_v13, %v1127_v33 }
 0x200   :  { %v3148_v45 = vpop.permute.xlu2 %1243 }
 0x201   :  { %1305 = vrot.lane.b32.xlu0 %v3151_v25, %s2034_s29 }
 0x202   :  { %1295 = vrot.lane.b32.xlu1 %v3155_v43, %s2034_s29 }
 0x203   :  { %v1216_v61 = vpop.permute.xlu0 %1215 }
 0x204   :  { %v1206_v50 = vpop.permute.xlu1 %1205  ;;  %v1396_v26 = vmax.f32 %v2523_v4, %v1216_v61  ;;  %v3674_v4 = vld [vmem:[#allocation23_spill] sm:$0xff] }
 0x205   :  { %v1391_v55 = vmax.f32 %v2529_v2, %v1206_v50  ;;  %v3672_v2 = vld [vmem:[#allocation20_spill] sm:$0xff]  ;;  %v1389_v61 = vmax.f32 %v3674_v4, %v2875_v36  ;;  %v3682_v4 = vld [vmem:[#allocation14_spill] sm:$0xff] }
 0x206   :  { %1315 = vrot.lane.b32.xlu2 %v3164_v9, %s2034_s29  ;;  %v1392_v0 = vmax.f32 %v3672_v2, %v2781_v52 }
 0x208   :  { %v3169_v8 = vpop.permute.xlu2 %1249 }
 0x209   :  { %1311 = vrot.lane.b32.xlu0 %v3172_v6, %s2034_s29 }
 0x20a   :  { %1301 = vrot.lane.b32.xlu1 %v3177_v49, %s2034_s29 }
 0x20b   :  { %v1222_v46 = vpop.permute.xlu0 %1221 }
 0x20c   :  { %v1212_v30 = vpop.permute.xlu1 %1211  ;;  %v1399_v52 = vmax.f32 %v2563_v19, %v1222_v46  ;;  %v1395_v19 = vmax.f32 %v2448_v1, %v2923_v35  ;;  %v3675_v1 = vld [vmem:[#allocation22_spill] sm:$0xff] }
 0x20d   :  { %v1394_v15 = vmax.f32 %v2568_v59, %v1212_v30  ;;  %v1408_v35 = vmax.f32 %v3675_v1, %v2997_v34  ;;  %v3678_v34 = vld [vmem:[#allocation25_spill] sm:$0xff] }
 0x20e   :  { %1514 = vperm.xlu2 %2022, %v1385_v20  }
 0x210   :  { %v3187_v58 = vpop.permute.xlu2 %1255 }
 0x211   :  { %1317 = vrot.lane.b32.xlu0 %v3190_v44, %s2034_s29 }
 0x212   :  { %1307 = vrot.lane.b32.xlu1 %v3193_v39, %s2034_s29 }
 0x213   :  { %v1228_v27 = vpop.permute.xlu0 %1227 }
 0x214   :  { %v1218_v21 = vpop.permute.xlu1 %1217 }
 0x216   :  { %1523 = vperm.xlu2 %2022, %v1388_v60  }
 0x218   :  { %v3202_v62 = vpop.permute.xlu2 %1261 }
 0x219   :  { %1517 = vperm.xlu0 %2023, %v1386_v7   ;;  %v1397_v7 = vmax.f32 %v2611_v40, %v1218_v21  ;;  %v1402_v40 = vmax.f32 %v2605_v38, %v1228_v27  ;;  %v1398_v38 = vmax.f32 %v2488_v47, %v2976_v14 }
 0x21a   :  { %1313 = vrot.lane.b32.xlu1 %v3205_v24, %s2034_s29 }
 0x21b   :  { %v1234_v20 = vpop.permute.xlu0 %1233 }
 0x21c   :  { %v1230_v18 = vpop.permute.xlu1 %1229  ;;  %v1405_v36 = vmax.f32 %v2641_v53, %v1234_v20  ;;  %v1401_v53 = vmax.f32 %v2513_v51, %v3014_v23  ;;  %v3679_v51 = vld [vmem:[#allocation30_spill] sm:$0xff] }
 0x21d   :  { %v1403_v21 = vmax.f32 %v2651_v5, %v1230_v18 }
 0x21e   :  { %1529 = vperm.xlu2 %2022, %v1390_v22   ;;  %v3673_v22 = vld [vmem:[#allocation24_spill] sm:$0xff] }
 0x220   :  { %v3212_v57 = vpop.permute.xlu2 %1267 }
 0x221   :  { %1532 = vperm.xlu0 %2023, %v1391_v55   ;;  %v1400_v55 = vmax.f32 %v3673_v22, %v3046_v10 }
 0x222   :  { %1319 = vrot.lane.b32.xlu1 %v3215_v3, %s2034_s29 }
 0x223   :  { %v1246_v37 = vpop.permute.xlu0 %1245 }
 0x224   :  { %v1236_v60 = vpop.permute.xlu1 %1235 }
 0x226   :  { %1538 = vperm.xlu2 %2022, %v1393_v17  }
 0x228   :  { %v3224_v50 = vpop.permute.xlu2 %1273 }
 0x229   :  { %1541 = vperm.xlu0 %2023, %v1394_v15   ;;  %v1406_v15 = vmax.f32 %v2697_v16, %v1236_v60  ;;  %v1411_v16 = vmax.f32 %v2693_v29, %v1246_v37  ;;  %v3676_v60 = vld [vmem:[#allocation6_spill] sm:$0xff] }
 0x22a   :  { %1535 = vperm.xlu1 %2021, %v1392_v0   ;;  %v3681_v29 = vld [vmem:[#allocation26_spill] sm:$0xff] }
 0x22b   :  { %v1252_v13 = vpop.permute.xlu0 %1251  ;;  %v1407_v37 = vmax.f32 %v3681_v29, %v3114_v63  ;;  %v3685_v63 = vld [vmem:[#allocation31_spill] sm:$0xff] }
 0x22c   :  { %v1242_v54 = vpop.permute.xlu1 %1241  ;;  %v1414_v23 = vmax.f32 %v3679_v51, %v1252_v13  ;;  %v3684_v13 = vld [vmem:[#allocation27_spill] sm:$0xff] }
 0x22d   :  { %v1409_v2 = vmax.f32 %v2749_v28, %v1242_v54 }
 0x22e   :  { %1547 = vperm.xlu2 %2022, %v1396_v26   ;;  %v3677_v26 = vld [vmem:[#allocation7_spill] sm:$0xff] }
 0x230   :  { %v3230_v32 = vpop.permute.xlu2 %1279 }
 0x231   :  { %1550 = vperm.xlu0 %2023, %v1397_v7   ;;  %v1404_v7 = vmax.f32 %v3678_v34, %v3677_v26  ;;  %v3689_v26 = vld [vmem:[#allocation34_spill] sm:$0xff] }
 0x232   :  { %1520 = vperm.xlu1 %2021, %v1387_v31  }
 0x233   :  { %v1258_v59 = vpop.permute.xlu0 %1257 }
 0x234   :  { %v1248_v30 = vpop.permute.xlu1 %1247 }
 0x235   :  { %v1412_v0 = vmax.f32 %v3676_v60, %v1248_v30 }
 0x236   :  { %1556 = vperm.xlu2 %2022, %v1399_v52   ;;  %v3680_v52 = vld [vmem:[#allocation32_spill] sm:$0xff] }
 0x238   :  { %v3237_v33 = vpop.permute.xlu2 %1285 }
 0x239   :  { %1559 = vperm.xlu0 %2023, %v1400_v55  }
 0x23a   :  { %1526 = vperm.xlu1 %2021, %v1389_v61   ;;  %v1417_v61 = vmax.f32 %v3682_v4, %v1258_v59  ;;  %v3687_v59 = vld [vmem:[#allocation28_spill] sm:$0xff] }
 0x23b   :  { %v1264_v42 = vpop.permute.xlu0 %1263 }
 0x23c   :  { %v1254_v12 = vpop.permute.xlu1 %1253 }
 0x23d   :  { %v1415_v22 = vmax.f32 %v3680_v52, %v1254_v12 }
 0x23e   :  { %1565 = vperm.xlu2 %2022, %v1402_v40  }
 0x240   :  { %v3243_v46 = vpop.permute.xlu2 %1291 }
 0x241   :  { %1568 = vperm.xlu0 %2023, %v1403_v21   ;;  %v3683_v21 = vld [vmem:[#allocation5_spill] sm:$0xff] }
 0x242   :  { %1544 = vperm.xlu1 %2021, %v1395_v19  }
 0x243   :  { %v1270_v10 = vpop.permute.xlu0 %1269 }
 0x244   :  { %v1260_v17 = vpop.permute.xlu1 %1259 }
 0x245   :  { %v1418_v19 = vmax.f32 %v3683_v21, %v1260_v17  ;;  %v1705_v21 = vlaneseq }
 0x246   :  { %1574 = vperm.xlu2 %2022, %v1405_v36   ;;  %v1410_v36 = vmax.f32 %v3684_v13, %v3148_v45  ;;  %v3688_v45 = vld [vmem:[#allocation33_spill] sm:$0xff] }
 0x247   :  { %v1423_v60 = vmax.f32 %v3688_v45, %v1270_v10  ;;  %v3693_v10 = vld [vmem:[#allocation10_spill] sm:$0xff]  ;;  %v3698_v45 = vld [vmem:[#allocation13_spill] sm:$0xff] }
 0x248   :  { %v3249_v27 = vpop.permute.xlu2 %1297 }
 0x249   :  { %1577 = vperm.xlu0 %2023, %v1406_v15  }
 0x24a   :  { %1553 = vperm.xlu1 %2021, %v1398_v38   ;;  %v1420_v38 = vmax.f32 %v3685_v63, %v1264_v42  ;;  %v3690_v42 = vld [vmem:[#allocation29_spill] sm:$0xff] }
 0x24b   :  { %v1276_v5 = vpop.permute.xlu0 %1275 }
 0x24c   :  { %v1266_v18 = vpop.permute.xlu1 %1265 }
 0x24e   :  { %1583 = vperm.xlu2 %2022, %v1408_v35   ;;  %v3686_v35 = vld [vmem:[#allocation17_spill] sm:$0xff] }
 0x250   :  { %v3256_v20 = vpop.permute.xlu2 %1303 }
 0x251   :  { %1586 = vperm.xlu0 %2023, %v1409_v2   ;;  %v1421_v2 = vmax.f32 %v3686_v35, %v1266_v18  ;;  %v3697_v35 = vld [vmem:[#allocation35_spill] sm:$0xff] }
 0x252   :  { %1562 = vperm.xlu1 %2021, %v1401_v53   ;;  %v1413_v53 = vmax.f32 %v3687_v59, %v3169_v8  ;;  %v3691_v8 = vld [vmem:[#allocation21_spill] sm:$0xff] }
 0x253   :  { %v1282_v47 = vpop.permute.xlu0 %1281 }
 0x254   :  { %v1272_v14 = vpop.permute.xlu1 %1271 }
 0x255   :  { %v1424_v34 = vmax.f32 %v3689_v26, %v1272_v14 }
 0x256   :  { %1592 = vperm.xlu2 %2022, %v1411_v16  }
 0x258   :  { %v3262_v31 = vpop.permute.xlu2 %1309 }
 0x259   :  { %1595 = vperm.xlu0 %2023, %v1412_v0  }
 0x25a   :  { %1571 = vperm.xlu1 %2021, %v1404_v7   ;;  %v1416_v7 = vmax.f32 %v3690_v42, %v3187_v58  ;;  %v3694_v58 = vld [vmem:[#allocation12_spill] sm:$0xff] }
 0x25b   :  { %v3264_v28 = vpop.permute.xlu0 %1287 }
 0x25c   :  { %v1278_v54 = vpop.permute.xlu1 %1277 }
 0x25e   :  { %1601 = vperm.xlu2 %2022, %v1414_v23   ;;  %v1426_v23 = vmax.f32 %v3691_v8, %v1276_v5  ;;  %v3695_v5 = vld [vmem:[#allocation8_spill] sm:$0xff]  ;;  %v3700_v8 = vld [vmem:[#allocation9_spill] sm:$0xff] }
 0x260   :  { %v3270_v55 = vpop.permute.xlu2 %1315 }
 0x261   :  { %1604 = vperm.xlu0 %2023, %v1415_v22   ;;  %v3692_v22 = vld [vmem:[#allocation16_spill] sm:$0xff] }
 0x262   :  { %1580 = vperm.xlu1 %2021, %v1407_v37   ;;  %v1427_v29 = vmax.f32 %v3692_v22, %v1278_v54  ;;  %v1419_v37 = vmax.f32 %v3693_v10, %v3202_v62  ;;  %v3306_v54 = vand.u32 127, %v1705_v21 }
 0x263   :  { %v3272_v30 = vpop.permute.xlu0 %1293 }
 0x264   :  { %v1284_v40 = vpop.permute.xlu1 %1283 }
 0x265   :  { %v1430_v13 = vmax.f32 %v3695_v5, %v1284_v40 }
 0x266   :  { %1610 = vperm.xlu2 %2022, %v1417_v61   ;;  %v1429_v61 = vmax.f32 %v3694_v58, %v1282_v47  ;;  %v1432_v47 = vmax.f32 %v3697_v35, %v3264_v28 }
 0x268   :  { %v1515_v15 = vpop.permute.xlu2 %1514 }
 0x269   :  { %1613 = vperm.xlu0 %2023, %v1418_v19  }
 0x26a   :  { %1589 = vperm.xlu1 %2021, %v1410_v36   ;;  %v3696_v36 = vld [vmem:[#allocation2_spill] sm:$0xff] }
 0x26b   :  { %v3278_v12 = vpop.permute.xlu0 %1299  ;;  %v1422_v63 = vmax.f32 %v3696_v36, %v3212_v57 }
 0x26c   :  { %v1290_v1 = vpop.permute.xlu1 %1289 }
 0x26d   :  { %v1433_v57 = vmax.f32 %v3126_v41, %v1290_v1 }
 0x26e   :  { %1619 = vperm.xlu2 %2022, %v1420_v38  }
 0x270   :  { %v3284_v16 = vpop.permute.xlu2 %1523 }
 0x271   :  { %1622 = vperm.xlu0 %2023, %v1421_v2   ;;  %v1707_v2 = vperm.slane %v1515_v15, %v3306_v54  ;;  %v1710_v58 = vperm.slane %v3284_v16, %v3306_v54 }
 0x272   :  { %1598 = vperm.xlu1 %2021, %v1413_v53  }
 0x273   :  { %v1306_v17 = vpop.permute.xlu0 %1305 }
 0x274   :  { %v1296_v0 = vpop.permute.xlu1 %1295 }
 0x276   :  { %1628 = vperm.xlu2 %2022, %v1423_v60   ;;  %v1425_v60 = vmax.f32 %v3698_v45, %v3224_v50  ;;  %v1436_v50 = vmax.f32 %v3155_v43, %v1296_v0 }
 0x278   :  { %v3290_v51 = vpop.permute.xlu2 %1529 }
 0x279   :  { %1631 = vperm.xlu0 %2023, %v1424_v34   ;;  %v3699_v34 = vld [vmem:[#allocation11_spill] sm:$0xff] }
 0x27a   :  { %1607 = vperm.xlu1 %2021, %v1416_v7   ;;  %v1435_v28 = vmax.f32 %v3699_v34, %v3272_v30  ;;  %v1441_v7 = vmax.f32 %v3151_v25, %v1306_v17  ;;  %v1443_v25 = vmax.f32 %v3140_v56, %v3262_v31  ;;  %v1438_v56 = vmax.f32 %v3118_v11, %v3278_v12 }
 0x27b   :  { %v1312_v18 = vpop.permute.xlu0 %1311  ;;  %v1712_v12 = vperm.slane %v3290_v51, %v3306_v54 }
 0x27c   :  { %v3293_v52 = vpop.permute.xlu1 %1301  ;;  %v1444_v43 = vmax.f32 %v3172_v6, %v1312_v18 }
 0x27d   :  { %v1439_v5 = vmax.f32 %v3177_v49, %v3293_v52 }
 0x27e   :  { %1637 = vperm.xlu2 %2022, %v1426_v23   ;;  %v1428_v23 = vmax.f32 %v3700_v8, %v3230_v32  ;;  %v3701_v32 = vld [vmem:[#allocation3_spill] sm:$0xff] }
 0x27f   :  { %v1431_v17 = vmax.f32 %v3701_v32, %v3237_v33  ;;  %v3702_v33 = vld [vmem:[#allocation19_spill] sm:$0xff] }
 0x280   :  { %v1539_v4 = vpop.permute.xlu2 %1538 }
 0x281   :  { %1640 = vperm.xlu0 %2023, %v1427_v29   ;;  %v1715_v1 = vperm.slane %v1539_v4, %v3306_v54 }
 0x282   :  { %1616 = vperm.xlu1 %2021, %v1419_v37  }
 0x283   :  { %v3298_v14 = vpop.permute.xlu0 %1317 }
 0x284   :  { %v3301_v19 = vpop.permute.xlu1 %1307 }
 0x285   :  { %v1442_v49 = vmax.f32 %v3193_v39, %v3301_v19 }
 0x286   :  { %1646 = vperm.xlu2 %2022, %v1429_v61   ;;  %v1434_v61 = vmax.f32 %v3702_v33, %v3243_v46  ;;  %v1446_v46 = vmax.f32 %v3164_v9, %v3270_v55  ;;  %v1447_v55 = vmax.f32 %v3190_v44, %v3298_v14 }
 0x288   :  { %v3308_v62 = vpop.permute.xlu2 %1547 }
 0x289   :  { %1649 = vperm.xlu0 %2023, %v1430_v13   ;;  %v1718_v39 = vperm.slane %v3308_v62, %v3306_v54 }
 0x28a   :  { %1625 = vperm.xlu1 %2021, %v1422_v63  }
 0x28b   :  { %v1518_v38 = vpop.permute.xlu0 %1517 }
 0x28c   :  { %v3313_v59 = vpop.permute.xlu1 %1313  ;;  %v1708_v40 = vperm.slane %v1518_v38, %v3306_v54 }
 0x28e   :  { %v1772_v53 = vsel %vm1771_vm1, %v1708_v40, %v1707_v2  ;;  %1655 = vperm.xlu2 %2022, %v1432_v47  }
 0x290   :  { %v3322_v42 = vpop.permute.xlu2 %1556 }
 0x291   :  { %1658 = vperm.xlu0 %2023, %v1433_v57   ;;  %v3703_v57 = vld [vmem:[#allocation15_spill] sm:$0xff] }
 0x292   :  { %1634 = vperm.xlu1 %2021, %v1425_v60   ;;  %v1437_v45 = vmax.f32 %v3703_v57, %v3249_v27  ;;  %v1445_v27 = vmax.f32 %v3205_v24, %v3313_v59  ;;  %v3704_v24 = vld [vmem:[#allocation4_spill] sm:$0xff] }
 0x293   :  { %v1533_v26 = vpop.permute.xlu0 %1532  ;;  %v1440_v59 = vmax.f32 %v3704_v24, %v3256_v20 }
 0x294   :  { %v3324_v15 = vpop.permute.xlu1 %1319  ;;  %v1713_v13 = vperm.slane %v1533_v26, %v3306_v54 }
 0x295   :  { %v1448_v19 = vmax.f32 %v3215_v3, %v3324_v15  ;;  %v1721_v3 = vperm.slane %v3322_v42, %v3306_v54 }
 0x296   :  { %1664 = vperm.xlu2 %2022, %v1435_v28  }
 0x298   :  { %v3332_v29 = vpop.permute.xlu2 %1565 }
 0x299   :  { %1682 = vperm.xlu0 %2023, %v1441_v7  }
 0x29a   :  { %1643 = vperm.xlu1 %2021, %v1428_v23  }
 0x29b   :  { %v1542_v41 = vpop.permute.xlu0 %1541 }
 0x29c   :  { %v1536_v22 = vpop.permute.xlu1 %1535  ;;  %v1716_v30 = vperm.slane %v1542_v41, %v3306_v54 }
 0x29d   :  { %v1714_v52 = vperm.slane %v1536_v22, %v3306_v54 }
 0x29e   :  { %v1785_v10 = vsel %vm1771_vm1, %v1716_v30, %v1715_v1  ;;  %1667 = vperm.xlu2 %2022, %v1436_v50   ;;  %v1724_v50 = vperm.slane %v3332_v29, %v3306_v54 }
 0x2a0   :  { %v3348_v21 = vpop.permute.xlu2 %1574 }
 0x2a1   :  { %1688 = vperm.xlu0 %2023, %v1443_v25   ;;  %v1727_v29 = vperm.slane %v3348_v21, %v3306_v54 }
 0x2a2   :  { %1652 = vperm.xlu1 %2021, %v1431_v17  }
 0x2a3   :  { %v1551_v37 = vpop.permute.xlu0 %1550 }
 0x2a4   :  { %v1521_v0 = vpop.permute.xlu1 %1520  ;;  %v1719_v40 = vperm.slane %v1551_v37, %v3306_v54 }
 0x2a5   :  { %v1709_v4 = vperm.slane %v1521_v0, %v3306_v54 }
 0x2a6   :  { %1691 = vperm.xlu2 %2022, %v1444_v43  }
 0x2a7   :  { %v1774_v31 = vsel %vm1773_vm2, %v1709_v4, %v1772_v53 }
 0x2a8   :  { %v1776_v6 = vsel %vm1775_vm3, %v1710_v58, %v1774_v31  ;;  %v1584_v51 = vpop.permute.xlu2 %1583 }
 0x2a9   :  { %1673 = vperm.xlu0 %2023, %v1438_v56   ;;  %v1730_v33 = vperm.slane %v1584_v51, %v3306_v54 }
 0x2aa   :  { %1661 = vperm.xlu1 %2021, %v1434_v61  }
 0x2ab   :  { %v1560_v18 = vpop.permute.xlu0 %1559 }
 0x2ac   :  { %v1527_v16 = vpop.permute.xlu1 %1526  ;;  %v1722_v28 = vperm.slane %v1560_v18, %v3306_v54 }
 0x2ad   :  { %v1711_v11 = vperm.slane %v1527_v16, %v3306_v54 }
 0x2ae   :  { %1676 = vperm.xlu2 %2022, %v1439_v5  }
 0x2af   :  { %v1778_v36 = vsel %vm1777_vm4, %v1711_v11, %v1776_v6 }
 0x2b0   :  { %v1780_v63 = vsel %vm1779_vm5, %v1712_v12, %v1778_v36  ;;  %v1593_v26 = vpop.permute.xlu2 %1592 }
 0x2b1   :  { %v1782_v38 = vsel %vm1781_vm6, %v1713_v13, %v1780_v63  ;;  %1697 = vperm.xlu0 %2023, %v1446_v46   ;;  %v1733_v63 = vperm.slane %v1593_v26, %v3306_v54 }
 0x2b2   :  { %v1784_v35 = vsel %vm1783_vm7, %v1714_v52, %v1782_v38  ;;  %1685 = vperm.xlu1 %2021, %v1442_v49  }
 0x2b3   :  { %v1569_v9 = vpop.permute.xlu0 %1568  ;;  %v1844_v61 = vrot.slane %v1784_v35, 4 }
 0x2b4   :  { %v1545_v47 = vpop.permute.xlu1 %1544  ;;  %v1725_v1 = vperm.slane %v1569_v9, %v3306_v54 }
 0x2b5   :  { %v1717_v2 = vperm.slane %v1545_v47, %v3306_v54 }
 0x2b6   :  { %1700 = vperm.xlu2 %2022, %v1447_v55  }
 0x2b7   :  { %v1786_v53 = vsel %vm1773_vm2, %v1717_v2, %v1785_v10 }
 0x2b8   :  { %v1787_v60 = vsel %vm1775_vm3, %v1718_v39, %v1786_v53  ;;  %v1602_v22 = vpop.permute.xlu2 %1601 }
 0x2b9   :  { %1703 = vperm.xlu0 %2023, %v1448_v19   ;;  %v1788_v44 = vsel %vm1777_vm4, %v1719_v40, %v1787_v60  ;;  %v1736_v40 = vperm.slane %v1602_v22, %v3306_v54 }
 0x2ba   :  { %1670 = vperm.xlu1 %2021, %v1437_v45  }
 0x2bb   :  { %v1578_v14 = vpop.permute.xlu0 %1577 }
 0x2bc   :  { %v1554_v62 = vpop.permute.xlu1 %1553  ;;  %v1728_v37 = vperm.slane %v1578_v14, %v3306_v54 }
 0x2bd   :  { %v1720_v34 = vperm.slane %v1554_v62, %v3306_v54 }
 0x2bf   :  { %v1789_v15 = vsel %vm1779_vm5, %v1720_v34, %v1788_v44  ;;  %v3705_v34 = vld [vmem:[#allocation18_spill] sm:$0xff] }
 0x2c0   :  { %v1790_v7 = vsel %vm1781_vm6, %v1721_v3, %v1789_v15  ;;  %v1611_v0 = vpop.permute.xlu2 %1610 }
 0x2c1   :  { %v3388_v8 = vsel %vm1783_vm7, %v1722_v28, %v1790_v7  ;;  %v1739_v46 = vperm.slane %v1611_v0, %v3306_v54 }
 0x2c2   :  { %1694 = vperm.xlu1 %2021, %v1445_v27   ;;  %v1856_v62 = vrot.slane %v3388_v8, 4 }
 0x2c3   :  { %v1587_v23 = vpop.permute.xlu0 %1586 }
 0x2c4   :  { %v1563_v41 = vpop.permute.xlu1 %1562  ;;  %v1731_v49 = vperm.slane %v1587_v23, %v3306_v54 }
 0x2c5   :  { %v1723_v42 = vperm.slane %v1563_v41, %v3306_v54 }
 0x2c7   :  { %v1792_v30 = vsel %vm1771_vm1, %v1724_v50, %v1723_v42 }
 0x2c8   :  { %v1793_v10 = vsel %vm1773_vm2, %v1725_v1, %v1792_v30  ;;  %v1620_v16 = vpop.permute.xlu2 %1619 }
 0x2ca   :  { %1679 = vperm.xlu1 %2021, %v1440_v59  }
 0x2cb   :  { %v1596_v25 = vpop.permute.xlu0 %1595 }
 0x2cc   :  { %v1572_v32 = vpop.permute.xlu1 %1571  ;;  %v1734_v51 = vperm.slane %v1596_v25, %v3306_v54 }
 0x2cd   :  { %v1726_v17 = vperm.slane %v1572_v32, %v3306_v54 }
 0x2cf   :  { %v1794_v43 = vsel %vm1775_vm3, %v1726_v17, %v1793_v10  ;;  %v1742_v17 = vperm.slane %v1620_v16, %v3306_v54 }
 0x2d0   :  { %v1795_v4 = vsel %vm1777_vm4, %v1727_v29, %v1794_v43  ;;  %v1629_v2 = vpop.permute.xlu2 %1628 }
 0x2d1   :  { %v1796_v58 = vsel %vm1779_vm5, %v1728_v37, %v1795_v4 }
 0x2d3   :  { %v1605_v20 = vpop.permute.xlu0 %1604 }
 0x2d4   :  { %v1581_v56 = vpop.permute.xlu1 %1580  ;;  %v1737_v53 = vperm.slane %v1605_v20, %v3306_v54 }
 0x2d5   :  { %v1729_v31 = vperm.slane %v1581_v56, %v3306_v54 }
 0x2d7   :  { %v1797_v6 = vsel %vm1781_vm6, %v1729_v31, %v1796_v58 }
 0x2d8   :  { %v1798_v21 = vsel %vm1783_vm7, %v1730_v33, %v1797_v6  ;;  %v1638_v28 = vpop.permute.xlu2 %1637 }
 0x2d9   :  { %v1842_v18 = vrot.slane %v1798_v21, 4  ;;  %v1845_v5 = vsel %vm233_vm0, %v1798_v21, %v1844_v61  ;;  %v1745_v61 = vperm.slane %v1629_v2, %v3306_v54 }
 0x2da   :  { %v1853_v3 = vperm.slane %v1845_v5, %v3705_v34 }
 0x2db   :  { %v1843_v11 = vsel %vm233_vm0, %v1842_v18, %v1784_v35  ;;  %v1614_v12 = vpop.permute.xlu0 %1613 }
 0x2dc   :  { %v1590_v13 = vpop.permute.xlu1 %1589  ;;  %v1740_v36 = vperm.slane %v1614_v12, %v3306_v54  ;;  %v1849_v27 = vperm.slane %v1843_v11, %v3705_v34  ;;  %v1904_v50 = vrot.slane %v1853_v3, 4 }
 0x2dd   :  { %v1732_v52 = vperm.slane %v1590_v13, %v3306_v54 }
 0x2de   :  { %v1806_v38 = vsel %vm1771_vm1, %v1740_v36, %v1739_v46  ;;  %v1892_v59 = vrot.slane %v1849_v27, 4 }
 0x2df   :  { %v1799_v9 = vsel %vm1771_vm1, %v1732_v52, %v1731_v49 }
 0x2e0   :  { %v1800_v35 = vsel %vm1773_vm2, %v1733_v63, %v1799_v9  ;;  %v1647_v0 = vpop.permute.xlu2 %1646 }
 0x2e1   :  { %v1801_v55 = vsel %vm1775_vm3, %v1734_v51, %v1800_v35 }
 0x2e3   :  { %v1623_v47 = vpop.permute.xlu0 %1622 }
 0x2e4   :  { %v1599_v39 = vpop.permute.xlu1 %1598 }
 0x2e5   :  { %v1735_v19 = vperm.slane %v1599_v39, %v3306_v54 }
 0x2e7   :  { %v1802_v57 = vsel %vm1777_vm4, %v1735_v19, %v1801_v55 }
 0x2e8   :  { %v1803_v45 = vsel %vm1779_vm5, %v1736_v40, %v1802_v57  ;;  %v1656_v16 = vpop.permute.xlu2 %1655 }
 0x2e9   :  { %v1804_v60 = vsel %vm1781_vm6, %v1737_v53, %v1803_v45 }
 0x2eb   :  { %v1632_v44 = vpop.permute.xlu0 %1631 }
 0x2ec   :  { %v1608_v14 = vpop.permute.xlu1 %1607  ;;  %v1746_v6 = vperm.slane %v1632_v44, %v3306_v54 }
 0x2ed   :  { %v1738_v26 = vperm.slane %v1608_v14, %v3306_v54  ;;  %v1751_v14 = vperm.slane %v1647_v0, %v3306_v54 }
 0x2ef   :  { %v1805_v15 = vsel %vm1783_vm7, %v1738_v26, %v1804_v60 }
 0x2f0   :  { %v1854_v7 = vrot.slane %v1805_v15, 4  ;;  %v1857_v23 = vsel %vm233_vm0, %v1805_v15, %v1856_v62  ;;  %v1665_v46 = vpop.permute.xlu2 %1664 }
 0x2f1   :  { %v1865_v41 = vperm.slane %v1857_v23, %v3705_v34 }
 0x2f2   :  { %v1855_v42 = vsel %vm233_vm0, %v1854_v7, %v3388_v8  ;;  %v1743_v8 = vperm.slane %v1623_v47, %v3306_v54  ;;  %v1748_v47 = vperm.slane %v1638_v28, %v3306_v54 }
 0x2f3   :  { %v1861_v1 = vperm.slane %v1855_v42, %v3705_v34  ;;  %v1902_v22 = vrot.slane %v1865_v41, 4  ;;  %v1641_v30 = vpop.permute.xlu0 %1640  ;;  %v3438_v10 = vsel %vm233_vm0, %v1865_v41, %v1904_v50  ;;  %v1757_v50 = vperm.slane %v1665_v46, %v3306_v54 }
 0x2f4   :  { %v1617_v24 = vpop.permute.xlu1 %1616  ;;  %v1749_v19 = vperm.slane %v1641_v30, %v3306_v54  ;;  %v1754_v30 = vperm.slane %v1656_v16, %v3306_v54 }
 0x2f5   :  { %v1890_v25 = vrot.slane %v1861_v1, 4  ;;  %v1741_v32 = vperm.slane %v1617_v24, %v3306_v54  ;;  %v3443_v29 = vsel %vm233_vm0, %v1861_v1, %v1892_v59  ;;  %v3446_v37 = vsel %vm233_vm0, %v1902_v22, %v1853_v3 }
 0x2f7   :  { %v1807_v43 = vsel %vm1773_vm2, %v1741_v32, %v1806_v38  ;;  %v3452_v58 = vsel %vm233_vm0, %v1890_v25, %v1849_v27 }
 0x2f8   :  { %v1808_v4 = vsel %vm1775_vm3, %v1742_v17, %v1807_v43  ;;  %v1668_v52 = vpop.permute.xlu2 %1667 }
 0x2f9   :  { %v1809_v20 = vsel %vm1777_vm4, %v1743_v8, %v1808_v4  ;;  %v1758_v8 = vperm.slane %v1668_v52, %v3306_v54 }
 0x2fb   :  { %v1650_v56 = vpop.permute.xlu0 %1649 }
 0x2fc   :  { %v1626_v31 = vpop.permute.xlu1 %1625  ;;  %v1752_v27 = vperm.slane %v1650_v56, %v3306_v54 }
 0x2fd   :  { %v1744_v33 = vperm.slane %v1626_v31, %v3306_v54 }
 0x2ff   :  { %v1810_v21 = vsel %vm1779_vm5, %v1744_v33, %v1809_v20 }
 0x300   :  { %v1811_v18 = vsel %vm1781_vm6, %v1745_v61, %v1810_v21  ;;  %v1692_v51 = vpop.permute.xlu2 %1691 }
 0x301   :  { %v3461_v5 = vsel %vm1783_vm7, %v1746_v6, %v1811_v18  ;;  %v1766_v24 = vperm.slane %v1692_v51, %v3306_v54 }
 0x303   :  { %v1659_v11 = vpop.permute.xlu0 %1658 }
 0x304   :  { %v1635_v12 = vpop.permute.xlu1 %1634  ;;  %v1755_v3 = vperm.slane %v1659_v11, %v3306_v54 }
 0x305   :  { %v1747_v35 = vperm.slane %v1635_v12, %v3306_v54 }
 0x307   :  { %v1813_v2 = vsel %vm1771_vm1, %v1748_v47, %v1747_v35 }
 0x308   :  { %v1677_v40 = vpop.permute.xlu2 %1676  ;;  %v1814_v53 = vsel %vm1773_vm2, %v1749_v19, %v1813_v2 }
 0x309   :  { %v1761_v52 = vperm.slane %v1677_v40, %v3306_v54  ;;  %v1909_v40 = vperm.slane %v3446_v37, %v2260_v48 }
 0x30b   :  { %v1683_v36 = vpop.permute.xlu0 %1682 }
 0x30c   :  { %v1644_v13 = vpop.permute.xlu1 %1643  ;;  %v1763_v62 = vperm.slane %v1683_v36, %v3306_v54 }
 0x30d   :  { %v1750_v39 = vperm.slane %v1644_v13, %v3306_v54 }
 0x30f   :  { %v1815_v45 = vsel %vm1775_vm3, %v1750_v39, %v1814_v53 }
 0x310   :  { %v1816_v28 = vsel %vm1777_vm4, %v1751_v14, %v1815_v45  ;;  %v1701_v59 = vpop.permute.xlu2 %1700 }
 0x311   :  { %v1817_v42 = vsel %vm1779_vm5, %v1752_v27, %v1816_v28  ;;  %v1769_v31 = vperm.slane %v1701_v59, %v3306_v54  ;;  %v1948_v28 = vrot.slane %v1909_v40, 4 }
 0x313   :  { %v1689_v63 = vpop.permute.xlu0 %1688 }
 0x314   :  { %v1653_v49 = vpop.permute.xlu1 %1652  ;;  %v1765_v23 = vperm.slane %v1689_v63, %v3306_v54 }
 0x315   :  { %v1753_v15 = vperm.slane %v1653_v49, %v3306_v54 }
 0x317   :  { %v1818_v1 = vsel %vm1781_vm6, %v1753_v15, %v1817_v42 }
 0x318   :  { %v1819_v4 = vsel %vm1783_vm7, %v1754_v30, %v1818_v1 }
 0x319   :  { %v1880_v16 = vrot.slane %v1819_v4, 4 }
 0x31b   :  { %v1674_v9 = vpop.permute.xlu0 %1673 }
 0x31c   :  { %v1662_v38 = vpop.permute.xlu1 %1661  ;;  %v1760_v11 = vperm.slane %v1674_v9, %v3306_v54  ;;  %v1868_v9 = vrot.slane %v3461_v5, 4 }
 0x31d   :  { %v1756_v26 = vperm.slane %v1662_v38, %v3306_v54 }
 0x31f   :  { %v1820_v41 = vsel %vm1771_vm1, %v1756_v26, %v1755_v3 }
 0x320   :  { %v1821_v25 = vsel %vm1773_vm2, %v1757_v50, %v1820_v41 }
 0x321   :  { %v1822_v33 = vsel %vm1775_vm3, %v1758_v8, %v1821_v25 }
 0x323   :  { %v1698_v57 = vpop.permute.xlu0 %1697 }
 0x324   :  { %v1686_v55 = vpop.permute.xlu1 %1685  ;;  %v1768_v20 = vperm.slane %v1698_v57, %v3306_v54 }
 0x325   :  { %v1764_v60 = vperm.slane %v1686_v55, %v3306_v54 }
 0x327   :  { %v1827_v7 = vsel %vm1771_vm1, %v1764_v60, %v1763_v62  ;;  %v1901_v60 = vperm.slane %v3443_v29, %v2260_v48 }
 0x328   :  { %v1828_v22 = vsel %vm1773_vm2, %v1765_v23, %v1827_v7 }
 0x329   :  { %v1829_v56 = vsel %vm1775_vm3, %v1766_v24, %v1828_v22  ;;  %v1944_v41 = vrot.slane %v1901_v60, 4 }
 0x32b   :  { %v1704_v43 = vpop.permute.xlu0 %1703 }
 0x32c   :  { %v1671_v44 = vpop.permute.xlu1 %1670  ;;  %v1770_v21 = vperm.slane %v1704_v43, %v3306_v54 }
 0x32d   :  { %v1759_v32 = vperm.slane %v1671_v44, %v3306_v54  ;;  %v1913_v44 = vperm.slane %v3438_v10, %v2260_v48 }
 0x32f   :  { %v1823_v6 = vsel %vm1777_vm4, %v1759_v32, %v1822_v33  ;;  %v1952_v50 = vrot.slane %v1913_v44, 4 }
 0x330   :  { %v1824_v13 = vsel %vm1779_vm5, %v1760_v11, %v1823_v6 }
 0x331   :  { %v1825_v55 = vsel %vm1781_vm6, %v1761_v52, %v1824_v13 }
 0x334   :  { %v1695_v17 = vpop.permute.xlu1 %1694 }
 0x335   :  { %v1767_v0 = vperm.slane %v1695_v17, %v3306_v54 }
 0x337   :  { %v1830_v61 = vsel %vm1777_vm4, %v1767_v0, %v1829_v56 }
 0x338   :  { %v1831_v18 = vsel %vm1779_vm5, %v1768_v20, %v1830_v61 }
 0x339   :  { %v1832_v12 = vsel %vm1781_vm6, %v1769_v31, %v1831_v18 }
 0x33a   :  { %v1833_v46 = vsel %vm1783_vm7, %v1770_v21, %v1832_v12 }
 0x33b   :  { %v1878_v36 = vrot.slane %v1833_v46, 4  ;;  %v1881_v49 = vsel %vm233_vm0, %v1833_v46, %v1880_v16 }
 0x33c   :  { %v1680_v63 = vpop.permute.xlu1 %1679  ;;  %v1889_v38 = vperm.slane %v1881_v49, %v3705_v34 }
 0x33d   :  { %v1762_v51 = vperm.slane %v1680_v63, %v3306_v54  ;;  %v1879_v35 = vsel %vm233_vm0, %v1878_v36, %v1819_v4  ;;  %v1897_v54 = vperm.slane %v3452_v58, %v2260_v48 }
 0x33e   :  { %v1885_v2 = vperm.slane %v1879_v35, %v3705_v34  ;;  %v1926_v57 = vrot.slane %v1889_v38, 4 }
 0x33f   :  { %v1826_v47 = vsel %vm1783_vm7, %v1762_v51, %v1825_v55  ;;  %v1940_v15 = vrot.slane %v1897_v54, 4 }
 0x340   :  { %v1866_v39 = vrot.slane %v1826_v47, 4  ;;  %v1869_v19 = vsel %vm233_vm0, %v1826_v47, %v1868_v9  ;;  %v1914_v62 = vrot.slane %v1885_v2, 4 }
 0x341   :  { %v1877_v53 = vperm.slane %v1869_v19, %v3705_v34 }
 0x342   :  { %v1867_v45 = vsel %vm233_vm0, %v1866_v39, %v3461_v5 }
 0x343   :  { %v1873_v14 = vperm.slane %v1867_v45, %v3705_v34  ;;  %v1928_v26 = vrot.slane %v1877_v53, 4  ;;  %v1927_v37 = vsel %vm233_vm0, %v1926_v57, %v1877_v53 }
 0x344   :  { %v1933_v3 = vperm.slane %v1927_v37, %v2260_v48 }
 0x345   :  { %v1915_v58 = vsel %vm233_vm0, %v1914_v62, %v1873_v14  ;;  %v1916_v27 = vrot.slane %v1873_v14, 4  ;;  %v1929_v5 = vsel %vm233_vm0, %v1889_v38, %v1928_v26 }
 0x346   :  { %v1921_v29 = vperm.slane %v1915_v58, %v2260_v48  ;;  %v1946_v7 = vrot.slane %v1933_v3, 4  ;;  %v1937_v10 = vperm.slane %v1929_v5, %v2260_v48  ;;  %v1949_v34 = vsel %vm233_vm0, %v1933_v3, %v1948_v28 }
 0x347   :  { %v1917_v23 = vsel %vm233_vm0, %v1885_v2, %v1916_v27 }
 0x348   :  { %v1941_v42 = vsel %vm233_vm0, %v1921_v29, %v1940_v15  ;;  %v1925_v1 = vperm.slane %v1917_v23, %v2260_v48  ;;  %v1947_v22 = vsel %vm233_vm0, %v1946_v7, %v1909_v40  ;;  %v1950_v30 = vrot.slane %v1937_v10, 4 }
 0x349   :  { %1955 = vrot.lane.b32.xlu1 %v1941_v42, %s2036_s30  ;;  %v1953_v24 = vsel %vm233_vm0, %v1937_v10, %v1952_v50  ;;  %v1938_v48 = vrot.slane %v1921_v29, 4 }
 0x34a   :  { %v1945_v59 = vsel %vm233_vm0, %v1925_v1, %v1944_v41  ;;  %v1942_v25 = vrot.slane %v1925_v1, 4  ;;  %v1951_v32 = vsel %vm233_vm0, %v1950_v30, %v1913_v44 }
 0x34b   :  { %1963 = vrot.lane.b32.xlu0 %v1945_v59, %s2037_s2  ;;  %v1939_v0 = vsel %vm233_vm0, %v1938_v48, %v1897_v54 }
 0x34c   :  { %v1943_v17 = vsel %vm233_vm0, %v1942_v25, %v1901_v60 }
 0x34d   :  { %1959 = vrot.lane.b32.xlu2 %v1943_v17, %s2038_s3 }
 0x351   :  { %1967 = vrot.lane.b32.xlu1 %v1947_v22, %s2039_s4 }
 0x353   :  { %1975 = vrot.lane.b32.xlu0 %v1951_v32, %s2040_s5 }
 0x355   :  { %1971 = vrot.lane.b32.xlu2 %v1949_v34, %s2041_s6 }
 0x359   :  { %1979 = vrot.lane.b32.xlu1 %v1953_v24, %s2042_s7 }
 0x3a7   :  { %v1960_v43 = vpop.permute.xlu2 %1959 }
 0x3af   :  { %v1972_v6 = vpop.permute.xlu2 %1971 }
 0x3bb   :  { %v1956_v8 = vpop.permute.xlu1 %1955 }
 0x3bc   :  { %v1983_v4 = vsel %vm1982_vm8, %v1939_v0, %v1956_v8 }
 0x3bd   :  { %v1964_v20 = vpop.permute.xlu0 %1963  ;;  %v1985_v56 = vsel %vm1984_vm9, %v1983_v4, %v1960_v43 }
 0x3be   :  { %v1987_v33 = vsel %vm1986_vm10, %v1985_v56, %v1964_v20 }
 0x3c3   :  { %v1968_v31 = vpop.permute.xlu1 %1967 }
 0x3c4   :  { %v1989_v61 = vsel %vm1988_vm11, %v1987_v33, %v1968_v31 }
 0x3c5   :  { %v1976_v21 = vpop.permute.xlu0 %1975  ;;  %v1991_v18 = vsel %vm1990_vm12, %v1989_v61, %v1972_v6 }
 0x3c6   :  { %v1993_v16 = vsel %vm1992_vm13, %v1991_v18, %v1976_v21 }
 0x3cb   :  { %v1980_v11 = vpop.permute.xlu1 %1979 }
 0x3cc   :  { %v1995_v12 = vsel %vm1994_vm14, %v1993_v16, %v1980_v11 }
 0x3cd   :  { %1997 = vst.msk [vmem:[%s3546_s1] sm:$0xff] %vm1996_vm15, %v1995_v12 }

// kernel: _down_impl.1
= control target key start
LH: loop header
LB: loop body
LE: loop exit
PB: predicated region body
PF: predicated region fallthrough
CT: control target
= control target key end

     0   :  { %s1914_s10 = smov 112   ;;  %s3419_s0 = inlined_call_operand.vmem [shape: f32[8,8,32], index: 0, kind: input, shape index: {}]   ;;  %s3420_s1 = inlined_call_operand.hbm [shape: f32[8,8,8], index: 1, kind: output, shape index: {}]  }
   0x1   :  { %v11_v0 = vld [vmem:[%s3419_s0 + $0x10] sm:$0xff]  ;;  %v9_v1 = vld [vmem:[%s3419_s0] sm:$0xff] }
   0x2   :  { %29 = vrot.lane.b32.xlu1 %v11_v0, %s1914_s10  ;;  %25 = vrot.lane.b32.xlu0 %v9_v1, %s1914_s10  ;;  %v13_v2 = vld [vmem:[%s3419_s0 + $0x20] sm:$0xff] }
   0x3   :  { %33 = vrot.lane.b32.xlu2 %v13_v2, %s1914_s10 }
   0x4   :  { %6 = vsyncpa [#allocation3], 0  ;;  %v12_v3 = vld [vmem:[%s3419_s0 + $0x18] sm:$0xff]  ;;  %v10_v4 = vld [vmem:[%s3419_s0 + $0x8] sm:$0xff]  ;;  %s1915_s23 = smov 126   ;;  %s1917_s24 = smov 122  }
   0x5   :  { %v14_v5 = vld [vmem:[%s3419_s0 + $0x28] sm:$0xff]  ;;  %v15_v6 = vld [vmem:[%s3419_s0 + $0x30] sm:$0xff]  ;;  %v16_v7 = vld [vmem:[%s3419_s0 + $0x38] sm:$0xff]  ;;  %s1916_s0 = smov 124   ;;  %s1918_s25 = smov 120   ;;  %vm234_vm0 = vcmask 1047556  }
   0x6   :  { %s1919_s26 = smov 118   ;;  %s1920_s27 = smov 116   ;;  %vm1772_vm1 = vcmask 1041409   ;;  %vm1774_vm2 = vcmask 1042434   ;;  %vm1776_vm3 = vcmask 1043459   ;;  %vm1778_vm4 = vcmask 1044484  }
   0x7   :  { %s1921_s28 = smov 114   ;;  %s1924_s29 = smov 127   ;;  %vm1780_vm5 = vcmask 1045509   ;;  %vm1782_vm6 = vcmask 1046534   ;;  %vm1784_vm7 = vcmask 1047559   ;;  %vm1843_vm8 = vcmask 64512  }
   0x8   :  { %s1926_s30 = smov [#allocation2]   ;;  %s1858_s5 = sshll.u32 %s3420_s1, 4  ;;  %s1859_s5 = int_to_ptr.hbm [resolvable:$true] %s1858_s5 }
   0x9   :  { %s1856_s2 = sshll.u32 %s1926_s30, 4  ;;  %s1927_s6 = smov 128   ;;  %s1857_s2 = int_to_ptr.vmem [resolvable:$true] %s1856_s2 }
   0xa   :  { %31 = vrot.lane.b32.xlu1 %v12_v3, %s1914_s10  ;;  %27 = vrot.lane.b32.xlu0 %v10_v4, %s1914_s10  ;;  %s1928_s1 = smov 8  }
   0xb   :  { %35 = vrot.lane.b32.xlu2 %v14_v5, %s1914_s10 }
  0x12   :  { %37 = vrot.lane.b32.xlu0 %v15_v6, %s1914_s10  ;;  %39 = vrot.lane.b32.xlu1 %v16_v7, %s1914_s10 }
  0x5d   :  { %v34_v8 = vpop.permute.xlu2 %33 }
  0x5e   :  { %v1978_v19 = vmax.f32 %v13_v2, %v34_v8 }
  0x60   :  { %3482 = vst [vmem:[#allocation6_spill] sm:$0xff] %v1978_v19 }
  0x65   :  { %v36_v13 = vpop.permute.xlu2 %35 }
  0x66   :  { %v1969_v14 = vmax.f32 %v14_v5, %v36_v13 }
  0x68   :  { %3481 = vst [vmem:[#allocation5_spill] sm:$0xff] %v1969_v14 }
  0x74   :  { %v30_v9 = vpop.permute.xlu1 %29  ;;  %v26_v10 = vpop.permute.xlu0 %25 }
  0x75   :  { %v1963_v11 = vmax.f32 %v11_v0, %v30_v9  ;;  %v1965_v12 = vmax.f32 %v9_v1, %v26_v10  ;;  %v1922_v1 = vmov 1983009808  }
  0x76   :  { %v239_v2 = vunpack.c.l.s4 %v1922_v1 }
  0x77   :  { %69 = vrot.lane.b32.xlu1 %v1963_v11, %s1915_s23  ;;  %65 = vrot.lane.b32.xlu2 %v1965_v12, %s1915_s23  ;;  %v460_v13 = vrot.slane %v1963_v11, 4 }
  0x78   :  { %v2121_v9 = vunpack.c.0.s8 %v239_v2 }
  0x7c   :  { %v32_v15 = vpop.permute.xlu1 %31  ;;  %v28_v16 = vpop.permute.xlu0 %27 }
  0x7d   :  { %v1971_v17 = vmax.f32 %v12_v3, %v32_v15  ;;  %v1973_v18 = vmax.f32 %v10_v4, %v28_v16  ;;  %v236_v3 = vrot.slane %v1965_v12, 4 }
  0x7f   :  { %75 = vrot.lane.b32.xlu1 %v1969_v14, %s1915_s23  ;;  %71 = vrot.lane.b32.xlu2 %v1971_v17, %s1915_s23 }
  0x80   :  { %67 = vrot.lane.b32.xlu0 %v1973_v18, %s1915_s23 }
  0x84   :  { %v38_v20 = vpop.permute.xlu0 %37  ;;  %v40_v22 = vpop.permute.xlu1 %39 }
  0x85   :  { %v1980_v21 = vmax.f32 %v15_v6, %v38_v20  ;;  %v1985_v23 = vmax.f32 %v16_v7, %v40_v22 }
  0x87   :  { %3483 = vst [vmem:[#allocation7_spill] sm:$0xff] %v1980_v21  ;;  %89 = vrot.lane.b32.xlu1 %v1965_v12, %s1916_s0  ;;  %77 = vrot.lane.b32.xlu2 %v1980_v21, %s1915_s23 }
  0x88   :  { %73 = vrot.lane.b32.xlu0 %v1978_v19, %s1915_s23  ;;  %3484 = vst [vmem:[#allocation8_spill] sm:$0xff] %v1985_v23 }
  0x8f   :  { %95 = vrot.lane.b32.xlu1 %v1971_v17, %s1916_s0  ;;  %91 = vrot.lane.b32.xlu2 %v1973_v18, %s1916_s0 }
  0x90   :  { %79 = vrot.lane.b32.xlu0 %v1985_v23, %s1915_s23 }
  0x97   :  { %101 = vrot.lane.b32.xlu1 %v1980_v21, %s1916_s0  ;;  %97 = vrot.lane.b32.xlu2 %v1978_v19, %s1916_s0 }
  0x98   :  { %93 = vrot.lane.b32.xlu0 %v1963_v11, %s1916_s0 }
  0x9f   :  { %115 = vrot.lane.b32.xlu1 %v1973_v18, %s1917_s24  ;;  %103 = vrot.lane.b32.xlu2 %v1985_v23, %s1916_s0 }
  0xa0   :  { %99 = vrot.lane.b32.xlu0 %v1969_v14, %s1916_s0 }
  0xa7   :  { %121 = vrot.lane.b32.xlu1 %v1978_v19, %s1917_s24  ;;  %117 = vrot.lane.b32.xlu2 %v1963_v11, %s1917_s24 }
  0xa8   :  { %113 = vrot.lane.b32.xlu0 %v1965_v12, %s1917_s24 }
  0xaf   :  { %127 = vrot.lane.b32.xlu1 %v1985_v23, %s1917_s24  ;;  %123 = vrot.lane.b32.xlu2 %v1969_v14, %s1917_s24 }
  0xb0   :  { %119 = vrot.lane.b32.xlu0 %v1971_v17, %s1917_s24 }
  0xb7   :  { %141 = vrot.lane.b32.xlu1 %v1963_v11, %s1918_s25  ;;  %137 = vrot.lane.b32.xlu2 %v1965_v12, %s1918_s25 }
  0xb8   :  { %125 = vrot.lane.b32.xlu0 %v1980_v21, %s1917_s24 }
  0xbf   :  { %147 = vrot.lane.b32.xlu1 %v1969_v14, %s1918_s25  ;;  %143 = vrot.lane.b32.xlu2 %v1971_v17, %s1918_s25 }
  0xc0   :  { %139 = vrot.lane.b32.xlu0 %v1973_v18, %s1918_s25 }
  0xc7   :  { %161 = vrot.lane.b32.xlu1 %v1965_v12, %s1919_s26  ;;  %149 = vrot.lane.b32.xlu2 %v1980_v21, %s1918_s25 }
  0xc8   :  { %145 = vrot.lane.b32.xlu0 %v1978_v19, %s1918_s25 }
  0xcf   :  { %167 = vrot.lane.b32.xlu1 %v1971_v17, %s1919_s26  ;;  %163 = vrot.lane.b32.xlu2 %v1973_v18, %s1919_s26 }
  0xd0   :  { %151 = vrot.lane.b32.xlu0 %v1985_v23, %s1918_s25 }
  0xd1   :  { %v2014_v24 = vpop.permute.xlu2 %65 }
  0xd2   :  { %v248_v6 = vrot.slane %v2014_v24, 4 }
  0xd7   :  { %173 = vrot.lane.b32.xlu1 %v1980_v21, %s1919_s26  ;;  %169 = vrot.lane.b32.xlu2 %v1978_v19, %s1919_s26 }
  0xd8   :  { %165 = vrot.lane.b32.xlu0 %v1963_v11, %s1919_s26 }
  0xd9   :  { %v2019_v25 = vpop.permute.xlu2 %71 }
  0xdf   :  { %187 = vrot.lane.b32.xlu1 %v1973_v18, %s1920_s27  ;;  %175 = vrot.lane.b32.xlu2 %v1985_v23, %s1919_s26 }
  0xe0   :  { %171 = vrot.lane.b32.xlu0 %v1969_v14, %s1919_s26 }
  0xe1   :  { %v2024_v26 = vpop.permute.xlu2 %77 }
  0xe2   :  { %3485 = vst [vmem:[#allocation9_spill] sm:$0xff] %v2024_v26 }
  0xe7   :  { %193 = vrot.lane.b32.xlu1 %v1978_v19, %s1920_s27  ;;  %189 = vrot.lane.b32.xlu2 %v1963_v11, %s1920_s27 }
  0xe8   :  { %185 = vrot.lane.b32.xlu0 %v1965_v12, %s1920_s27 }
  0xe9   :  { %v2029_v27 = vpop.permute.xlu1 %69  ;;  %v2031_v28 = vpop.permute.xlu2 %91 }
  0xea   :  { %v346_v2 = vrot.slane %v2031_v28, 4 }
  0xef   :  { %199 = vrot.lane.b32.xlu1 %v1985_v23, %s1920_s27  ;;  %195 = vrot.lane.b32.xlu2 %v1969_v14, %s1920_s27 }
  0xf0   :  { %191 = vrot.lane.b32.xlu0 %v1971_v17, %s1920_s27 }
  0xf1   :  { %v2036_v29 = vpop.permute.xlu1 %75  ;;  %v2038_v30 = vpop.permute.xlu2 %97 }
  0xf2   :  { %3486 = vst [vmem:[#allocation10_spill] sm:$0xff] %v2036_v29  ;;  %v2040_v31 = vpop.permute.xlu0 %67 }
  0xf3   :  { %3487 = vst [vmem:[#allocation11_spill] sm:$0xff] %v2038_v30 }
  0xf7   :  { %213 = vrot.lane.b32.xlu1 %v1963_v11, %s1921_s28  ;;  %209 = vrot.lane.b32.xlu2 %v1965_v12, %s1921_s28 }
  0xf8   :  { %197 = vrot.lane.b32.xlu0 %v1980_v21, %s1920_s27 }
  0xf9   :  { %v2045_v32 = vpop.permute.xlu1 %89  ;;  %v2047_v33 = vpop.permute.xlu2 %103 }
  0xfa   :  { %3488 = vst [vmem:[#allocation12_spill] sm:$0xff] %v2047_v33  ;;  %v2049_v34 = vpop.permute.xlu0 %73  ;;  %v237_v7 = vsel %vm234_vm0, %v2045_v32, %v236_v3  ;;  %v233_v3 = vrot.slane %v2045_v32, 4 }
  0xfb   :  { %3489 = vst [vmem:[#allocation13_spill] sm:$0xff] %v2049_v34  ;;  %v2126_v16 = vperm.slane %v237_v7, %v2121_v9 }
  0xff   :  { %219 = vrot.lane.b32.xlu1 %v1969_v14, %s1921_s28  ;;  %215 = vrot.lane.b32.xlu2 %v1971_v17, %s1921_s28 }
 0x100   :  { %211 = vrot.lane.b32.xlu0 %v1973_v18, %s1921_s28 }
 0x101   :  { %v2054_v35 = vpop.permute.xlu1 %95  ;;  %v2056_v36 = vpop.permute.xlu2 %117 }
 0x102   :  { %v2058_v37 = vpop.permute.xlu0 %79 }
 0x103   :  { %3490 = vst [vmem:[#allocation14_spill] sm:$0xff] %v2058_v37  ;;  %v1923_v37 = vmov 1934713408  }
 0x107   :  { %221 = vrot.lane.b32.xlu2 %v1980_v21, %s1921_s28 }
 0x108   :  { %217 = vrot.lane.b32.xlu0 %v1978_v19, %s1921_s28 }
 0x109   :  { %v2062_v38 = vpop.permute.xlu1 %101  ;;  %v2064_v39 = vpop.permute.xlu2 %123 }
 0x10a   :  { %3491 = vst [vmem:[#allocation15_spill] sm:$0xff] %v2062_v38  ;;  %v2066_v40 = vpop.permute.xlu0 %93 }
 0x10b   :  { %3492 = vst [vmem:[#allocation16_spill] sm:$0xff] %v2064_v39  ;;  %v461_v20 = vsel %vm234_vm0, %v2066_v40, %v460_v13 }
 0x110   :  { %223 = vrot.lane.b32.xlu0 %v1985_v23, %s1921_s28 }
 0x111   :  { %v2069_v41 = vpop.permute.xlu1 %115  ;;  %v2071_v42 = vpop.permute.xlu2 %137 }
 0x112   :  { %v2073_v43 = vpop.permute.xlu0 %99  ;;  %v260_v7 = vrot.slane %v2071_v42, 4  ;;  %v358_v39 = vrot.slane %v2069_v41, 4 }
 0x113   :  { %3493 = vst [vmem:[#allocation17_spill] sm:$0xff] %v2073_v43 }
 0x119   :  { %v2075_v44 = vpop.permute.xlu1 %121  ;;  %v2077_v45 = vpop.permute.xlu2 %143 }
 0x11a   :  { %3494 = vst [vmem:[#allocation18_spill] sm:$0xff] %v2075_v44  ;;  %v114_v46 = vpop.permute.xlu0 %113 }
 0x11b   :  { %v246_v10 = vrot.slane %v114_v46, 4  ;;  %v249_v15 = vsel %vm234_vm0, %v114_v46, %v248_v6  ;;  %v296_v46 = vrot.slane %v2126_v16, 4  ;;  %v2139_v6 = vperm.slane %v461_v20, %v2121_v9 }
 0x11c   :  { %v2133_v1 = vperm.slane %v249_v15, %v2121_v9  ;;  %v348_v15 = vrot.slane %v1973_v18, 4 }
 0x11d   :  { %v247_v22 = vsel %vm234_vm0, %v246_v10, %v2014_v24  ;;  %3501 = vst [vmem:[#allocation25_spill] sm:$0xff] %v2139_v6  ;;  %v472_v10 = vrot.slane %v2029_v27, 4 }
 0x11e   :  { %v2149_v32 = vperm.slane %v247_v22, %v2121_v9  ;;  %v349_v38 = vsel %vm234_vm0, %v2031_v28, %v348_v15  ;;  %v347_v22 = vsel %vm234_vm0, %v346_v2, %v1973_v18 }
 0x121   :  { %v2079_v47 = vpop.permute.xlu1 %127  ;;  %v2081_v48 = vpop.permute.xlu2 %149 }
 0x122   :  { %3495 = vst [vmem:[#allocation19_spill] sm:$0xff] %v2079_v47  ;;  %v2083_v49 = vpop.permute.xlu0 %119  ;;  %v287_v47 = vunpack.c.l.s4 %v1923_v37 }
 0x124   :  { %v2159_v14 = vunpack.c.0.s8 %v287_v47  ;;  %v282_v47 = vrot.slane %v2149_v32, 4 }
 0x129   :  { %v2085_v50 = vpop.permute.xlu1 %141  ;;  %v2087_v51 = vpop.permute.xlu2 %163 }
 0x12a   :  { %v2089_v52 = vpop.permute.xlu0 %125 }
 0x12b   :  { %3496 = vst [vmem:[#allocation20_spill] sm:$0xff] %v2089_v52 }
 0x131   :  { %v2091_v53 = vpop.permute.xlu1 %147  ;;  %v2093_v54 = vpop.permute.xlu2 %169 }
 0x132   :  { %3497 = vst [vmem:[#allocation21_spill] sm:$0xff] %v2093_v54  ;;  %v2095_v55 = vpop.permute.xlu0 %139 }
 0x139   :  { %v162_v56 = vpop.permute.xlu1 %161  ;;  %v2097_v57 = vpop.permute.xlu2 %175 }
 0x13a   :  { %3498 = vst [vmem:[#allocation22_spill] sm:$0xff] %v2097_v57  ;;  %v2099_v58 = vpop.permute.xlu0 %145  ;;  %v272_v13 = vrot.slane %v162_v56, 4  ;;  %v297_v57 = vsel %vm234_vm0, %v2133_v1, %v296_v46  ;;  %v235_v46 = vsel %vm234_vm0, %v233_v3, %v1965_v12  ;;  %v2177_v12 = vperm.slane %v347_v22, %v2121_v9 }
 0x13b   :  { %3499 = vst [vmem:[#allocation23_spill] sm:$0xff] %v2099_v58 }
 0x141   :  { %v2101_v59 = vpop.permute.xlu1 %167  ;;  %v2103_v60 = vpop.permute.xlu2 %189 }
 0x142   :  { %v2105_v61 = vpop.permute.xlu0 %151 }
 0x143   :  { %3500 = vst [vmem:[#allocation24_spill] sm:$0xff] %v2105_v61 }
 0x149   :  { %v2107_v62 = vpop.permute.xlu1 %173  ;;  %v2109_v63 = vpop.permute.xlu2 %195 }
 0x14a   :  { %v2111_v0 = vpop.permute.xlu0 %165 }
 0x151   :  { %v2114_v4 = vpop.permute.xlu1 %187  ;;  %v210_v5 = vpop.permute.xlu2 %209 }
 0x152   :  { %v2119_v8 = vpop.permute.xlu0 %171  ;;  %v270_v23 = vrot.slane %v210_v5, 4  ;;  %v273_v20 = vsel %vm234_vm0, %v210_v5, %v272_v13  ;;  %v473_v5 = vsel %vm234_vm0, %v2056_v36, %v472_v10  ;;  %v370_v54 = vrot.slane %v2114_v4, 4 }
 0x153   :  { %v281_v13 = vperm.slane %v273_v20, %v2121_v9  ;;  %v2183_v2 = vperm.slane %v473_v5, %v2121_v9  ;;  %v944_v5 = vrot.slane %v2107_v62, 4 }
 0x154   :  { %v271_v26 = vsel %vm234_vm0, %v270_v23, %v162_v56  ;;  %v2180_v56 = vperm.slane %v349_v38, %v2121_v9  ;;  %v360_v38 = vrot.slane %v2040_v31, 4 }
 0x155   :  { %v277_v18 = vperm.slane %v271_v26, %v2121_v9  ;;  %3503 = vst [vmem:[#allocation27_spill] sm:$0xff] %v2183_v2  ;;  %v318_v19 = vrot.slane %v281_v13, 4 }
 0x159   :  { %v2142_v33 = vpop.permute.xlu1 %193  ;;  %v2144_v24 = vpop.permute.xlu2 %215 }
 0x15a   :  { %3502 = vst [vmem:[#allocation26_spill] sm:$0xff] %v2142_v33  ;;  %v186_v37 = vpop.permute.xlu0 %185 }
 0x15b   :  { %v258_v61 = vrot.slane %v186_v37, 4  ;;  %v261_v21 = vsel %vm234_vm0, %v186_v37, %v260_v7  ;;  %v520_v7 = vrot.slane %v2139_v6, 4 }
 0x15c   :  { %v269_v52 = vperm.slane %v261_v21, %v2121_v9  ;;  %v2172_v21 = vperm.slane %v297_v57, %v2159_v14  ;;  %v484_v57 = vrot.slane %v2085_v50, 4 }
 0x15d   :  { %v259_v23 = vsel %vm234_vm0, %v258_v61, %v2071_v42  ;;  %v2187_v42 = vperm.slane %v235_v46, %v2121_v9  ;;  %v521_v22 = vsel %vm234_vm0, %v2183_v2, %v520_v7  ;;  %v408_v7 = vrot.slane %v2180_v56, 4 }
 0x15e   :  { %v320_v28 = vrot.slane %v269_v52, 4  ;;  %v265_v61 = vperm.slane %v259_v23, %v2121_v9  ;;  %v344_v20 = vrot.slane %v2172_v21, 4  ;;  %v485_v46 = vsel %vm234_vm0, %v2103_v60, %v484_v57 }
 0x15f   :  { %v306_v23 = vrot.slane %v277_v18, 4  ;;  %v284_v43 = vrot.slane %v2187_v42, 4  ;;  %v2230_v29 = vperm.slane %v521_v22, %v2159_v14  ;;  %v932_v22 = vrot.slane %v2081_v48, 4 }
 0x160   :  { %v321_v3 = vsel %vm234_vm0, %v281_v13, %v320_v28  ;;  %v283_v28 = vsel %vm234_vm0, %v282_v47, %v2187_v42  ;;  %v496_v42 = vrot.slane %v2111_v0, 4  ;;  %v308_v34 = vrot.slane %v265_v61, 4 }
 0x161   :  { %v2191_v10 = vpop.permute.xlu1 %199  ;;  %v2194_v26 = vperm.slane %v321_v3, %v2159_v14  ;;  %v2197_v15 = vpop.permute.xlu2 %221  ;;  %v361_v3 = vsel %vm234_vm0, %v2069_v41, %v360_v38  ;;  %v307_v47 = vsel %vm234_vm0, %v306_v23, %v265_v61  ;;  %v2224_v38 = vperm.slane %v485_v46, %v2121_v9 }
 0x162   :  { %3504 = vst [vmem:[#allocation28_spill] sm:$0xff] %v2191_v10  ;;  %v2199_v37 = vpop.permute.xlu0 %191  ;;  %v945_v57 = vsel %vm234_vm0, %v2197_v15, %v944_v5  ;;  %v2234_v5 = vperm.slane %v361_v3, %v2121_v9  ;;  %v820_v23 = vrot.slane %v2091_v53, 4  ;;  %v372_v41 = vrot.slane %v2095_v55, 4 }
 0x163   :  { %v2213_v10 = vsel %vm234_vm0, %v2194_v26, %v344_v20  ;;  %v2227_v20 = vperm.slane %v283_v28, %v2159_v14  ;;  %v2240_v46 = vperm.slane %v945_v57, %v2121_v9  ;;  %v2243_v28 = vperm.slane %v307_v47, %v2159_v14 }
 0x164   :  { %3505 = vst [vmem:[#allocation29_spill] sm:$0xff] %v2213_v10  ;;  %1208 = vrot.lane.b32.xlu2 %v2213_v10, %s1924_s29  ;;  %v294_v10 = vrot.slane %v2133_v1, 4  ;;  %v319_v3 = vsel %vm234_vm0, %v318_v19, %v269_v52  ;;  %v544_v1 = vrot.slane %v2224_v38, 4  ;;  %v821_v13 = vsel %vm234_vm0, %v2109_v63, %v820_v23 }
 0x165   :  { %v332_v47 = vrot.slane %v2227_v20, 4  ;;  %v373_v58 = vsel %vm234_vm0, %v2114_v4, %v372_v41  ;;  %v990_v52 = vrot.slane %v2240_v46, 4  ;;  %v2272_v33 = vperm.slane %v319_v3, %v2159_v14 }
 0x166   :  { %v359_v4 = vsel %vm234_vm0, %v358_v39, %v2040_v31  ;;  %v309_v41 = vsel %vm234_vm0, %v277_v18, %v308_v34  ;;  %v470_v39 = vrot.slane %v2056_v36, 4  ;;  %v2298_v34 = vperm.slane %v373_v58, %v2121_v9 }
 0x167   :  { %v295_v18 = vsel %vm234_vm0, %v294_v10, %v2126_v16  ;;  %v2312_v36 = vperm.slane %v359_v4, %v2121_v9  ;;  %v285_v58 = vsel %vm234_vm0, %v2149_v32, %v284_v43 }
 0x168   :  { %v432_v43 = vrot.slane %v2298_v34, 4 }
 0x169   :  { %v214_v44 = vpop.permute.xlu1 %213 }
 0x16a   :  { %v497_v30 = vsel %vm234_vm0, %v214_v44, %v496_v42  ;;  %v2252_v57 = vpop.permute.xlu0 %197  ;;  %v2269_v42 = vsel %vm234_vm0, %v2243_v28, %v332_v47  ;;  %v409_v47 = vsel %vm234_vm0, %v2234_v5, %v408_v7  ;;  %v832_v7 = vrot.slane %v2119_v8, 4 }
 0x16b   :  { %v2259_v61 = vperm.slane %v497_v30, %v2121_v9  ;;  %v933_v19 = vsel %vm234_vm0, %v2252_v57, %v932_v22  ;;  %3506 = vst [vmem:[#allocation30_spill] sm:$0xff] %v2269_v42  ;;  %v568_v22 = vrot.slane %v2230_v29, 4  ;;  %v2320_v16 = vperm.slane %v409_v47, %v2159_v14 }
 0x16c   :  { %v2265_v23 = vperm.slane %v933_v19, %v2121_v9  ;;  %1196 = vrot.lane.b32.xlu2 %v2269_v42, %s1924_s29  ;;  %v2285_v19 = vperm.slane %v821_v13, %v2121_v9  ;;  %v301_v42 = vperm.slane %v295_v18, %v2159_v14 }
 0x16d   :  { %v545_v30 = vsel %vm234_vm0, %v2259_v61, %v544_v1  ;;  %v371_v1 = vsel %vm234_vm0, %v370_v54, %v2095_v55  ;;  %v384_v54 = vrot.slane %v2087_v51, 4 }
 0x16e   :  { %v2289_v3 = vsel %vm234_vm0, %v990_v52, %v2265_v23  ;;  %v2292_v31 = vperm.slane %v545_v30, %v2159_v14  ;;  %v338_v52 = vrot.slane %v2272_v33, 4  ;;  %v2309_v30 = vperm.slane %v309_v41, %v2159_v14 }
 0x16f   :  { %3507 = vst [vmem:[#allocation31_spill] sm:$0xff] %v2289_v3  ;;  %v880_v10 = vrot.slane %v2285_v19, 4  ;;  %v494_v3 = vrot.slane %v214_v44, 4  ;;  %v406_v44 = vrot.slane %v2234_v5, 4 }
 0x170   :  { %v2305_v13 = vsel %vm234_vm0, %v2292_v31, %v568_v22  ;;  %v377_v22 = vperm.slane %v371_v1, %v2121_v9  ;;  %v2333_v47 = vsel %vm234_vm0, %v338_v52, %v301_v42  ;;  %v334_v1 = vrot.slane %v2309_v30, 4 }
 0x171   :  { %3508 = vst [vmem:[#allocation32_spill] sm:$0xff] %v2305_v13  ;;  %v220_v55 = vpop.permute.xlu1 %219  ;;  %1240 = vrot.lane.b32.xlu0 %v2305_v13, %s1924_s29  ;;  %v495_v5 = vsel %vm234_vm0, %v494_v3, %v2111_v0  ;;  %v458_v0 = vrot.slane %v2066_v40, 4  ;;  %v818_v40 = vrot.slane %v2109_v63, 4 }
 0x172   :  { %v833_v41 = vsel %vm234_vm0, %v220_v55, %v832_v7  ;;  %v212_v4 = vpop.permute.xlu0 %211  ;;  %3509 = vst [vmem:[#allocation33_spill] sm:$0xff] %v2333_v47  ;;  %v471_v7 = vsel %vm234_vm0, %v470_v39, %v2029_v27 }
 0x173   :  { %v2327_v6 = vperm.slane %v833_v41, %v2121_v9  ;;  %v382_v13 = vrot.slane %v212_v4, 4  ;;  %v385_v2 = vsel %vm234_vm0, %v212_v4, %v384_v54  ;;  %v2349_v41 = vperm.slane %v285_v58, %v2159_v14 }
 0x174   :  { %v393_v32 = vperm.slane %v385_v2, %v2121_v9  ;;  %1202 = vrot.lane.b32.xlu2 %v2333_v47, %s1924_s29  ;;  %v420_v2 = vrot.slane %v377_v22, 4  ;;  %v482_v4 = vrot.slane %v2103_v60, 4  ;;  %v2379_v60 = vperm.slane %v495_v5, %v2121_v9 }
 0x175   :  { %v2341_v18 = vsel %vm234_vm0, %v2327_v6, %v880_v10  ;;  %v383_v54 = vsel %vm234_vm0, %v382_v13, %v2087_v51  ;;  %v456_v10 = vrot.slane %v2320_v16, 4  ;;  %v3510_v51 = vrot.slane %v2177_v12, 4 }
 0x176   :  { %v389_v52 = vperm.slane %v383_v54, %v2121_v9  ;;  %v433_v27 = vsel %vm234_vm0, %v393_v32, %v432_v43  ;;  %v830_v54 = vrot.slane %v220_v55, 4  ;;  %v2365_v58 = vsel %vm234_vm0, %v334_v1, %v2349_v41 }
 0x177   :  { %v2355_v39 = vperm.slane %v433_v27, %v2159_v14  ;;  %v397_v13 = vsel %vm234_vm0, %v2312_v36, %v3510_v51  ;;  %v430_v55 = vrot.slane %v393_v32, 4  ;;  %v407_v32 = vsel %vm234_vm0, %v406_v44, %v2180_v56 }
 0x178   :  { %v421_v43 = vsel %vm234_vm0, %v389_v52, %v420_v2  ;;  %v418_v3 = vrot.slane %v389_v52, 4  ;;  %v2385_v1 = vperm.slane %v397_v13, %v2159_v14  ;;  %v477_v52 = vperm.slane %v471_v7, %v2121_v9 }
 0x179   :  { %1198 = vrot.lane.b32.xlu0 %v2365_v58, %s1924_s29  ;;  %v2373_v27 = vsel %vm234_vm0, %v2355_v39, %v456_v10  ;;  %v2376_v51 = vperm.slane %v421_v43, %v2159_v14  ;;  %v483_v10 = vsel %vm234_vm0, %v482_v4, %v2085_v50  ;;  %v831_v5 = vsel %vm234_vm0, %v830_v54, %v2119_v8 }
 0x17a   :  { %1224 = vrot.lane.b32.xlu1 %v2373_v27, %s1924_s29  ;;  %v459_v43 = vsel %vm234_vm0, %v458_v0, %v1963_v11  ;;  %v330_v13 = vrot.slane %v2243_v28, 4  ;;  %v419_v7 = vsel %vm234_vm0, %v418_v3, %v377_v22  ;;  %v394_v47 = vrot.slane %v2312_v36, 4 }
 0x17b   :  { %v446_v2 = vrot.slane %v2376_v51, 4  ;;  %v530_v50 = vrot.slane %v2379_v60, 4  ;;  %v340_v8 = vrot.slane %v301_v42, 4  ;;  %v431_v56 = vsel %vm234_vm0, %v430_v55, %v2298_v34 }
 0x17c   :  { %v489_v11 = vperm.slane %v483_v10, %v2121_v9  ;;  %v819_v44 = vsel %vm234_vm0, %v818_v40, %v2091_v53  ;;  %v837_v28 = vperm.slane %v831_v5, %v2121_v9  ;;  %v2414_v22 = vperm.slane %v407_v32, %v2159_v14 }
 0x17d   :  { %v2399_v63 = vsel %vm234_vm0, %v446_v2, %v2385_v1  ;;  %v942_v36 = vrot.slane %v2197_v15, 4  ;;  %v930_v4 = vrot.slane %v2252_v57, 4  ;;  %v2420_v42 = vsel %vm234_vm0, %v2272_v33, %v340_v8 }
 0x17e   :  { %1214 = vrot.lane.b32.xlu2 %v2399_v63, %s1924_s29  ;;  %v2423_v34 = vperm.slane %v419_v7, %v2159_v14  ;;  %v2429_v53 = vsel %vm234_vm0, %v330_v13, %v2227_v20  ;;  %v2432_v54 = vperm.slane %v431_v56, %v2159_v14  ;;  %v465_v15 = vperm.slane %v459_v43, %v2121_v9 }
 0x17f   :  { %v825_v57 = vperm.slane %v819_v44, %v2121_v9  ;;  %v531_v33 = vsel %vm234_vm0, %v530_v50, %v489_v11  ;;  %v866_v0 = vrot.slane %v837_v28, 4  ;;  %v452_v3 = vrot.slane %v2414_v22, 4 }
 0x180   :  { %v395_v55 = vsel %vm234_vm0, %v394_v47, %v2177_v12  ;;  %v506_v20 = vrot.slane %v477_v52, 4  ;;  %v943_v40 = vsel %vm234_vm0, %v942_v36, %v2107_v62  ;;  %v931_v2 = vsel %vm234_vm0, %v930_v4, %v2081_v48 }
 0x181   :  { %1204 = vrot.lane.b32.xlu0 %v2420_v42, %s1924_s29  ;;  %v442_v10 = vrot.slane %v2423_v34, 4  ;;  %v2449_v5 = vsel %vm234_vm0, %v2432_v54, %v452_v3  ;;  %v2452_v32 = vperm.slane %v531_v33, %v2159_v14  ;;  %v868_v43 = vrot.slane %v825_v57, 4 }
 0x182   :  { %1194 = vrot.lane.b32.xlu1 %v2429_v53, %s1924_s29  ;;  %v336_v12 = vrot.slane %v2349_v41, 4  ;;  %v401_v62 = vperm.slane %v395_v55, %v2159_v14  ;;  %v507_v47 = vsel %vm234_vm0, %v506_v20, %v465_v15  ;;  %v949_v48 = vperm.slane %v943_v40, %v2121_v9 }
 0x183   :  { %v937_v13 = vperm.slane %v931_v2, %v2121_v9  ;;  %v878_v7 = vrot.slane %v2327_v6, 4  ;;  %v2463_v50 = vsel %vm234_vm0, %v866_v0, %v825_v57  ;;  %v508_v8 = vrot.slane %v465_v15, 4 }
 0x184   :  { %v2466_v56 = vsel %vm234_vm0, %v442_v10, %v401_v62  ;;  %v2470_v41 = vsel %vm234_vm0, %v2309_v30, %v336_v12  ;;  %v554_v44 = vrot.slane %v2452_v32, 4  ;;  %v2476_v36 = vsel %vm234_vm0, %v837_v28, %v868_v43 }
 0x185   :  { %v2481_v6 = vperm.slane %v507_v47, %v2159_v14  ;;  %v978_v4 = vrot.slane %v949_v48, 4  ;;  %v980_v15 = vrot.slane %v937_v13, 4  ;;  %v992_v57 = vrot.slane %v2265_v23, 4 }
 0x186   :  { %1220 = vrot.lane.b32.xlu2 %v2449_v5, %s1924_s29  ;;  %v2486_v30 = vsel %vm234_vm0, %v878_v7, %v2285_v19  ;;  %v532_v33 = vrot.slane %v489_v11, 4  ;;  %v509_v0 = vsel %vm234_vm0, %v477_v52, %v508_v8  ;;  %v582_v28 = vrot.slane %v2083_v49, 4 }
 0x187   :  { %v2492_v3 = vsel %vm234_vm0, %v554_v44, %v2481_v6  ;;  %v342_v55 = vrot.slane %v2194_v26, 4  ;;  %v2496_v20 = vsel %vm234_vm0, %v978_v4, %v937_v13  ;;  %v448_v23 = vrot.slane %v2385_v1, 4 }
 0x188   :  { %v533_v19 = vsel %vm234_vm0, %v2379_v60, %v532_v33  ;;  %v2504_v52 = vperm.slane %v509_v0, %v2159_v14  ;;  %v2507_v11 = vsel %vm234_vm0, %v949_v48, %v980_v15  ;;  %v2511_v26 = vsel %vm234_vm0, %v2240_v46, %v992_v57 }
 0x189   :  { %1210 = vrot.lane.b32.xlu0 %v2466_v56, %s1924_s29  ;;  %v2515_v40 = vsel %vm234_vm0, %v2376_v51, %v448_v23  ;;  %v583_v1 = vsel %vm234_vm0, %v582_v28, %v2019_v25  ;;  %v606_v2 = vrot.slane %v2144_v24, 4  ;;  %v2522_v60 = vsel %vm234_vm0, %v342_v55, %v2172_v21 }
 0x18a   :  { %1200 = vrot.lane.b32.xlu1 %v2470_v41, %s1924_s29  ;;  %v2527_v10 = vperm.slane %v533_v19, %v2159_v14  ;;  %v570_v46 = vrot.slane %v2054_v35, 4  ;;  %v594_v51 = vrot.slane %v2199_v37, 4  ;;  %v560_v43 = vrot.slane %v2504_v52, 4 }
 0x18b   :  { %v2535_v12 = vperm.slane %v583_v1, %v2121_v9  ;;  %v454_v21 = vrot.slane %v2355_v39, 4  ;;  %v607_v47 = vsel %vm234_vm0, %v606_v2, %v2101_v59  ;;  %v608_v7 = vrot.slane %v2101_v59, 4 }
 0x18c   :  { %v2542_v48 = vsel %vm234_vm0, %v2527_v10, %v560_v43  ;;  %v571_v13 = vsel %vm234_vm0, %v570_v46, %v1971_v17  ;;  %v595_v8 = vsel %vm234_vm0, %v594_v51, %v2077_v45  ;;  %v444_v44 = vrot.slane %v401_v62, 4  ;;  %v3513_v43 = vld [vmem:[#allocation27_spill] sm:$0xff] }
 0x18d   :  { %3511 = vst [vmem:[#allocation34_spill] sm:$0xff] %v2542_v48  ;;  %v596_v39 = vrot.slane %v2077_v45, 4  ;;  %v618_v4 = vrot.slane %v2535_v12, 4  ;;  %v613_v15 = vperm.slane %v607_v47, %v2121_v9  ;;  %v2556_v57 = vsel %vm234_vm0, %v454_v21, %v2320_v16 }
 0x18e   :  { %1226 = vrot.lane.b32.xlu2 %v2492_v3, %s1924_s29  ;;  %v609_v33 = vsel %vm234_vm0, %v2144_v24, %v608_v7  ;;  %v542_v0 = vrot.slane %v2259_v61, 4  ;;  %v2563_v59 = vsel %vm234_vm0, %v2423_v34, %v444_v44  ;;  %v566_v45 = vrot.slane %v2292_v31, 4  ;;  %v218_v7 = vpop.permute.xlu0 %217  ;;  %v3514_v44 = vld [vmem:[#allocation25_spill] sm:$0xff] }
 0x18f   :  { %v577_v62 = vperm.slane %v571_v13, %v2121_v9  ;;  %v601_v28 = vperm.slane %v595_v8, %v2121_v9  ;;  %v584_v24 = vrot.slane %v2019_v25, 4  ;;  %v597_v61 = vsel %vm234_vm0, %v2199_v37, %v596_v39 }
 0x190   :  { %v2576_v16 = vperm.slane %v609_v33, %v2121_v9  ;;  %v642_v34 = vrot.slane %v613_v15, 4  ;;  %v2583_v23 = vsel %vm234_vm0, %v566_v45, %v2230_v29  ;;  %v450_v19 = vrot.slane %v2432_v54, 4 }
 0x191   :  { %1216 = vrot.lane.b32.xlu0 %v2515_v40, %s1924_s29  ;;  %v619_v55 = vsel %vm234_vm0, %v618_v4, %v577_v62  ;;  %v585_v31 = vsel %vm234_vm0, %v2083_v49, %v584_v24  ;;  %3512 = vst [vmem:[#allocation35_spill] sm:$0xff] %v2583_v23  ;;  %v543_v25 = vsel %vm234_vm0, %v542_v0, %v2224_v38  ;;  %v556_v1 = vrot.slane %v2481_v6, 4  ;;  %v3515_v4 = vld [vmem:[#allocation26_spill] sm:$0xff] }
 0x192   :  { %1206 = vrot.lane.b32.xlu1 %v2522_v60, %s1924_s29  ;;  %v605_v37 = vperm.slane %v597_v61, %v2121_v9  ;;  %v643_v2 = vsel %vm234_vm0, %v642_v34, %v601_v28  ;;  %v572_v49 = vrot.slane %v1971_v17, 4  ;;  %v2595_v46 = vperm.slane %v619_v55, %v2159_v14 }
 0x193   :  { %v593_v29 = vperm.slane %v585_v31, %v2121_v9  ;;  %v654_v54 = vrot.slane %v2576_v16, 4  ;;  %v2601_v38 = vsel %vm234_vm0, %v2452_v32, %v556_v1  ;;  %v549_v51 = vperm.slane %v543_v25, %v2159_v14  ;;  %v3517_v1 = vld [vmem:[#allocation23_spill] sm:$0xff] }
 0x194   :  { %v518_v21 = vrot.slane %v3513_v43, 4  ;;  %v644_v6 = vrot.slane %v601_v28, 4  ;;  %v2607_v47 = vsel %vm234_vm0, %v450_v19, %v2414_v22  ;;  %v2612_v17 = vperm.slane %v643_v2, %v2159_v14 }
 0x195   :  { %v655_v13 = vsel %vm234_vm0, %v654_v54, %v605_v37  ;;  %v573_v32 = vsel %vm234_vm0, %v2054_v35, %v572_v49  ;;  %v668_v8 = vrot.slane %v2595_v46, 4  ;;  %v630_v39 = vrot.slane %v593_v29, 4 }
 0x196   :  { %1232 = vrot.lane.b32.xlu2 %v2542_v48, %s1924_s29  ;;  %v519_v22 = vsel %vm234_vm0, %v518_v21, %v3514_v44  ;;  %v706_v33 = vrot.slane %v3515_v4, 4  ;;  %v562_v0 = vrot.slane %v549_v51, 4  ;;  %v558_v28 = vrot.slane %v2527_v10, 4  ;;  %v3518_v21 = vld [vmem:[#allocation21_spill] sm:$0xff] }
 0x197   :  { %v2625_v45 = vsel %vm234_vm0, %v2612_v17, %v668_v8  ;;  %v2629_v24 = vperm.slane %v655_v13, %v2159_v14  ;;  %v645_v35 = vsel %vm234_vm0, %v613_v15, %v644_v6  ;;  %v581_v61 = vperm.slane %v573_v32, %v2121_v9  ;;  %v3520_v8 = vld [vmem:[#allocation18_spill] sm:$0xff] }
 0x198   :  { %3516 = vst [vmem:[#allocation27_spill] sm:$0xff] %v2625_v45  ;;  %v718_v34 = vrot.slane %v218_v7, 4  ;;  %v525_v55 = vperm.slane %v519_v22, %v2159_v14  ;;  %v2641_v10 = vperm.slane %v645_v35, %v2159_v14  ;;  %v620_v25 = vrot.slane %v577_v62, 4  ;;  %v3519_v62 = vld [vmem:[#allocation11_spill] sm:$0xff] }
 0x199   :  { %1222 = vrot.lane.b32.xlu0 %v2556_v57, %s1924_s29  ;;  %v631_v19 = vsel %vm234_vm0, %v630_v39, %v581_v61  ;;  %v707_v15 = vsel %vm234_vm0, %v706_v33, %v3517_v1  ;;  %v2647_v2 = vsel %vm234_vm0, %v558_v28, %v2504_v52  ;;  %v674_v49 = vrot.slane %v2629_v24, 4  ;;  %v3522_v28 = vld [vmem:[#allocation13_spill] sm:$0xff] }
 0x19a   :  { %1212 = vrot.lane.b32.xlu1 %v2563_v59, %s1924_s29  ;;  %v2637_v31 = vsel %vm234_vm0, %v562_v0, %v525_v55  ;;  %v632_v54 = vrot.slane %v581_v61, 4  ;;  %v656_v43 = vrot.slane %v605_v37, 4  ;;  %v719_v6 = vsel %vm234_vm0, %v718_v34, %v3518_v21  ;;  %v3523_v61 = vld [vmem:[#allocation6_spill] sm:$0xff] }
 0x19b   :  { %v682_v13 = vrot.slane %v3519_v62, 4  ;;  %v637_v32 = vperm.slane %v631_v19, %v2159_v14  ;;  %v621_v52 = vsel %vm234_vm0, %v2535_v12, %v620_v25  ;;  %v694_v44 = vrot.slane %v3520_v8, 4 }
 0x19c   :  { %v633_v22 = vsel %vm234_vm0, %v593_v29, %v632_v54  ;;  %v713_v39 = vperm.slane %v707_v15, %v2121_v9  ;;  %v670_v37 = vrot.slane %v2641_v10, 4  ;;  %v725_v33 = vperm.slane %v719_v6, %v2121_v9 }
 0x19d   :  { %v2666_v0 = vsel %vm234_vm0, %v674_v49, %v637_v32  ;;  %v696_v35 = vrot.slane %v3522_v28, 4  ;;  %v2672_v12 = vperm.slane %v621_v52, %v2159_v14  ;;  %v657_v29 = vsel %vm234_vm0, %v2576_v16, %v656_v43 }
 0x19e   :  { %1238 = vrot.lane.b32.xlu2 %v2583_v23, %s1924_s29  ;;  %3521 = vst [vmem:[#allocation25_spill] sm:$0xff] %v2666_v0  ;;  %v683_v34 = vsel %vm234_vm0, %v682_v13, %v3523_v61  ;;  %v564_v19 = vrot.slane %v525_v55, 4  ;;  %v2679_v25 = vperm.slane %v633_v22, %v2159_v14  ;;  %v695_v15 = vsel %vm234_vm0, %v694_v44, %v3522_v28 }
 0x19f   :  { %v697_v49 = vsel %vm234_vm0, %v3520_v8, %v696_v35  ;;  %v756_v54 = vrot.slane %v713_v39, 4  ;;  %v2687_v6 = vsel %vm234_vm0, %v670_v37, %v2672_v12  ;;  %v720_v16 = vrot.slane %v3518_v21, 4 }
 0x1a0   :  { %v754_v43 = vrot.slane %v725_v33, 4  ;;  %v2691_v13 = vsel %vm234_vm0, %v549_v51, %v564_v19  ;;  %v2696_v55 = vperm.slane %v657_v29, %v2159_v14  ;;  %v689_v52 = vperm.slane %v683_v34, %v2121_v9 }
 0x1a1   :  { %1228 = vrot.lane.b32.xlu0 %v2601_v38, %s1924_s29  ;;  %v757_v8 = vsel %vm234_vm0, %v725_v33, %v756_v54  ;;  %v701_v44 = vperm.slane %v695_v15, %v2121_v9  ;;  %v721_v21 = vsel %vm234_vm0, %v218_v7, %v720_v16  ;;  %v680_v51 = vrot.slane %v2679_v25, 4 }
 0x1a2   :  { %1218 = vrot.lane.b32.xlu1 %v2607_v47, %s1924_s29  ;;  %v684_v22 = vrot.slane %v3523_v61, 4  ;;  %v2707_v37 = vperm.slane %v697_v49, %v2121_v9  ;;  %v666_v35 = vrot.slane %v2612_v17, 4  ;;  %v765_v29 = vperm.slane %v757_v8, %v2159_v14  ;;  %v3526_v8 = vld [vmem:[#allocation16_spill] sm:$0xff] }
 0x1a3   :  { %v2711_v28 = vsel %vm234_vm0, %v2696_v55, %v680_v51  ;;  %v755_v33 = vsel %vm234_vm0, %v754_v43, %v713_v39  ;;  %v732_v34 = vrot.slane %v689_v52, 4  ;;  %v729_v7 = vperm.slane %v721_v21, %v2121_v9 }
 0x1a4   :  { %3524 = vst [vmem:[#allocation26_spill] sm:$0xff] %v2711_v28  ;;  %v676_v61 = vrot.slane %v637_v32, 4  ;;  %v685_v19 = vsel %vm234_vm0, %v3519_v62, %v684_v22  ;;  %v730_v15 = vrot.slane %v701_v44, 4  ;;  %v708_v49 = vrot.slane %v3517_v1, 4 }
 0x1a5   :  { %v742_v54 = vrot.slane %v2707_v37, 4  ;;  %v733_v39 = vsel %vm234_vm0, %v701_v44, %v732_v34  ;;  %v2729_v16 = vperm.slane %v755_v33, %v2159_v14  ;;  %v2735_v62 = vsel %vm234_vm0, %v666_v35, %v2595_v46  ;;  %v3527_v35 = vld [vmem:[#allocation17_spill] sm:$0xff] }
 0x1a6   :  { %1244 = vrot.lane.b32.xlu2 %v2625_v45, %s1924_s29  ;;  %v2725_v17 = vsel %vm234_vm0, %v2629_v24, %v676_v61  ;;  %v709_v32 = vsel %vm234_vm0, %v3515_v4, %v708_v49  ;;  %v782_v1 = vrot.slane %v765_v29, 4  ;;  %v693_v43 = vperm.slane %v685_v19, %v2121_v9  ;;  %v3529_v49 = vld [vmem:[#allocation10_spill] sm:$0xff]  ;;  %v3553_v45 = vld [vmem:[#allocation24_spill] sm:$0xff] }
 0x1a7   :  { %3525 = vst [vmem:[#allocation23_spill] sm:$0xff] %v2725_v17  ;;  %v766_v24 = vrot.slane %v729_v7, 4  ;;  %v806_v44 = vrot.slane %v3526_v8, 4  ;;  %v741_v21 = vperm.slane %v733_v39, %v2159_v14  ;;  %v731_v4 = vsel %vm234_vm0, %v730_v15, %v689_v52 }
 0x1a8   :  { %v717_v51 = vperm.slane %v709_v32, %v2121_v9  ;;  %v778_v46 = vrot.slane %v2729_v16, 4  ;;  %v743_v22 = vsel %vm234_vm0, %v742_v54, %v693_v43  ;;  %v794_v33 = vrot.slane %v3527_v35, 4 }
 0x1a9   :  { %1234 = vrot.lane.b32.xlu0 %v2637_v31, %s1924_s29  ;;  %v2750_v34 = vsel %vm234_vm0, %v782_v1, %v741_v21  ;;  %v737_v61 = vperm.slane %v731_v4, %v2159_v14  ;;  %v807_v52 = vsel %vm234_vm0, %v806_v44, %v3529_v49  ;;  %v672_v39 = vrot.slane %v2672_v12, 4  ;;  %v3531_v1 = vld [vmem:[#allocation5_spill] sm:$0xff] }
 0x1aa   :  { %1230 = vrot.lane.b32.xlu1 %v2647_v2, %s1924_s29  ;;  %3528 = vst [vmem:[#allocation21_spill] sm:$0xff] %v2750_v34  ;;  %v767_v19 = vsel %vm234_vm0, %v766_v24, %v717_v51  ;;  %v2762_v54 = vperm.slane %v743_v22, %v2159_v14  ;;  %v813_v12 = vperm.slane %v807_v52, %v2121_v9  ;;  %v768_v44 = vrot.slane %v717_v51, 4 }
 0x1ab   :  { %v2765_v32 = vsel %vm234_vm0, %v778_v46, %v737_v61  ;;  %v2771_v4 = vsel %vm234_vm0, %v2641_v10, %v672_v39  ;;  %v2776_v24 = vperm.slane %v767_v19, %v2159_v14  ;;  %v678_v39 = vrot.slane %v2696_v55, 4 }
 0x1ac   :  { %3530 = vst [vmem:[#allocation11_spill] sm:$0xff] %v2765_v32  ;;  %v788_v46 = vrot.slane %v2762_v54, 4  ;;  %v873_v19 = vperm.slane %v2463_v50, %v2159_v14  ;;  %v842_v52 = vrot.slane %v813_v12, 4  ;;  %v784_v51 = vrot.slane %v741_v21, 4 }
 0x1ad   :  { %3532 = vst [vmem:[#allocation18_spill] sm:$0xff] %v2771_v4  ;;  %v744_v55 = vrot.slane %v693_v43, 4  ;;  %v2804_v50 = vsel %vm234_vm0, %v678_v39, %v2679_v25  ;;  %v3536_v39 = vld [vmem:[#allocation20_spill] sm:$0xff] }
 0x1ae   :  { %1250 = vrot.lane.b32.xlu2 %v2666_v0, %s1924_s29  ;;  %v2786_v10 = vsel %vm234_vm0, %v2776_v24, %v788_v46  ;;  %3535 = vst [vmem:[#allocation16_spill] sm:$0xff] %v2804_v50  ;;  %v890_v21 = vrot.slane %v873_v19, 4 }
 0x1af   :  { %3533 = vst [vmem:[#allocation13_spill] sm:$0xff] %v2786_v10 }
 0x1b1   :  { %1246 = vrot.lane.b32.xlu0 %v2687_v6, %s1924_s29 }
 0x1b2   :  { %1236 = vrot.lane.b32.xlu1 %v2691_v13, %s1924_s29 }
 0x1b6   :  { %1256 = vrot.lane.b32.xlu2 %v2711_v28, %s1924_s29 }
 0x1b9   :  { %1252 = vrot.lane.b32.xlu0 %v2725_v17, %s1924_s29  ;;  %v3559_v17 = vld [vmem:[#allocation14_spill] sm:$0xff] }
 0x1ba   :  { %1242 = vrot.lane.b32.xlu1 %v2735_v62, %s1924_s29 }
 0x1be   :  { %1262 = vrot.lane.b32.xlu2 %v2750_v34, %s1924_s29  ;;  %v2758_v15 = vpop.permute.xlu2 %1208  ;;  %v795_v34 = vsel %vm234_vm0, %v794_v33, %v3531_v1  ;;  %v769_v33 = vsel %vm234_vm0, %v729_v7, %v768_v44 }
 0x1bf   :  { %v801_v22 = vperm.slane %v795_v34, %v2121_v9  ;;  %v2796_v34 = vsel %vm234_vm0, %v765_v29, %v784_v51  ;;  %v2800_v44 = vperm.slane %v769_v33, %v2159_v14  ;;  %v796_v29 = vrot.slane %v3531_v1, 4 }
 0x1c0   :  { %3534 = vst [vmem:[#allocation6_spill] sm:$0xff] %v2796_v34 }
 0x1c1   :  { %1258 = vrot.lane.b32.xlu0 %v2765_v32, %s1924_s29  ;;  %v844_v0 = vrot.slane %v801_v22, 4  ;;  %v843_v7 = vsel %vm234_vm0, %v842_v52, %v801_v22  ;;  %v745_v22 = vsel %vm234_vm0, %v2707_v37, %v744_v55  ;;  %v790_v43 = vrot.slane %v2800_v44, 4 }
 0x1c2   :  { %1248 = vrot.lane.b32.xlu1 %v2771_v4, %s1924_s29  ;;  %v849_v46 = vperm.slane %v843_v7, %v2159_v14  ;;  %v797_v25 = vsel %vm234_vm0, %v3527_v35, %v796_v29  ;;  %v918_v52 = vrot.slane %v3536_v39, 4  ;;  %v753_v1 = vperm.slane %v745_v22, %v2159_v14  ;;  %v3541_v22 = vld [vmem:[#allocation15_spill] sm:$0xff] }
 0x1c3   :  { %v845_v33 = vsel %vm234_vm0, %v813_v12, %v844_v0  ;;  %v780_v7 = vrot.slane %v737_v61, 4  ;;  %v808_v55 = vrot.slane %v3529_v49, 4  ;;  %v805_v0 = vperm.slane %v797_v25, %v2121_v9 }
 0x1c4   :  { %v2820_v51 = vsel %vm234_vm0, %v890_v21, %v849_v46  ;;  %v2826_v37 = vperm.slane %v845_v33, %v2159_v14  ;;  %v2833_v35 = vsel %vm234_vm0, %v790_v43, %v753_v1  ;;  %v3539_v21 = vld [vmem:[#allocation9_spill] sm:$0xff]  ;;  %v2845_v61 = vperm.slane %v2476_v36, %v2159_v14 }
 0x1c5   :  { %3537 = vst [vmem:[#allocation17_spill] sm:$0xff] %v2820_v51  ;;  %v919_v29 = vsel %vm234_vm0, %v918_v52, %v3539_v21  ;;  %v809_v49 = vsel %vm234_vm0, %v3526_v8, %v808_v55  ;;  %v906_v43 = vrot.slane %v3541_v22, 4  ;;  %v856_v25 = vrot.slane %v805_v0, 4 }
 0x1c6   :  { %1268 = vrot.lane.b32.xlu2 %v2786_v10, %s1924_s29  ;;  %v2793_v28 = vpop.permute.xlu2 %1196  ;;  %3538 = vst [vmem:[#allocation10_spill] sm:$0xff] %v2833_v35  ;;  %v896_v33 = vrot.slane %v2826_v37, 4  ;;  %v817_v52 = vperm.slane %v809_v49, %v2121_v9  ;;  %v889_v8 = vperm.slane %v2341_v18, %v2159_v14  ;;  %v892_v55 = vrot.slane %v849_v46, 4  ;;  %v3543_v10 = vld [vmem:[#allocation7_spill] sm:$0xff] }
 0x1c8   :  { %v2859_v36 = vsel %vm234_vm0, %v2845_v61, %v896_v33  ;;  %v2872_v49 = vsel %vm234_vm0, %v873_v19, %v892_v55  ;;  %v857_v33 = vsel %vm234_vm0, %v817_v52, %v856_v25  ;;  %v854_v18 = vrot.slane %v817_v52, 4  ;;  %v2889_v25 = vpop.permute.xlu0 %223 }
 0x1c9   :  { %1264 = vrot.lane.b32.xlu0 %v2796_v34, %s1924_s29  ;;  %3542 = vst [vmem:[#allocation20_spill] sm:$0xff] %v2859_v36  ;;  %v920_v19 = vrot.slane %v3539_v21, 4 }
 0x1ca   :  { %1254 = vrot.lane.b32.xlu1 %v2804_v50, %s1924_s29  ;;  %3544 = vst [vmem:[#allocation9_spill] sm:$0xff] %v2872_v49  ;;  %v855_v52 = vsel %vm234_vm0, %v854_v18, %v805_v0 }
 0x1cb   :  { %v921_v55 = vsel %vm234_vm0, %v3536_v39, %v920_v19  ;;  %v2903_v21 = vperm.slane %v855_v52, %v2159_v14 }
 0x1cc   :  { %v929_v0 = vperm.slane %v921_v55, %v2121_v9  ;;  %v3551_v55 = vld [vmem:[#allocation31_spill] sm:$0xff] }
 0x1ce   :  { %1274 = vrot.lane.b32.xlu2 %v2820_v51, %s1924_s29  ;;  %v2830_v12 = vpop.permute.xlu2 %1202  ;;  %v2839_v51 = vsel %vm234_vm0, %v2729_v16, %v780_v7  ;;  %v2854_v16 = vperm.slane %v919_v29, %v2121_v9  ;;  %v786_v7 = vrot.slane %v2776_v24, 4  ;;  %v2877_v24 = vperm.slane %v2486_v30, %v2159_v14 }
 0x1cf   :  { %3540 = vst [vmem:[#allocation5_spill] sm:$0xff] %v2839_v51  ;;  %v865_v30 = vperm.slane %v857_v33, %v2159_v14 }
 0x1d0   :  { %v954_v29 = vrot.slane %v2854_v16, 4  ;;  %v2881_v46 = vsel %vm234_vm0, %v786_v7, %v2762_v54  ;;  %v898_v54 = vrot.slane %v2877_v24, 4 }
 0x1d1   :  { %1270 = vrot.lane.b32.xlu0 %v2833_v35, %s1924_s29  ;;  %v907_v35 = vsel %vm234_vm0, %v906_v43, %v3543_v10  ;;  %3545 = vst [vmem:[#allocation15_spill] sm:$0xff] %v2881_v46  ;;  %v902_v43 = vrot.slane %v889_v8, 4 }
 0x1d2   :  { %1260 = vrot.lane.b32.xlu1 %v2839_v51, %s1924_s29  ;;  %v2913_v39 = vsel %vm234_vm0, %v898_v54, %v2903_v21  ;;  %v966_v54 = vrot.slane %v929_v0, 4 }
 0x1d3   :  { %3547 = vst [vmem:[#allocation36_spill] sm:$0xff] %v2913_v39 }
 0x1d6   :  { %1280 = vrot.lane.b32.xlu2 %v2859_v36, %s1924_s29  ;;  %v913_v36 = vperm.slane %v907_v35, %v2121_v9  ;;  %v2898_v35 = vsel %vm234_vm0, %v902_v43, %v865_v30 }
 0x1d7   :  { %3546 = vst [vmem:[#allocation7_spill] sm:$0xff] %v2898_v35 }
 0x1d8   :  { %v2869_v34 = vpop.permute.xlu2 %1214  ;;  %v955_v7 = vsel %vm234_vm0, %v954_v29, %v913_v36  ;;  %v908_v29 = vrot.slane %v3543_v10, 4 }
 0x1d9   :  { %1276 = vrot.lane.b32.xlu0 %v2872_v49, %s1924_s29  ;;  %v792_v49 = vrot.slane %v753_v1, 4  ;;  %v2906_v33 = vperm.slane %v955_v7, %v2159_v14  ;;  %v2924_v1 = vperm.slane %v2496_v20, %v2159_v14  ;;  %v894_v20 = vrot.slane %v2845_v61, 4 }
 0x1da   :  { %1266 = vrot.lane.b32.xlu1 %v2881_v46, %s1924_s29  ;;  %v909_v19 = vsel %vm234_vm0, %v3541_v22, %v908_v29  ;;  %v1054_v22 = vrot.slane %v2889_v25, 4  ;;  %v904_v29 = vrot.slane %v865_v30, 4  ;;  %v2955_v61 = vperm.slane %v2507_v11, %v2159_v14  ;;  %v3556_v11 = vld [vmem:[#allocation12_spill] sm:$0xff] }
 0x1db   :  { %v2918_v43 = vsel %vm234_vm0, %v2800_v44, %v792_v49  ;;  %v1004_v10 = vrot.slane %v2906_v33, 4  ;;  %v3549_v44 = vld [vmem:[#allocation28_spill] sm:$0xff]  ;;  %v2961_v51 = vsel %vm234_vm0, %v894_v20, %v2826_v37  ;;  %v3557_v20 = vld [vmem:[#allocation19_spill] sm:$0xff] }
 0x1dc   :  { %3548 = vst [vmem:[#allocation37_spill] sm:$0xff] %v2918_v43  ;;  %v1042_v49 = vrot.slane %v3549_v44, 4  ;;  %v2950_v46 = vsel %vm234_vm0, %v889_v8, %v904_v29  ;;  %v3555_v29 = vld [vmem:[#allocation22_spill] sm:$0xff] }
 0x1dd   :  { %v2936_v7 = vsel %vm234_vm0, %v2924_v1, %v1004_v10  ;;  %3552 = vst [vmem:[#allocation31_spill] sm:$0xff] %v2950_v46 }
 0x1de   :  { %1286 = vrot.lane.b32.xlu2 %v2898_v35, %s1924_s29  ;;  %3550 = vst [vmem:[#allocation28_spill] sm:$0xff] %v2936_v7  ;;  %v2941_v35 = vperm.slane %v3551_v55, %v2159_v14  ;;  %v956_v55 = vrot.slane %v913_v36, 4  ;;  %v1018_v36 = vrot.slane %v3556_v11, 4 }
 0x1df   :  { %3554 = vst [vmem:[#allocation24_spill] sm:$0xff] %v2961_v51 }
 0x1e0   :  { %v2909_v18 = vpop.permute.xlu2 %1220  ;;  %v1010_v8 = vrot.slane %v2941_v35, 4  ;;  %v957_v37 = vsel %vm234_vm0, %v2854_v16, %v956_v55  ;;  %v3560_v55 = vld [vmem:[#allocation8_spill] sm:$0xff] }
 0x1e1   :  { %1282 = vrot.lane.b32.xlu0 %v2913_v39, %s1924_s29  ;;  %v917_v39 = vperm.slane %v909_v19, %v2121_v9  ;;  %v1043_v19 = vsel %vm234_vm0, %v1042_v49, %v3553_v45  ;;  %v2990_v16 = vperm.slane %v957_v37, %v2159_v14 }
 0x1e2   :  { %1272 = vrot.lane.b32.xlu1 %v2918_v43, %s1924_s29 }
 0x1e3   :  { %v2930_v52 = vpop.permute.xlu0 %1240  ;;  %v967_v10 = vsel %vm234_vm0, %v966_v54, %v917_v39  ;;  %v968_v30 = vrot.slane %v917_v39, 4  ;;  %v1055_v54 = vsel %vm234_vm0, %v1054_v22, %v3555_v29  ;;  %v1049_v39 = vperm.slane %v1043_v19, %v2121_v9 }
 0x1e4   :  { %v973_v49 = vperm.slane %v967_v10, %v2159_v14  ;;  %v1006_v22 = vrot.slane %v2955_v61, 4  ;;  %v1032_v10 = vrot.slane %v3559_v17, 4  ;;  %v1019_v19 = vsel %vm234_vm0, %v1018_v36, %v3560_v55 }
 0x1e5   :  { %v969_v32 = vsel %vm234_vm0, %v929_v0, %v968_v30  ;;  %v1925_v0 = vmov 0   ;;  %v900_v30 = vrot.slane %v2903_v21, 4  ;;  %v1092_v37 = vrot.slane %v1049_v39, 4 }
 0x1e6   :  { %1292 = vrot.lane.b32.xlu2 %v2936_v7, %s1924_s29  ;;  %v2984_v50 = vsel %vm234_vm0, %v1010_v8, %v973_v49  ;;  %1887 = vset.pattern.permute.xlu0 %v1925_v0  ;;  %v3006_v4 = vsel %vm234_vm0, %v1006_v22, %v2990_v16  ;;  %v1056_v21 = vrot.slane %v3555_v29, 4 }
 0x1e7   :  { %3558 = vst [vmem:[#allocation22_spill] sm:$0xff] %v2984_v50  ;;  %1886 = vset.pattern.permute.xlu2 %v1925_v0  ;;  %1885 = vset.pattern.permute.xlu1 %v1925_v0  ;;  %v1020_v0 = vrot.slane %v3560_v55, 4  ;;  %v1012_v55 = vrot.slane %v973_v49, 4 }
 0x1e8   :  { %v2947_v43 = vpop.permute.xlu2 %1226  ;;  %3562 = vst [vmem:[#allocation19_spill] sm:$0xff] %v3006_v4 }
 0x1e9   :  { %1288 = vrot.lane.b32.xlu0 %v2950_v46, %s1924_s29  ;;  %v1030_v46 = vrot.slane %v3557_v20, 4 }
 0x1ea   :  { %1278 = vrot.lane.b32.xlu1 %v2961_v51, %s1924_s29  ;;  %v1061_v51 = vperm.slane %v1055_v54, %v2121_v9  ;;  %v2996_v54 = vperm.slane %v969_v32, %v2159_v14  ;;  %v3011_v32 = vsel %vm234_vm0, %v2877_v24, %v900_v30  ;;  %v1057_v24 = vsel %vm234_vm0, %v2889_v25, %v1056_v21 }
 0x1eb   :  { %v2971_v7 = vpop.permute.xlu0 %1198  ;;  %v1031_v8 = vsel %vm234_vm0, %v1030_v46, %v3559_v17  ;;  %3563 = vst [vmem:[#allocation14_spill] sm:$0xff] %v3011_v32  ;;  %v3017_v17 = vperm.slane %v2511_v26, %v2159_v14  ;;  %v1025_v46 = vperm.slane %v1019_v19, %v2121_v9  ;;  %v1065_v21 = vperm.slane %v1057_v24, %v2121_v9 }
 0x1ec   :  { %v2979_v23 = vpop.permute.xlu1 %1224  ;;  %v1090_v36 = vrot.slane %v1061_v51, 4  ;;  %v1037_v29 = vperm.slane %v1031_v8, %v2121_v9 }
 0x1ed   :  { %v1102_v24 = vrot.slane %v1065_v21, 4 }
 0x1ee   :  { %1298 = vrot.lane.b32.xlu2 %v2984_v50, %s1924_s29  ;;  %v1033_v50 = vsel %vm234_vm0, %v3557_v20, %v1032_v10  ;;  %v1093_v20 = vsel %vm234_vm0, %v1061_v51, %v1092_v37  ;;  %v1016_v10 = vrot.slane %v2996_v54, 4  ;;  %v1002_v51 = vrot.slane %v2924_v1, 4 }
 0x1ef   :  { %v1041_v26 = vperm.slane %v1033_v50, %v2121_v9  ;;  %v1101_v8 = vperm.slane %v1093_v20, %v2159_v14  ;;  %v1091_v25 = vsel %vm234_vm0, %v1090_v36, %v1049_v39  ;;  %v1068_v37 = vrot.slane %v1025_v46, 4 }
 0x1f0   :  { %v3002_v48 = vpop.permute.xlu2 %1232  ;;  %v3035_v19 = vsel %vm234_vm0, %v3017_v17, %v1016_v10  ;;  %v1021_v50 = vsel %vm234_vm0, %v3556_v11, %v1020_v0  ;;  %v1044_v10 = vrot.slane %v3553_v45, 4  ;;  %v3050_v1 = vsel %vm234_vm0, %v2941_v35, %v1012_v55 }
 0x1f1   :  { %3561 = vst [vmem:[#allocation12_spill] sm:$0xff] %v3002_v48  ;;  %1294 = vrot.lane.b32.xlu0 %v3006_v4, %s1924_s29  ;;  %v1066_v4 = vrot.slane %v1037_v29, 4  ;;  %v1069_v39 = vsel %vm234_vm0, %v1037_v29, %v1068_v37  ;;  %v1097_v36 = vperm.slane %v1091_v25, %v2159_v14  ;;  %v3058_v11 = vsel %vm234_vm0, %v1002_v51, %v2906_v33 }
 0x1f2   :  { %1284 = vrot.lane.b32.xlu1 %v3011_v32, %s1924_s29  ;;  %v1078_v32 = vrot.slane %v1041_v26, 4  ;;  %v1045_v49 = vsel %vm234_vm0, %v3549_v44, %v1044_v10  ;;  %v1118_v45 = vrot.slane %v1101_v8, 4  ;;  %v1029_v20 = vperm.slane %v1021_v50, %v2121_v9 }
 0x1f3   :  { %v3026_v22 = vpop.permute.xlu0 %1204  ;;  %v1077_v29 = vperm.slane %v1069_v39, %v2159_v14  ;;  %v1067_v44 = vsel %vm234_vm0, %v1066_v4, %v1025_v46  ;;  %v1053_v0 = vperm.slane %v1045_v49, %v2121_v9  ;;  %v1114_v51 = vrot.slane %v1097_v36, 4 }
 0x1f4   :  { %v3031_v30 = vpop.permute.xlu1 %1194  ;;  %v1079_v25 = vsel %vm234_vm0, %v1078_v32, %v1029_v20  ;;  %v1073_v55 = vperm.slane %v1067_v44, %v2159_v14  ;;  %v1008_v10 = vrot.slane %v2990_v16, 4 }
 0x1f5   :  { %v3072_v37 = vsel %vm234_vm0, %v1118_v45, %v1077_v29  ;;  %v1103_v50 = vsel %vm234_vm0, %v1102_v24, %v1053_v0  ;;  %v1085_v4 = vperm.slane %v1079_v25, %v2159_v14  ;;  %v1104_v16 = vrot.slane %v1053_v0, 4 }
 0x1f6   :  { %1304 = vrot.lane.b32.xlu2 %v3035_v19, %s1924_s29  ;;  %3564 = vst [vmem:[#allocation8_spill] sm:$0xff] %v3072_v37  ;;  %v3083_v9 = vsel %vm234_vm0, %v1114_v51, %v1073_v55  ;;  %v3087_v32 = vsel %vm234_vm0, %v2955_v61, %v1008_v10  ;;  %v1109_v39 = vperm.slane %v1103_v50, %v2159_v14  ;;  %v1014_v61 = vrot.slane %v3017_v17, 4 }
 0x1f7   :  { %v1124_v45 = vrot.slane %v1085_v4, 4  ;;  %v1105_v44 = vsel %vm234_vm0, %v1065_v21, %v1104_v16  ;;  %v1120_v25 = vrot.slane %v1077_v29, 4 }
 0x1f8   :  { %v3046_v48 = vpop.permute.xlu2 %1238  ;;  %v1113_v0 = vperm.slane %v1105_v44, %v2159_v14  ;;  %v3109_v21 = vsel %vm234_vm0, %v1014_v61, %v2996_v54  ;;  %v1116_v44 = vrot.slane %v1073_v55, 4 }
 0x1f9   :  { %1300 = vrot.lane.b32.xlu0 %v3050_v1, %s1924_s29  ;;  %v3096_v51 = vsel %vm234_vm0, %v1109_v39, %v1124_v45  ;;  %v3104_v50 = vsel %vm234_vm0, %v1101_v8, %v1120_v25  ;;  %v1386_v8 = vmax.f32 %v2429_v53, %v3031_v30 }
 0x1fa   :  { %1290 = vrot.lane.b32.xlu1 %v3058_v11, %s1924_s29  ;;  %v1126_v45 = vrot.slane %v1113_v0, 4  ;;  %v3125_v25 = vsel %vm234_vm0, %v1097_v36, %v1116_v44 }
 0x1fb   :  { %v3065_v35 = vpop.permute.xlu0 %1210 }
 0x1fc   :  { %v1201_v33 = vpop.permute.xlu1 %1200 }
 0x1fe   :  { %1310 = vrot.lane.b32.xlu2 %v3072_v37, %s1924_s29  ;;  %v1080_v37 = vrot.slane %v1029_v20, 4 }
 0x200   :  { %v3080_v46 = vpop.permute.xlu2 %1244  ;;  %v1081_v29 = vsel %vm234_vm0, %v1041_v26, %v1080_v37  ;;  %v1389_v26 = vmax.f32 %v2470_v41, %v1201_v33  ;;  %v3565_v37 = vld [vmem:[#allocation30_spill] sm:$0xff] }
 0x201   :  { %1306 = vrot.lane.b32.xlu0 %v3083_v9, %s1924_s29  ;;  %v1089_v20 = vperm.slane %v1081_v29, %v2159_v14  ;;  %v1122_v14 = vrot.slane %v1109_v39, 4  ;;  %v1387_v55 = vmax.f32 %v3565_v37, %v2793_v28 }
 0x202   :  { %1296 = vrot.lane.b32.xlu1 %v3087_v32, %s1924_s29 }
 0x203   :  { %v1217_v49 = vpop.permute.xlu0 %1216  ;;  %v3122_v61 = vsel %vm234_vm0, %v1126_v45, %v1089_v20  ;;  %v3137_v36 = vsel %vm234_vm0, %v1122_v14, %v1085_v4  ;;  %v1391_v45 = vmax.f32 %v2420_v42, %v3026_v22  ;;  %v1128_v39 = vrot.slane %v1089_v20, 4 }
 0x204   :  { %v1207_v24 = vpop.permute.xlu1 %1206  ;;  %v1397_v20 = vmax.f32 %v2515_v40, %v1217_v49  ;;  %v3567_v40 = vld [vmem:[#allocation33_spill] sm:$0xff] }
 0x205   :  { %v1392_v33 = vmax.f32 %v2522_v60, %v1207_v24  ;;  %v3147_v28 = vsel %vm234_vm0, %v1113_v0, %v1128_v39  ;;  %v3566_v60 = vld [vmem:[#allocation29_spill] sm:$0xff]  ;;  %v1390_v49 = vmax.f32 %v3567_v40, %v2830_v12 }
 0x206   :  { %1316 = vrot.lane.b32.xlu2 %v3096_v51, %s1924_s29  ;;  %v1393_v22 = vmax.f32 %v3566_v60, %v2758_v15  ;;  %v3570_v60 = vld [vmem:[#allocation12_spill] sm:$0xff] }
 0x208   :  { %v3101_v10 = vpop.permute.xlu2 %1250 }
 0x209   :  { %1312 = vrot.lane.b32.xlu0 %v3104_v50, %s1924_s29 }
 0x20a   :  { %1302 = vrot.lane.b32.xlu1 %v3109_v21, %s1924_s29 }
 0x20b   :  { %v1223_v17 = vpop.permute.xlu0 %1222 }
 0x20c   :  { %v1213_v16 = vpop.permute.xlu1 %1212  ;;  %v1400_v15 = vmax.f32 %v2556_v57, %v1223_v17  ;;  %v1396_v57 = vmax.f32 %v2399_v63, %v2869_v34  ;;  %v3568_v63 = vld [vmem:[#allocation32_spill] sm:$0xff] }
 0x20d   :  { %v1395_v42 = vmax.f32 %v2563_v59, %v1213_v16  ;;  %v1409_v34 = vmax.f32 %v3568_v63, %v2930_v52  ;;  %v3571_v52 = vld [vmem:[#allocation34_spill] sm:$0xff]  ;;  %v3579_v63 = vld [vmem:[#allocation15_spill] sm:$0xff] }
 0x20e   :  { %1515 = vperm.xlu2 %1886, %v1386_v8  }
 0x210   :  { %v3119_v54 = vpop.permute.xlu2 %1256 }
 0x211   :  { %1318 = vrot.lane.b32.xlu0 %v3122_v61, %s1924_s29 }
 0x212   :  { %1308 = vrot.lane.b32.xlu1 %v3125_v25, %s1924_s29 }
 0x213   :  { %v1229_v53 = vpop.permute.xlu0 %1228 }
 0x214   :  { %v1219_v30 = vpop.permute.xlu1 %1218 }
 0x216   :  { %1524 = vperm.xlu2 %1886, %v1389_v26   ;;  %v1394_v26 = vmax.f32 %v2466_v56, %v3065_v35  ;;  %v1388_v56 = vmax.f32 %v2365_v58, %v2971_v7 }
 0x218   :  { %v3134_v29 = vpop.permute.xlu2 %1262 }
 0x219   :  { %1518 = vperm.xlu0 %1887, %v1387_v55   ;;  %v1398_v55 = vmax.f32 %v2607_v47, %v1219_v30  ;;  %v1403_v47 = vmax.f32 %v2601_v38, %v1229_v53  ;;  %v1399_v38 = vmax.f32 %v2449_v5, %v2909_v18 }
 0x21a   :  { %1314 = vrot.lane.b32.xlu1 %v3137_v36, %s1924_s29 }
 0x21b   :  { %v1235_v8 = vpop.permute.xlu0 %1234 }
 0x21c   :  { %v1231_v41 = vpop.permute.xlu1 %1230 }
 0x21d   :  { %v1404_v30 = vmax.f32 %v2647_v2, %v1231_v41 }
 0x21e   :  { %1530 = vperm.xlu2 %1886, %v1391_v45   ;;  %v1401_v45 = vmax.f32 %v2373_v27, %v2979_v23  ;;  %v1406_v23 = vmax.f32 %v2637_v31, %v1235_v8  ;;  %v1402_v31 = vmax.f32 %v2492_v3, %v2947_v43  ;;  %v3572_v3 = vld [vmem:[#allocation23_spill] sm:$0xff] }
 0x220   :  { %v3144_v44 = vpop.permute.xlu2 %1268 }
 0x221   :  { %1533 = vperm.xlu0 %1887, %v1392_v33  }
 0x222   :  { %1320 = vrot.lane.b32.xlu1 %v3147_v28, %s1924_s29 }
 0x223   :  { %v1247_v4 = vpop.permute.xlu0 %1246 }
 0x224   :  { %v1237_v14 = vpop.permute.xlu1 %1236 }
 0x225   :  { %v1407_v39 = vmax.f32 %v2691_v13, %v1237_v14  ;;  %v1412_v13 = vmax.f32 %v2687_v6, %v1247_v4  ;;  %v3569_v14 = vld [vmem:[#allocation18_spill] sm:$0xff]  ;;  %v3574_v6 = vld [vmem:[#allocation35_spill] sm:$0xff] }
 0x226   :  { %1539 = vperm.xlu2 %1886, %v1394_v26   ;;  %v1408_v4 = vmax.f32 %v3574_v6, %v3046_v48  ;;  %v3578_v48 = vld [vmem:[#allocation6_spill] sm:$0xff] }
 0x228   :  { %v3156_v24 = vpop.permute.xlu2 %1274 }
 0x229   :  { %1542 = vperm.xlu0 %1887, %v1395_v42  }
 0x22a   :  { %1536 = vperm.xlu1 %1885, %v1393_v22   ;;  %v1405_v22 = vmax.f32 %v3571_v52, %v3570_v60 }
 0x22b   :  { %v1253_v0 = vpop.permute.xlu0 %1252 }
 0x22c   :  { %v1243_v37 = vpop.permute.xlu1 %1242  ;;  %v1415_v43 = vmax.f32 %v3572_v3, %v1253_v0  ;;  %v3577_v0 = vld [vmem:[#allocation27_spill] sm:$0xff] }
 0x22d   :  { %v1410_v26 = vmax.f32 %v2735_v62, %v1243_v37 }
 0x22e   :  { %1548 = vperm.xlu2 %1886, %v1397_v20  }
 0x230   :  { %v3162_v35 = vpop.permute.xlu2 %1280 }
 0x231   :  { %1551 = vperm.xlu0 %1887, %v1398_v55   ;;  %v3573_v55 = vld [vmem:[#allocation16_spill] sm:$0xff] }
 0x232   :  { %1521 = vperm.xlu1 %1885, %v1388_v56  }
 0x233   :  { %v1259_v59 = vpop.permute.xlu0 %1258 }
 0x234   :  { %v1249_v16 = vpop.permute.xlu1 %1248 }
 0x235   :  { %v1413_v42 = vmax.f32 %v3569_v14, %v1249_v16 }
 0x236   :  { %1557 = vperm.xlu2 %1886, %v1400_v15  }
 0x238   :  { %v3169_v33 = vpop.permute.xlu2 %1286 }
 0x239   :  { %1560 = vperm.xlu0 %1887, %v1401_v45   ;;  %v3575_v45 = vld [vmem:[#allocation11_spill] sm:$0xff] }
 0x23a   :  { %1527 = vperm.xlu1 %1885, %v1390_v49   ;;  %v1418_v40 = vmax.f32 %v3575_v45, %v1259_v59  ;;  %v3580_v59 = vld [vmem:[#allocation25_spill] sm:$0xff] }
 0x23b   :  { %v1265_v58 = vpop.permute.xlu0 %1264 }
 0x23c   :  { %v1255_v7 = vpop.permute.xlu1 %1254 }
 0x23d   :  { %v1416_v56 = vmax.f32 %v3573_v55, %v1255_v7  ;;  %v3585_v55 = vld [vmem:[#allocation24_spill] sm:$0xff] }
 0x23e   :  { %1566 = vperm.xlu2 %1886, %v1403_v47   ;;  %v3576_v47 = vld [vmem:[#allocation5_spill] sm:$0xff] }
 0x240   :  { %v3175_v17 = vpop.permute.xlu2 %1292 }
 0x241   :  { %1569 = vperm.xlu0 %1887, %v1404_v30  }
 0x242   :  { %1545 = vperm.xlu1 %1885, %v1396_v57   ;;  %v1411_v57 = vmax.f32 %v3577_v0, %v3080_v46  ;;  %v3581_v46 = vld [vmem:[#allocation10_spill] sm:$0xff] }
 0x243   :  { %v1271_v27 = vpop.permute.xlu0 %1270 }
 0x244   :  { %v1261_v12 = vpop.permute.xlu1 %1260 }
 0x245   :  { %v1419_v30 = vmax.f32 %v3576_v47, %v1261_v12 }
 0x246   :  { %1575 = vperm.xlu2 %1886, %v1406_v23  }
 0x248   :  { %v3181_v53 = vpop.permute.xlu2 %1298 }
 0x249   :  { %1578 = vperm.xlu0 %1887, %v1407_v39   ;;  %v1421_v39 = vmax.f32 %v3578_v48, %v1265_v58  ;;  %v3583_v58 = vld [vmem:[#allocation26_spill] sm:$0xff] }
 0x24a   :  { %1554 = vperm.xlu1 %1885, %v1399_v38   ;;  %v1417_v52 = vmax.f32 %v3583_v58, %v3119_v54  ;;  %v3587_v54 = vld [vmem:[#allocation36_spill] sm:$0xff] }
 0x24b   :  { %v1277_v2 = vpop.permute.xlu0 %1276 }
 0x24c   :  { %v1267_v41 = vpop.permute.xlu1 %1266 }
 0x24e   :  { %1584 = vperm.xlu2 %1886, %v1409_v34   ;;  %v1422_v34 = vmax.f32 %v3579_v63, %v1267_v41 }
 0x250   :  { %v3188_v8 = vpop.permute.xlu2 %1304 }
 0x251   :  { %1587 = vperm.xlu0 %1887, %v1410_v26   ;;  %v1414_v26 = vmax.f32 %v3580_v59, %v3101_v10  ;;  %v3592_v59 = vld [vmem:[#allocation19_spill] sm:$0xff] }
 0x252   :  { %1563 = vperm.xlu1 %1885, %v1402_v31  }
 0x253   :  { %v1283_v5 = vpop.permute.xlu0 %1282 }
 0x254   :  { %v1273_v18 = vpop.permute.xlu1 %1272 }
 0x256   :  { %1593 = vperm.xlu2 %1886, %v1412_v13   ;;  %v1424_v13 = vmax.f32 %v3581_v46, %v1271_v27  ;;  %v3586_v27 = vld [vmem:[#allocation21_spill] sm:$0xff]  ;;  %v3593_v46 = vld [vmem:[#allocation20_spill] sm:$0xff] }
 0x257   :  { %v1420_v6 = vmax.f32 %v3586_v27, %v3134_v29 }
 0x258   :  { %v3194_v20 = vpop.permute.xlu2 %1310 }
 0x259   :  { %1596 = vperm.xlu0 %1887, %v1413_v42   ;;  %v3582_v42 = vld [vmem:[#allocation37_spill] sm:$0xff] }
 0x25a   :  { %1572 = vperm.xlu1 %1885, %v1405_v22   ;;  %v1425_v60 = vmax.f32 %v3582_v42, %v1273_v18  ;;  %v3584_v22 = vld [vmem:[#allocation9_spill] sm:$0xff] }
 0x25b   :  { %v1289_v62 = vpop.permute.xlu0 %1288  ;;  %v1427_v10 = vmax.f32 %v3584_v22, %v1277_v2 }
 0x25c   :  { %v1279_v37 = vpop.permute.xlu1 %1278 }
 0x25e   :  { %1602 = vperm.xlu2 %1886, %v1415_v43  }
 0x260   :  { %v3200_v15 = vpop.permute.xlu2 %1316 }
 0x261   :  { %1605 = vperm.xlu0 %1887, %v1416_v56   ;;  %v1428_v56 = vmax.f32 %v3585_v55, %v1279_v37 }
 0x262   :  { %1581 = vperm.xlu1 %1885, %v1408_v4   ;;  %v1430_v4 = vmax.f32 %v3587_v54, %v1283_v5  ;;  %v3591_v5 = vld [vmem:[#allocation17_spill] sm:$0xff] }
 0x263   :  { %v1295_v16 = vpop.permute.xlu0 %1294  ;;  %v1426_v63 = vmax.f32 %v3591_v5, %v3156_v24 }
 0x264   :  { %v1285_v49 = vpop.permute.xlu1 %1284 }
 0x266   :  { %1611 = vperm.xlu2 %1886, %v1418_v40   ;;  %v3588_v40 = vld [vmem:[#allocation14_spill] sm:$0xff] }
 0x267   :  { %v1431_v47 = vmax.f32 %v3588_v40, %v1285_v49 }
 0x268   :  { %v3206_v23 = vpop.permute.xlu2 %1515 }
 0x269   :  { %1614 = vperm.xlu0 %1887, %v1419_v30   ;;  %v3589_v30 = vld [vmem:[#allocation13_spill] sm:$0xff] }
 0x26a   :  { %1590 = vperm.xlu1 %1885, %v1411_v57   ;;  %v1423_v0 = vmax.f32 %v3589_v30, %v3144_v44  ;;  %v3590_v57 = vld [vmem:[#allocation31_spill] sm:$0xff]  ;;  %v1436_v44 = vmax.f32 %v3592_v59, %v1295_v16 }
 0x26b   :  { %v1301_v7 = vpop.permute.xlu0 %1300  ;;  %v1433_v29 = vmax.f32 %v3590_v57, %v1289_v62  ;;  %v3594_v16 = vld [vmem:[#allocation7_spill] sm:$0xff] }
 0x26c   :  { %v1291_v38 = vpop.permute.xlu1 %1290  ;;  %v1432_v58 = vmax.f32 %v3594_v16, %v3169_v33 }
 0x26e   :  { %1620 = vperm.xlu2 %1886, %v1421_v39   ;;  %v1434_v39 = vmax.f32 %v3058_v11, %v1291_v38  ;;  %v1439_v38 = vmax.f32 %v3050_v1, %v1301_v7  ;;  %v3595_v7 = vld [vmem:[#allocation28_spill] sm:$0xff] }
 0x270   :  { %v3212_v12 = vpop.permute.xlu2 %1524 }
 0x271   :  { %1623 = vperm.xlu0 %1887, %v1422_v34  }
 0x272   :  { %1599 = vperm.xlu1 %1885, %v1414_v26  }
 0x273   :  { %v1307_v31 = vpop.permute.xlu0 %1306 }
 0x274   :  { %v1297_v14 = vpop.permute.xlu1 %1296 }
 0x275   :  { %v1437_v62 = vmax.f32 %v3087_v32, %v1297_v14  ;;  %v1442_v14 = vmax.f32 %v3083_v9, %v1307_v31 }
 0x276   :  { %1629 = vperm.xlu2 %1886, %v1424_v13   ;;  %v1429_v13 = vmax.f32 %v3593_v46, %v3162_v35  ;;  %v3597_v46 = vld [vmem:[#allocation8_spill] sm:$0xff] }
 0x278   :  { %v3221_v43 = vpop.permute.xlu2 %1530 }
 0x279   :  { %1632 = vperm.xlu0 %1887, %v1425_v60  }
 0x27a   :  { %1608 = vperm.xlu1 %1885, %v1417_v52   ;;  %v1706_v52 = vlaneseq }
 0x27b   :  { %v3218_v41 = vpop.permute.xlu0 %1312 }
 0x27c   :  { %v1303_v3 = vpop.permute.xlu1 %1302  ;;  %v3256_v35 = vand.u32 127, %v1706_v52  ;;  %v1445_v27 = vmax.f32 %v3104_v50, %v3218_v41  ;;  %v3596_v41 = vld [vmem:[#allocation22_spill] sm:$0xff] }
 0x27d   :  { %v1440_v60 = vmax.f32 %v3109_v21, %v1303_v3  ;;  %v1435_v3 = vmax.f32 %v3595_v7, %v3175_v17  ;;  %v1438_v40 = vmax.f32 %v3596_v41, %v3181_v53 }
 0x27e   :  { %1638 = vperm.xlu2 %1886, %v1427_v10   ;;  %v1708_v55 = vperm.slane %v3206_v23, %v3256_v35 }
 0x280   :  { %v3230_v2 = vpop.permute.xlu2 %1539 }
 0x281   :  { %1641 = vperm.xlu0 %1887, %v1428_v56  }
 0x282   :  { %1617 = vperm.xlu1 %1885, %v1420_v6   ;;  %v1713_v6 = vperm.slane %v3221_v43, %v3256_v35 }
 0x283   :  { %v3226_v18 = vpop.permute.xlu0 %1318 }
 0x284   :  { %v1309_v45 = vpop.permute.xlu1 %1308  ;;  %v1448_v57 = vmax.f32 %v3122_v61, %v3226_v18 }
 0x285   :  { %v1443_v21 = vmax.f32 %v3125_v25, %v1309_v45  ;;  %v1711_v25 = vperm.slane %v3212_v12, %v3256_v35 }
 0x286   :  { %1647 = vperm.xlu2 %1886, %v1430_v4  }
 0x288   :  { %v3240_v34 = vpop.permute.xlu2 %1548 }
 0x289   :  { %1650 = vperm.xlu0 %1887, %v1431_v47   ;;  %v1719_v61 = vperm.slane %v3240_v34, %v3256_v35 }
 0x28a   :  { %1626 = vperm.xlu1 %1885, %v1423_v0  }
 0x28b   :  { %v1519_v37 = vpop.permute.xlu0 %1518 }
 0x28c   :  { %v3235_v48 = vpop.permute.xlu1 %1314  ;;  %v1709_v1 = vperm.slane %v1519_v37, %v3256_v35 }
 0x28d   :  { %v1446_v4 = vmax.f32 %v3137_v36, %v3235_v48 }
 0x28e   :  { %1656 = vperm.xlu2 %1886, %v1433_v29   ;;  %v1773_v9 = vsel %vm1772_vm1, %v1709_v1, %v1708_v55  ;;  %v1716_v29 = vperm.slane %v3230_v2, %v3256_v35 }
 0x290   :  { %v3248_v11 = vpop.permute.xlu2 %1557 }
 0x291   :  { %1659 = vperm.xlu0 %1887, %v1434_v39  }
 0x292   :  { %1635 = vperm.xlu1 %1885, %v1426_v63   ;;  %v1441_v63 = vmax.f32 %v3035_v19, %v3188_v8  ;;  %v1722_v19 = vperm.slane %v3248_v11, %v3256_v35  ;;  %v1447_v11 = vmax.f32 %v3096_v51, %v3200_v15 }
 0x293   :  { %v1534_v49 = vpop.permute.xlu0 %1533 }
 0x294   :  { %v3243_v26 = vpop.permute.xlu1 %1320  ;;  %v1714_v12 = vperm.slane %v1534_v49, %v3256_v35 }
 0x295   :  { %v1449_v39 = vmax.f32 %v3147_v28, %v3243_v26 }
 0x296   :  { %1665 = vperm.xlu2 %1886, %v1436_v44  }
 0x298   :  { %v3259_v10 = vpop.permute.xlu2 %1566 }
 0x299   :  { %1668 = vperm.xlu0 %1887, %v1437_v62   ;;  %v1725_v52 = vperm.slane %v3259_v10, %v3256_v35 }
 0x29a   :  { %1644 = vperm.xlu1 %1885, %v1429_v13   ;;  %v1444_v13 = vmax.f32 %v3597_v46, %v3194_v20 }
 0x29b   :  { %v1543_v24 = vpop.permute.xlu0 %1542 }
 0x29c   :  { %v1537_v42 = vpop.permute.xlu1 %1536  ;;  %v1717_v36 = vperm.slane %v1543_v24, %v3256_v35 }
 0x29d   :  { %v1715_v47 = vperm.slane %v1537_v42, %v3256_v35 }
 0x29e   :  { %1674 = vperm.xlu2 %1886, %v1439_v38   ;;  %v1786_v5 = vsel %vm1772_vm1, %v1717_v36, %v1716_v29 }
 0x2a0   :  { %v1576_v45 = vpop.permute.xlu2 %1575 }
 0x2a1   :  { %1677 = vperm.xlu0 %1887, %v1440_v60   ;;  %v1728_v51 = vperm.slane %v1576_v45, %v3256_v35 }
 0x2a2   :  { %1653 = vperm.xlu1 %1885, %v1432_v58  }
 0x2a3   :  { %v3254_v32 = vpop.permute.xlu0 %1551 }
 0x2a4   :  { %v1522_v22 = vpop.permute.xlu1 %1521  ;;  %v1720_v44 = vperm.slane %v3254_v32, %v3256_v35 }
 0x2a5   :  { %v1710_v33 = vperm.slane %v1522_v22, %v3256_v35 }
 0x2a6   :  { %1683 = vperm.xlu2 %1886, %v1442_v14  }
 0x2a7   :  { %v1775_v31 = vsel %vm1774_vm2, %v1710_v33, %v1773_v9 }
 0x2a8   :  { %v1777_v54 = vsel %vm1776_vm3, %v1711_v25, %v1775_v31  ;;  %v1585_v18 = vpop.permute.xlu2 %1584 }
 0x2a9   :  { %1686 = vperm.xlu0 %1887, %v1443_v21   ;;  %v1731_v31 = vperm.slane %v1585_v18, %v3256_v35 }
 0x2aa   :  { %1662 = vperm.xlu1 %1885, %v1435_v3  }
 0x2ab   :  { %v1561_v56 = vpop.permute.xlu0 %1560 }
 0x2ac   :  { %v1528_v17 = vpop.permute.xlu1 %1527  ;;  %v1723_v62 = vperm.slane %v1561_v56, %v3256_v35 }
 0x2ad   :  { %v1712_v23 = vperm.slane %v1528_v17, %v3256_v35 }
 0x2ae   :  { %1692 = vperm.xlu2 %1886, %v1445_v27  }
 0x2af   :  { %v1779_v50 = vsel %vm1778_vm4, %v1712_v23, %v1777_v54 }
 0x2b0   :  { %v1781_v43 = vsel %vm1780_vm5, %v1713_v6, %v1779_v50  ;;  %v1594_v42 = vpop.permute.xlu2 %1593 }
 0x2b1   :  { %v1783_v30 = vsel %vm1782_vm6, %v1714_v12, %v1781_v43  ;;  %1695 = vperm.xlu0 %1887, %v1446_v4   ;;  %v1734_v50 = vperm.slane %v1594_v42, %v3256_v35 }
 0x2b2   :  { %v1785_v0 = vsel %vm1784_vm7, %v1715_v47, %v1783_v30  ;;  %1671 = vperm.xlu1 %1885, %v1438_v40  }
 0x2b3   :  { %1844 = vst.msk [vmem:[#allocation2] sm:$0xff] %vm1843_vm8, %v1785_v0  ;;  %v1570_v37 = vpop.permute.xlu0 %1569 }
 0x2b4   :  { %v1546_v53 = vpop.permute.xlu1 %1545  ;;  %v1726_v22 = vperm.slane %v1570_v37, %v3256_v35 }
 0x2b5   :  { %v1718_v48 = vperm.slane %v1546_v53, %v3256_v35 }
 0x2b6   :  { %1701 = vperm.xlu2 %1886, %v1448_v57  }
 0x2b7   :  { %v1787_v49 = vsel %vm1774_vm2, %v1718_v48, %v1786_v5 }
 0x2b8   :  { %v1788_v2 = vsel %vm1776_vm3, %v1719_v61, %v1787_v49  ;;  %v1603_v1 = vpop.permute.xlu2 %1602 }
 0x2b9   :  { %1704 = vperm.xlu0 %1887, %v1449_v39   ;;  %v1789_v8 = vsel %vm1778_vm4, %v1720_v44, %v1788_v2  ;;  %v1737_v37 = vperm.slane %v1603_v1, %v3256_v35 }
 0x2ba   :  { %1680 = vperm.xlu1 %1885, %v1441_v63  }
 0x2bb   :  { %v1579_v59 = vpop.permute.xlu0 %1578 }
 0x2bc   :  { %v1555_v28 = vpop.permute.xlu1 %1554  ;;  %v1729_v10 = vperm.slane %v1579_v59, %v3256_v35 }
 0x2bd   :  { %v1721_v26 = vperm.slane %v1555_v28, %v3256_v35 }
 0x2bf   :  { %v1790_v34 = vsel %vm1780_vm5, %v1721_v26, %v1789_v8 }
 0x2c0   :  { %v1791_v24 = vsel %vm1782_vm6, %v1722_v19, %v1790_v34  ;;  %v1612_v25 = vpop.permute.xlu2 %1611 }
 0x2c1   :  { %v1792_v38 = vsel %vm1784_vm7, %v1723_v62, %v1791_v24  ;;  %v1740_v2 = vperm.slane %v1612_v25, %v3256_v35 }
 0x2c2   :  { %1845 = vst.msk [vmem:[#allocation2 + $0x8] sm:$0xff] %vm1843_vm8, %v1792_v38  ;;  %1689 = vperm.xlu1 %1885, %v1444_v13  }
 0x2c3   :  { %v1588_v60 = vpop.permute.xlu0 %1587 }
 0x2c4   :  { %v1564_v16 = vpop.permute.xlu1 %1563  ;;  %v1732_v4 = vperm.slane %v1588_v60, %v3256_v35 }
 0x2c5   :  { %v1724_v58 = vperm.slane %v1564_v16, %v3256_v35 }
 0x2c7   :  { %v1793_v32 = vsel %vm1772_vm1, %v1725_v52, %v1724_v58 }
 0x2c8   :  { %v1794_v33 = vsel %vm1774_vm2, %v1726_v22, %v1793_v32  ;;  %v1621_v12 = vpop.permute.xlu2 %1620 }
 0x2c9   :  { %v1743_v8 = vperm.slane %v1621_v12, %v3256_v35 }
 0x2ca   :  { %1698 = vperm.xlu1 %1885, %v1447_v11  }
 0x2cb   :  { %v1597_v20 = vpop.permute.xlu0 %1596 }
 0x2cc   :  { %v1573_v14 = vpop.permute.xlu1 %1572  ;;  %v1735_v43 = vperm.slane %v1597_v20, %v3256_v35 }
 0x2cd   :  { %v1727_v21 = vperm.slane %v1573_v14, %v3256_v35 }
 0x2cf   :  { %v1795_v7 = vsel %vm1776_vm3, %v1727_v21, %v1794_v33 }
 0x2d0   :  { %v1796_v15 = vsel %vm1778_vm4, %v1728_v51, %v1795_v7  ;;  %v1630_v57 = vpop.permute.xlu2 %1629 }
 0x2d1   :  { %v1797_v56 = vsel %vm1780_vm5, %v1729_v10, %v1796_v15  ;;  %v1746_v24 = vperm.slane %v1630_v57, %v3256_v35 }
 0x2d3   :  { %v1606_v3 = vpop.permute.xlu0 %1605 }
 0x2d4   :  { %v1582_v55 = vpop.permute.xlu1 %1581  ;;  %v1738_v29 = vperm.slane %v1606_v3, %v3256_v35 }
 0x2d5   :  { %v1730_v9 = vperm.slane %v1582_v55, %v3256_v35 }
 0x2d7   :  { %v1798_v27 = vsel %vm1782_vm6, %v1730_v9, %v1797_v56 }
 0x2d8   :  { %v1799_v17 = vsel %vm1784_vm7, %v1731_v31, %v1798_v27  ;;  %v1639_v59 = vpop.permute.xlu2 %1638 }
 0x2d9   :  { %1846 = vst.msk [vmem:[#allocation2 + $0x10] sm:$0xff] %vm1843_vm8, %v1799_v17  ;;  %v1749_v22 = vperm.slane %v1639_v59, %v3256_v35 }
 0x2db   :  { %v1615_v23 = vpop.permute.xlu0 %1614 }
 0x2dc   :  { %v1591_v6 = vpop.permute.xlu1 %1590  ;;  %v1741_v61 = vperm.slane %v1615_v23, %v3256_v35 }
 0x2dd   :  { %v1733_v54 = vperm.slane %v1591_v6, %v3256_v35 }
 0x2de   :  { %v1807_v26 = vsel %vm1772_vm1, %v1741_v61, %v1740_v2 }
 0x2df   :  { %v1800_v45 = vsel %vm1772_vm1, %v1733_v54, %v1732_v4 }
 0x2e0   :  { %v1801_v40 = vsel %vm1774_vm2, %v1734_v50, %v1800_v45  ;;  %v1648_v42 = vpop.permute.xlu2 %1647 }
 0x2e1   :  { %v1802_v0 = vsel %vm1776_vm3, %v1735_v43, %v1801_v40  ;;  %v1752_v10 = vperm.slane %v1648_v42, %v3256_v35 }
 0x2e3   :  { %v1624_v41 = vpop.permute.xlu0 %1623 }
 0x2e4   :  { %v1600_v47 = vpop.permute.xlu1 %1599  ;;  %v1744_v34 = vperm.slane %v1624_v41, %v3256_v35 }
 0x2e5   :  { %v1736_v30 = vperm.slane %v1600_v47, %v3256_v35 }
 0x2e7   :  { %v1803_v36 = vsel %vm1778_vm4, %v1736_v30, %v1802_v0 }
 0x2e8   :  { %v1804_v53 = vsel %vm1780_vm5, %v1737_v37, %v1803_v36  ;;  %v1657_v14 = vpop.permute.xlu2 %1656 }
 0x2e9   :  { %v1805_v63 = vsel %vm1782_vm6, %v1738_v29, %v1804_v53  ;;  %v1755_v17 = vperm.slane %v1657_v14, %v3256_v35 }
 0x2eb   :  { %v1633_v39 = vpop.permute.xlu0 %1632 }
 0x2ec   :  { %v1609_v48 = vpop.permute.xlu1 %1608  ;;  %v1747_v60 = vperm.slane %v1633_v39, %v3256_v35 }
 0x2ed   :  { %v1739_v5 = vperm.slane %v1609_v48, %v3256_v35 }
 0x2ef   :  { %v1806_v49 = vsel %vm1784_vm7, %v1739_v5, %v1805_v63 }
 0x2f0   :  { %1847 = vst.msk [vmem:[#allocation2 + $0x18] sm:$0xff] %vm1843_vm8, %v1806_v49  ;;  %v1666_v55 = vpop.permute.xlu2 %1665 }
 0x2f1   :  { %v1758_v47 = vperm.slane %v1666_v55, %v3256_v35 }
 0x2f3   :  { %v1642_v28 = vpop.permute.xlu0 %1641 }
 0x2f4   :  { %v1618_v18 = vpop.permute.xlu1 %1617  ;;  %v1750_v7 = vperm.slane %v1642_v28, %v3256_v35 }
 0x2f5   :  { %v1742_v44 = vperm.slane %v1618_v18, %v3256_v35 }
 0x2f7   :  { %v1808_v19 = vsel %vm1774_vm2, %v1742_v44, %v1807_v26 }
 0x2f8   :  { %v1809_v62 = vsel %vm1776_vm3, %v1743_v8, %v1808_v19  ;;  %v1675_v12 = vpop.permute.xlu2 %1674 }
 0x2f9   :  { %v1810_v38 = vsel %vm1778_vm4, %v1744_v34, %v1809_v62  ;;  %v1761_v48 = vperm.slane %v1675_v12, %v3256_v35 }
 0x2fb   :  { %v1651_v58 = vpop.permute.xlu0 %1650 }
 0x2fc   :  { %v1627_v46 = vpop.permute.xlu1 %1626  ;;  %v1753_v31 = vperm.slane %v1651_v58, %v3256_v35 }
 0x2fd   :  { %v1745_v13 = vperm.slane %v1627_v46, %v3256_v35 }
 0x2ff   :  { %v1811_v16 = vsel %vm1780_vm5, %v1745_v13, %v1810_v38 }
 0x300   :  { %v1812_v11 = vsel %vm1782_vm6, %v1746_v24, %v1811_v16  ;;  %v1684_v37 = vpop.permute.xlu2 %1683 }
 0x301   :  { %v1813_v52 = vsel %vm1784_vm7, %v1747_v60, %v1812_v11  ;;  %v1764_v26 = vperm.slane %v1684_v37, %v3256_v35 }
 0x302   :  { %1848 = vst.msk [vmem:[#allocation2 + $0x20] sm:$0xff] %vm1843_vm8, %v1813_v52 }
 0x303   :  { %v1660_v1 = vpop.permute.xlu0 %1659 }
 0x304   :  { %v1636_v20 = vpop.permute.xlu1 %1635  ;;  %v1756_v41 = vperm.slane %v1660_v1, %v3256_v35 }
 0x305   :  { %v1748_v32 = vperm.slane %v1636_v20, %v3256_v35 }
 0x307   :  { %v1814_v21 = vsel %vm1772_vm1, %v1749_v22, %v1748_v32 }
 0x308   :  { %v1815_v15 = vsel %vm1774_vm2, %v1750_v7, %v1814_v21  ;;  %v1693_v2 = vpop.permute.xlu2 %1692 }
 0x309   :  { %v1767_v34 = vperm.slane %v1693_v2, %v3256_v35 }
 0x30b   :  { %v1669_v56 = vpop.permute.xlu0 %1668 }
 0x30c   :  { %v1645_v33 = vpop.permute.xlu1 %1644  ;;  %v1759_v0 = vperm.slane %v1669_v56, %v3256_v35 }
 0x30d   :  { %v1751_v51 = vperm.slane %v1645_v33, %v3256_v35 }
 0x30f   :  { %v1816_v3 = vsel %vm1776_vm3, %v1751_v51, %v1815_v15 }
 0x310   :  { %v1817_v9 = vsel %vm1778_vm4, %v1752_v10, %v1816_v3  ;;  %v1702_v46 = vpop.permute.xlu2 %1701 }
 0x311   :  { %v1818_v23 = vsel %vm1780_vm5, %v1753_v31, %v1817_v9  ;;  %v1770_v16 = vperm.slane %v1702_v46, %v3256_v35 }
 0x313   :  { %v1678_v50 = vpop.permute.xlu0 %1677 }
 0x314   :  { %v1654_v25 = vpop.permute.xlu1 %1653  ;;  %v1762_v5 = vperm.slane %v1678_v50, %v3256_v35 }
 0x315   :  { %v1754_v27 = vperm.slane %v1654_v25, %v3256_v35 }
 0x317   :  { %v1819_v6 = vsel %vm1782_vm6, %v1754_v27, %v1818_v23 }
 0x318   :  { %v1820_v54 = vsel %vm1784_vm7, %v1755_v17, %v1819_v6 }
 0x319   :  { %1849 = vst.msk [vmem:[#allocation2 + $0x28] sm:$0xff] %vm1843_vm8, %v1820_v54 }
 0x31b   :  { %v1687_v53 = vpop.permute.xlu0 %1686 }
 0x31c   :  { %v1663_v4 = vpop.permute.xlu1 %1662  ;;  %v1765_v44 = vperm.slane %v1687_v53, %v3256_v35 }
 0x31d   :  { %v1757_v45 = vperm.slane %v1663_v4, %v3256_v35 }
 0x31e   :  { %v1828_v8 = vsel %vm1772_vm1, %v1765_v44, %v1764_v26 }
 0x31f   :  { %v1821_v40 = vsel %vm1772_vm1, %v1757_v45, %v1756_v41 }
 0x320   :  { %v1822_v43 = vsel %vm1774_vm2, %v1758_v47, %v1821_v40 }
 0x321   :  { %v1823_v57 = vsel %vm1776_vm3, %v1759_v0, %v1822_v43 }
 0x323   :  { %v1696_v59 = vpop.permute.xlu0 %1695 }
 0x324   :  { %v1672_v30 = vpop.permute.xlu1 %1671  ;;  %v1768_v24 = vperm.slane %v1696_v59, %v3256_v35 }
 0x325   :  { %v1760_v36 = vperm.slane %v1672_v30, %v3256_v35 }
 0x327   :  { %v1824_v29 = vsel %vm1778_vm4, %v1760_v36, %v1823_v57 }
 0x328   :  { %v1825_v39 = vsel %vm1780_vm5, %v1761_v48, %v1824_v29 }
 0x329   :  { %v1826_v61 = vsel %vm1782_vm6, %v1762_v5, %v1825_v39 }
 0x32b   :  { %v1705_v38 = vpop.permute.xlu0 %1704 }
 0x32c   :  { %v1681_v63 = vpop.permute.xlu1 %1680  ;;  %v1771_v58 = vperm.slane %v1705_v38, %v3256_v35 }
 0x32d   :  { %v1763_v49 = vperm.slane %v1681_v63, %v3256_v35 }
 0x32f   :  { %v1827_v18 = vsel %vm1784_vm7, %v1763_v49, %v1826_v61 }
 0x330   :  { %1850 = vst.msk [vmem:[#allocation2 + $0x30] sm:$0xff] %vm1843_vm8, %v1827_v18 }
 0x334   :  { %v1690_v28 = vpop.permute.xlu1 %1689 }
 0x335   :  { %v1766_v19 = vperm.slane %v1690_v28, %v3256_v35 }
 0x337   :  { %v1829_v62 = vsel %vm1774_vm2, %v1766_v19, %v1828_v8 }
 0x338   :  { %v1830_v13 = vsel %vm1776_vm3, %v1767_v34, %v1829_v62 }
 0x339   :  { %v1831_v11 = vsel %vm1778_vm4, %v1768_v24, %v1830_v13 }
 0x33c   :  { %v1699_v42 = vpop.permute.xlu1 %1698 }
 0x33d   :  { %v1769_v60 = vperm.slane %v1699_v42, %v3256_v35 }
 0x33f   :  { %v1832_v52 = vsel %vm1780_vm5, %v1769_v60, %v1831_v11 }
 0x340   :  { %v1833_v20 = vsel %vm1782_vm6, %v1770_v16, %v1832_v52 }
 0x341   :  { %v1834_v32 = vsel %vm1784_vm7, %v1771_v58, %v1833_v20 }
 0x342   :  { %1851 = vst.msk [vmem:[#allocation2 + $0x38] sm:$0xff] %vm1843_vm8, %v1834_v32 }
 0x343   :  { %1864 = dma.vmem_to_hbm [thread:$0]  %s1857_s2, 1024, %s1859_s5, [#allocation3], %s1927_s6, %s1927_s6, %s1928_s1  }
 0x344   :  { %1912 = dma.done.wait [#allocation3], 1024  }
 0x345   :  { %1913 = vsyncadd [#allocation3], 4294966272 }
 0x346   :  { %1869 = vsyncpa [#allocation3], 1 }

</bundles_post_ra>
